<compile_context>
chip_gen: v5e
topology: v5e:2x2
jax: 0.10.0
libtpu: 0.0.40
codegen_flags: <defaults>
</compile_context>

<pallas_src>
import functools

import jax
import jax.numpy as jnp
from jax.experimental import pallas as pl
from jax.experimental.pallas import tpu as pltpu

ODE_UNFOLDS = 6
EPS = 1e-8


# ----------------------------------------------------------------------------
# Kernel A: conv1 as a lane-dense GEMM  (Cout,K) @ (K,M) + bias -> relu -> bf16
# ----------------------------------------------------------------------------
def _conv1_kernel(a_ref, b_ref, bias_ref, o_ref):
    y = jnp.dot(a_ref[...], b_ref[...], preferred_element_type=jnp.float32)
    y = jnp.maximum(y + bias_ref[...], 0.0)
    o_ref[...] = y.astype(o_ref.dtype)


def conv1_gemm(wmat, patches, bias, tile_m=None):
    """wmat:(Cout,K) bf16, patches:(K,M) bf16, bias:(Cout,1) f32 -> (Cout,M) bf16.

    Default tile_m=None -> grid=(1,) (best on v5e/v6e: single TC, no per-step
    pipeline overhead).  On v7x a balanced 2-way split (tile_m=M//2 rounded up
    to 128) could use both TensorCores, but at this size it is in the noise.
    """
    Cout, K = wmat.shape
    _, M = patches.shape
    tm = M if tile_m is None else min(tile_m, M)
    grid = (pl.cdiv(M, tm),)
    return pl.pallas_call(
        _conv1_kernel,
        out_shape=jax.ShapeDtypeStruct((Cout, M), jnp.bfloat16),
        grid=grid,
        in_specs=[
            pl.BlockSpec((Cout, K), lambda i: (0, 0)),
            pl.BlockSpec((K, tm), lambda i: (0, i)),
            pl.BlockSpec((Cout, 1), lambda i: (0, 0)),
        ],
        out_specs=pl.BlockSpec((Cout, tm), lambda i: (0, i)),
        compiler_params=pltpu.CompilerParams(dimension_semantics=("parallel",)),
    )(wmat, patches, bias)


# ----------------------------------------------------------------------------
# XLA glue: im2col for conv1 (on the raw input) and patch extraction for conv2
# (on kernel A's output).  Both run fused under jit.
# ----------------------------------------------------------------------------
def _im2col_cf(x, kh, kw, stride):
    # x: (C, N, H, W) -> (C*kh*kw, N*Ho*Wo); K order (c,i,j), M order (n,ho,wo)
    C, N, H, W = x.shape
    Ho = (H - kh) // stride + 1
    Wo = (W - kw) // stride + 1
    cols = []
    for i in range(kh):
        for j in range(kw):
            cols.append(x[:, :, i:i + stride * Ho:stride, j:j + stride * Wo:stride])
    patches = jnp.stack(cols, axis=1)                       # (C, kh*kw, N, Ho, Wo)
    return patches.reshape(C * kh * kw, N * Ho * Wo), Ho, Wo


def _conv2_patches(h1, n_frames, ho_in, wo_in, kh=3, kw=3, stride=2):
    # h1: (C1, N*ho_in*wo_in) -> (Ho*Wo*N, C1*kh*kw); rows (s,n), cols (c1,i,j)
    C1 = h1.shape[0]
    h1r = h1.reshape(C1, n_frames, ho_in, wo_in)
    Ho = (ho_in - kh) // stride + 1
    Wo = (wo_in - kw) // stride + 1
    cols = []
    for i in range(kh):
        for j in range(kw):
            cols.append(h1r[:, :, i:i + stride * Ho:stride, j:j + stride * Wo:stride])
    p = jnp.stack(cols, axis=1)                             # (C1, kh*kw, N, Ho, Wo)
    p = jnp.transpose(p, (3, 4, 2, 0, 1))                   # (Ho, Wo, N, C1, kh*kw)
    return p.reshape(Ho * Wo * n_frames, C1 * kh * kw)


# ----------------------------------------------------------------------------
# Kernel B: conv2 GEMM + fc chain + LTC sequence, fused in one pallas_call.
# ----------------------------------------------------------------------------
def _head_kernel(patches_ref, cw_ref, cb_ref,
                 fc1w_ref, fc1b_ref, fc2w_ref, fc2b_ref, fc3w_ref, fc3b_ref,
                 hx_ref,
                 spack_ref, smu_ref, ssig_ref,
                 wpack_ref, rmu_ref, rsig_ref,
                 vecU_ref, vecS_ref, vecO_ref,
                 pred_ref, hxout_ref,
                 feat_ref, states_ref,
                 *, T, B, O):
    U = hx_ref.shape[1]
    N = T * B
    NS = fc1w_ref.shape[0]           # conv2 spatial positions (6*6)
    H1 = fc1w_ref.shape[2]

    # ---- conv2 as one GEMM over (spatial, frame) rows; bf16 in, f32 acc ----
    y2 = jnp.dot(patches_ref[...], cw_ref[...], preferred_element_type=jnp.float32)
    y2 = jnp.maximum(y2 + cb_ref[...], 0.0)                 # (NS*N, C2), rows (s, n)

    # ---- fc_1 without materializing the (N, C2*NS) flatten:
    #      fc1_pre = sum_s  y2[s*N:(s+1)*N] @ fc1w[s]   (only static sublane
    #      slices + small dots -> no in-kernel relayout of the activations)
    acc = jnp.zeros((N, H1), jnp.float32)
    for s in range(NS):
        acc = acc + jnp.dot(y2[s * N:(s + 1) * N, :], fc1w_ref[s],
                            preferred_element_type=jnp.float32)
    h = jnp.maximum(acc + fc1b_ref[...], 0.0)
    h = jnp.maximum(
        jnp.dot(h, fc2w_ref[...], preferred_element_type=jnp.float32) + fc2b_ref[...], 0.0)
    feat = jnp.dot(h, fc3w_ref[...], preferred_element_type=jnp.float32) + fc3b_ref[...]
    # frame rows are in (t, b) order -> (T, B, S) is a leading-dims reshape only
    feat_ref[...] = feat.reshape(T, B, feat.shape[-1])

    # ---- LTC (ncps fused ODE solver, 6 unfolds, elapsed_time = 1.0) ----
    # Hoist only the small recurrent packed set + per-neuron vectors; the
    # sensory packed set is read from refs inside step() (vreg pressure).
    wpack = wpack_ref[...]           # (U, 2U) = [w*erev | w]
    rmu = rmu_ref[...]               # (U, 2U) = [mu | mu]
    rsig = rsig_ref[...]             # (U, 2U) = [sigma | sigma]
    vecU = vecU_ref[...]
    gleak = vecU[0:1, :]
    vleak = vecU[1:2, :]
    cm = vecU[2:3, :]
    vecS = vecS_ref[...]
    inw = vecS[0:1, :]
    inb = vecS[1:2, :]
    cm_t = cm * float(ODE_UNFOLDS)   # cm / (elapsed_time / ode_unfolds)
    gv = gleak * vleak

    def sigm(z):                     # sigmoid via a single EUP tanh
        return 0.5 * jnp.tanh(0.5 * z) + 0.5

    def step(t, v):
        x_t = feat_ref[t] * inw + inb                                   # (B, S)
        # sensory synapses, packed [numerator | denominator] on the lane axis
        sact = spack_ref[...][None] * sigm(
            (x_t[:, :, None] - smu_ref[...][None]) * ssig_ref[...][None])   # (B, S, 2U)
        snd = jnp.sum(sact, axis=1)                                     # (B, 2U)
        w_num_s = snd[:, :U]
        w_den_s = snd[:, U:]
        for _ in range(ODE_UNFOLDS):
            wact = wpack[None] * sigm((v[:, :, None] - rmu[None]) * rsig[None])  # (B, U, 2U)
            nd = jnp.sum(wact, axis=1)                                  # (B, 2U)
            numer = cm_t * v + gv + (nd[:, :U] + w_num_s)
            denom = cm_t + gleak + (nd[:, U:] + w_den_s)
            v = numer / (denom + EPS)        # exact division (recurrence-safe)
        states_ref[t] = v
        return v

    v_final = jax.lax.fori_loop(0, T, step, hx_ref[...])
    hxout_ref[...] = v_final

    # output affine (motor neurons) once, after the serial loop
    vecO = vecO_ref[...]
    outw = vecO[0:1, :]
    outb = vecO[1:2, :]
    states = states_ref[...]                                            # (T, B, U)
    pred_ref[...] = states[:, :, :O] * outw + outb


def head_call(params, patches2, hx, *, T, B):
    U = hx.shape[1]
    S = params["fc3_b_row"].shape[1]
    O = params["vec_O"].shape[1]
    M2, K2 = patches2.shape
    f2 = lambda i: (0, 0)
    f3 = lambda i: (0, 0, 0)
    kern = functools.partial(_head_kernel, T=T, B=B, O=O)
    return pl.pallas_call(
        kern,
        out_shape=(jax.ShapeDtypeStruct((T, B, O), jnp.float32),
                   jax.ShapeDtypeStruct((B, U), jnp.float32)),
        grid=(1,),
        in_specs=[
            pl.BlockSpec((M2, K2), f2),
            pl.BlockSpec(params["conv2_wmat"].shape, f2),
            pl.BlockSpec(params["conv2_brow"].shape, f2),
            pl.BlockSpec(params["fc1_w_k"].shape, f3),
            pl.BlockSpec(params["fc1_b_row"].shape, f2),
            pl.BlockSpec(params["fc2_w"].shape, f2),
            pl.BlockSpec(params["fc2_b_row"].shape, f2),
            pl.BlockSpec(params["fc3_w"].shape, f2),
            pl.BlockSpec(params["fc3_b_row"].shape, f2),
            pl.BlockSpec((B, U), f2),
            pl.BlockSpec(params["sens_pack"].shape, f2),
            pl.BlockSpec(params["sens_mu2"].shape, f2),
            pl.BlockSpec(params["sens_sig2"].shape, f2),
            pl.BlockSpec(params["w_pack"].shape, f2),
            pl.BlockSpec(params["mu2"].shape, f2),
            pl.BlockSpec(params["sig2"].shape, f2),
            pl.BlockSpec(params["vec_U"].shape, f2),
            pl.BlockSpec(params["vec_S"].shape, f2),
            pl.BlockSpec(params["vec_O"].shape, f2),
        ],
        out_specs=(pl.BlockSpec((T, B, O), f3),
                   pl.BlockSpec((B, U), f2)),
        scratch_shapes=[pltpu.VMEM((T, B, S), jnp.float32),
                        pltpu.VMEM((T, B, U), jnp.float32)],
        compiler_params=pltpu.CompilerParams(dimension_semantics=("arbitrary",)),
    )(
        patches2, params["conv2_wmat"], params["conv2_brow"],
        params["fc1_w_k"], params["fc1_b_row"],
        params["fc2_w"], params["fc2_b_row"],
        params["fc3_w"], params["fc3_b_row"],
        hx,
        params["sens_pack"], params["sens_mu2"], params["sens_sig2"],
        params["w_pack"], params["mu2"], params["sig2"],
        params["vec_U"], params["vec_S"], params["vec_O"],
    )


# ----------------------------------------------------------------------------
# Full forward pass (jitted by the caller).
# ----------------------------------------------------------------------------
def model_forward(params, images_btchw, hx=None, timespans=None):
    B, T, C, H, W = images_btchw.shape
    N = B * T
    # frames in (t, b) order so encoder features land in (T, B, S) untransposed
    x_cf = jnp.transpose(images_btchw, (2, 1, 0, 3, 4)).reshape(C, N, H, W)
    x_cf = x_cf.astype(jnp.bfloat16)

    patches1, ho1, wo1 = _im2col_cf(x_cf, 5, 5, 2)                      # (75, N*14*14)
    h1 = conv1_gemm(params["conv1_wmat"], patches1, params["conv1_bcol"])  # (8, N*196) bf16
    patches2 = _conv2_patches(h1, N, ho1, wo1)                          # (36*N, 72) bf16

    if hx is None:
        hx = jnp.zeros((B, params["w_pack"].shape[0]), jnp.float32)

    pred_tbo, hx_new = head_call(params, patches2, hx, T=T, B=B)
    return jnp.transpose(pred_tbo, (1, 0, 2)), hx_new                   # (B, T, O), (B, U)


# ----------------------------------------------------------------------------
# Deterministic synthetic parameters (torch layouts -> kernel-ready layouts).
# ----------------------------------------------------------------------------
def build_params(key, *, output_size, units, feature_size=32):
    ks = iter(jax.random.split(key, 32))
    nrm = lambda kk, shape, s=0.1: jax.random.normal(kk, shape, jnp.float32) * s
    p = {}

    # --- Encoder (reconstructed): conv 3->8 k5 s2, conv 8->16 k3 s2, fc 576->64->48->S
    conv1_w = nrm(next(ks), (8, 3, 5, 5))
    conv1_b = jnp.zeros((8,), jnp.float32)
    conv2_w = nrm(next(ks), (16, 8, 3, 3))
    conv2_b = jnp.zeros((16,), jnp.float32)
    fc1_w = nrm(next(ks), (576, 64), 0.05)
    fc1_b = jnp.zeros((64,), jnp.float32)
    fc2_w = nrm(next(ks), (64, 48), 0.1)
    fc2_b = jnp.zeros((48,), jnp.float32)
    fc3_w = nrm(next(ks), (48, feature_size), 0.1)
    fc3_b = jnp.zeros((feature_size,), jnp.float32)

    p["conv1_wmat"] = conv1_w.reshape(8, 75).astype(jnp.bfloat16)       # K=(c,i,j)
    p["conv1_bcol"] = conv1_b.reshape(8, 1)
    p["conv2_wmat"] = conv2_w.reshape(16, 72).T.astype(jnp.bfloat16)    # (72, 16)
    p["conv2_brow"] = conv2_b.reshape(1, 16)
    # fc_1 rows re-blocked host-side from PyTorch (c2, ho, wo) flatten order to
    # per-spatial-position blocks (s, c2) consumed inside kernel B.
    p["fc1_w_k"] = fc1_w.reshape(16, 36, 64).transpose(1, 0, 2)         # (36, 16, 64)
    p["fc1_b_row"] = fc1_b.reshape(1, 64)
    p["fc2_w"] = fc2_w
    p["fc2_b_row"] = fc2_b.reshape(1, 48)
    p["fc3_w"] = fc3_w
    p["fc3_b_row"] = fc3_b.reshape(1, feature_size)

    # --- LTC / AutoNCP-style wiring (deterministic synthetic polarity masks) ---
    S, U, O = feature_size, units, output_size
    sens_pol = jax.random.choice(next(ks), jnp.array([-1.0, 0.0, 1.0]), (S, U),
                                 p=jnp.array([0.3, 0.3, 0.4]))
    rec_pol = jax.random.choice(next(ks), jnp.array([-1.0, 0.0, 1.0]), (U, U),
                                p=jnp.array([0.3, 0.3, 0.4]))
    sens_mask = (sens_pol != 0.0).astype(jnp.float32)
    rec_mask = (rec_pol != 0.0).astype(jnp.float32)
    sp = jax.nn.softplus

    # static transforms (softplus constraints, sparsity masks, erev) hoisted host-side
    sensory_w = sp(jax.random.uniform(next(ks), (S, U), jnp.float32, 0.01, 1.0)) * sens_mask
    w = sp(jax.random.uniform(next(ks), (U, U), jnp.float32, 0.01, 1.0)) * rec_mask
    sensory_mu = jax.random.uniform(next(ks), (S, U), jnp.float32, 0.3, 0.8)
    sensory_sigma = jax.random.uniform(next(ks), (S, U), jnp.float32, 3.0, 8.0)
    mu = jax.random.uniform(next(ks), (U, U), jnp.float32, 0.3, 0.8)
    sigma = jax.random.uniform(next(ks), (U, U), jnp.float32, 3.0, 8.0)
    gleak = sp(jax.random.uniform(next(ks), (1, U), jnp.float32, 0.001, 1.0))
    vleak = jax.random.uniform(next(ks), (1, U), jnp.float32, -0.2, 0.2)
    cm = sp(jax.random.uniform(next(ks), (1, U), jnp.float32, 0.4, 0.6))

    # packed [numerator | denominator] forms (removes in-kernel concatenates)
    p["sens_pack"] = jnp.concatenate([sensory_w * sens_pol, sensory_w], axis=1)   # (S, 2U)
    p["sens_mu2"] = jnp.concatenate([sensory_mu, sensory_mu], axis=1)
    p["sens_sig2"] = jnp.concatenate([sensory_sigma, sensory_sigma], axis=1)
    p["w_pack"] = jnp.concatenate([w * rec_pol, w], axis=1)                       # (U, 2U)
    p["mu2"] = jnp.concatenate([mu, mu], axis=1)
    p["sig2"] = jnp.concatenate([sigma, sigma], axis=1)

    p["vec_U"] = jnp.concatenate([gleak, vleak, cm], axis=0)                      # (3, U)
    p["vec_S"] = jnp.concatenate([jnp.ones((1, S), jnp.float32),
                                  jnp.zeros((1, S), jnp.float32)], axis=0)        # input w, b
    p["vec_O"] = jnp.concatenate([jnp.ones((1, O), jnp.float32),
                                  jnp.zeros((1, O), jnp.float32)], axis=0)        # output w, b
    return p


if __name__ == "__main__":
    key = jax.random.PRNGKey(0)
    k_x, k_p = jax.random.split(key)

    B, T, C, H, W = 2, 4, 3, 32, 32
    output_size, units = 4, 16

    x = jax.random.normal(k_x, (B, T, C, H, W), jnp.float32)
    params = build_params(k_p, output_size=output_size, units=units, feature_size=32)

    fwd = jax.jit(model_forward)
    predicted_angle, hx = fwd(params, x)
    jax.block_until_ready((predicted_angle, hx))

    assert predicted_angle.shape == (B, T, output_size)
    assert hx.shape == (B, units)
    print("KERNEL_OK")
</pallas_src>

<mosaic_0001>
module attributes {stable_mosaic.version = 11 : i64} {
  func.func @_conv1_kernel(%arg0: i32, %arg1: memref<8x75xbf16, #tpu.memory_space<vmem>>, %arg2: memref<75x1568xbf16, #tpu.memory_space<vmem>>, %arg3: memref<8x1xf32, #tpu.memory_space<vmem>>, %arg4: memref<8x1568xbf16, #tpu.memory_space<vmem>>) attributes {dimension_semantics = [#tpu.dimension_semantics<parallel>], iteration_bounds = array<i64: 1>, scalar_prefetch = 0 : i64, scratch_operands = 0 : i64, tpu.core_type = #tpu.core_type<tc>, window_params = [{pipeline_mode = #tpu.pipeline_mode<synchronous>, transform_indices = @transform_0, window_bounds = array<i64: 8, 75>}, {transform_indices = @transform_1, window_bounds = array<i64: 75, 1568>}, {pipeline_mode = #tpu.pipeline_mode<synchronous>, transform_indices = @transform_2, window_bounds = array<i64: 8, 1>}, {transform_indices = @transform_3, window_bounds = array<i64: 8, 1568>}]} {
    %c0 = arith.constant 0 : index
    %c0_0 = arith.constant 0 : index
    %0 = vector.load %arg1[%c0, %c0_0] : memref<8x75xbf16, #tpu.memory_space<vmem>>, vector<8x75xbf16>
    %c0_1 = arith.constant 0 : index
    %c0_2 = arith.constant 0 : index
    %1 = vector.load %arg2[%c0_1, %c0_2] : memref<75x1568xbf16, #tpu.memory_space<vmem>>, vector<75x1568xbf16>
    %cst = arith.constant dense<0.000000e+00> : vector<8x1568xf32>
    %2 = tpu.matmul %0, %1, %cst {dimension_numbers = #tpu.dot_dimension_numbers<[1], [0], [0], [1], [0, 0, 1, 1], [], []>} : vector<8x75xbf16>, vector<75x1568xbf16>, vector<8x1568xf32> -> vector<8x1568xf32>
    %c0_3 = arith.constant 0 : index
    %c0_4 = arith.constant 0 : index
    %3 = vector.load %arg3[%c0_3, %c0_4] : memref<8x1xf32, #tpu.memory_space<vmem>>, vector<8x1xf32>
    %4 = vector.broadcast %3 : vector<8x1xf32> to vector<8x1568xf32>
    %5 = arith.addf %2, %4 : vector<8x1568xf32>
    %cst_5 = arith.constant 0.000000e+00 : f32
    %6 = vector.broadcast %cst_5 : f32 to vector<8x1568xf32>
    %7 = arith.maximumf %5, %6 : vector<8x1568xf32>
    %8 = arith.truncf %7 : vector<8x1568xf32> to vector<8x1568xbf16>
    %c0_6 = arith.constant 0 : index
    %c0_7 = arith.constant 0 : index
    %9 = vector.load %arg4[%c0_6, %c0_7] : memref<8x1568xbf16, #tpu.memory_space<vmem>>, vector<8x1568xbf16>
    tpu.vector_store %arg4[%c0_6, %c0_7], %8 {strides = array<i32>} : memref<8x1568xbf16, #tpu.memory_space<vmem>>, vector<8x1568xbf16>,
    return
  }
  func.func @transform_0(%arg0: i32) -> (i32, i32) {
    %c0_i32 = arith.constant 0 : i32
    %c0_i32_0 = arith.constant 0 : i32
    %c0_i32_1 = arith.constant 0 : i32
    return %c0_i32, %c0_i32_0 : i32, i32
  }
  func.func @transform_1(%arg0: i32) -> (i32, i32) {
    %c0_i32 = arith.constant 0 : i32
    %c0_i32_0 = arith.constant 0 : i32
    return %c0_i32, %arg0 : i32, i32
  }
  func.func @transform_2(%arg0: i32) -> (i32, i32) {
    %c0_i32 = arith.constant 0 : i32
    %c0_i32_0 = arith.constant 0 : i32
    %c0_i32_1 = arith.constant 0 : i32
    return %c0_i32, %c0_i32_0 : i32, i32
  }
  func.func @transform_3(%arg0: i32) -> (i32, i32) {
    %c0_i32 = arith.constant 0 : i32
    %c0_i32_0 = arith.constant 0 : i32
    return %c0_i32, %arg0 : i32, i32
  }
}

module attributes {stable_mosaic.version = 11 : i64} {
  func.func @_head_kernel(%arg0: i32, %arg1: memref<288x72xbf16, #tpu.memory_space<vmem>>, %arg2: memref<72x16xbf16, #tpu.memory_space<vmem>>, %arg3: memref<1x16xf32, #tpu.memory_space<vmem>>, %arg4: memref<36x16x64xf32, #tpu.memory_space<vmem>>, %arg5: memref<1x64xf32, #tpu.memory_space<vmem>>, %arg6: memref<64x48xf32, #tpu.memory_space<vmem>>, %arg7: memref<1x48xf32, #tpu.memory_space<vmem>>, %arg8: memref<48x32xf32, #tpu.memory_space<vmem>>, %arg9: memref<1x32xf32, #tpu.memory_space<vmem>>, %arg10: memref<2x16xf32, #tpu.memory_space<vmem>>, %arg11: memref<32x32xf32, #tpu.memory_space<vmem>>, %arg12: memref<32x32xf32, #tpu.memory_space<vmem>>, %arg13: memref<32x32xf32, #tpu.memory_space<vmem>>, %arg14: memref<16x32xf32, #tpu.memory_space<vmem>>, %arg15: memref<16x32xf32, #tpu.memory_space<vmem>>, %arg16: memref<16x32xf32, #tpu.memory_space<vmem>>, %arg17: memref<3x16xf32, #tpu.memory_space<vmem>>, %arg18: memref<2x32xf32, #tpu.memory_space<vmem>>, %arg19: memref<2x4xf32, #tpu.memory_space<vmem>>, %arg20: memref<4x2x4xf32, #tpu.memory_space<vmem>>, %arg21: memref<2x16xf32, #tpu.memory_space<vmem>>, %arg22: memref<4x2x32xf32, #tpu.memory_space<vmem>>, %arg23: memref<4x2x16xf32, #tpu.memory_space<vmem>>) attributes {dimension_semantics = [#tpu.dimension_semantics<arbitrary>], iteration_bounds = array<i64: 1>, scalar_prefetch = 0 : i64, scratch_operands = 2 : i64, tpu.core_type = #tpu.core_type<tc>, window_params = [{pipeline_mode = #tpu.pipeline_mode<synchronous>, transform_indices = @transform_0, window_bounds = array<i64: 288, 72>}, {pipeline_mode = #tpu.pipeline_mode<synchronous>, transform_indices = @transform_1, window_bounds = array<i64: 72, 16>}, {pipeline_mode = #tpu.pipeline_mode<synchronous>, transform_indices = @transform_2, window_bounds = array<i64: 1, 16>}, {pipeline_mode = #tpu.pipeline_mode<synchronous>, transform_indices = @transform_3, window_bounds = array<i64: 36, 16, 64>}, {pipeline_mode = #tpu.pipeline_mode<synchronous>, transform_indices = @transform_4, window_bounds = array<i64: 1, 64>}, {pipeline_mode = #tpu.pipeline_mode<synchronous>, transform_indices = @transform_5, window_bounds = array<i64: 64, 48>}, {pipeline_mode = #tpu.pipeline_mode<synchronous>, transform_indices = @transform_6, window_bounds = array<i64: 1, 48>}, {pipeline_mode = #tpu.pipeline_mode<synchronous>, transform_indices = @transform_7, window_bounds = array<i64: 48, 32>}, {pipeline_mode = #tpu.pipeline_mode<synchronous>, transform_indices = @transform_8, window_bounds = array<i64: 1, 32>}, {pipeline_mode = #tpu.pipeline_mode<synchronous>, transform_indices = @transform_9, window_bounds = array<i64: 2, 16>}, {pipeline_mode = #tpu.pipeline_mode<synchronous>, transform_indices = @transform_10, window_bounds = array<i64: 32, 32>}, {pipeline_mode = #tpu.pipeline_mode<synchronous>, transform_indices = @transform_11, window_bounds = array<i64: 32, 32>}, {pipeline_mode = #tpu.pipeline_mode<synchronous>, transform_indices = @transform_12, window_bounds = array<i64: 32, 32>}, {pipeline_mode = #tpu.pipeline_mode<synchronous>, transform_indices = @transform_13, window_bounds = array<i64: 16, 32>}, {pipeline_mode = #tpu.pipeline_mode<synchronous>, transform_indices = @transform_14, window_bounds = array<i64: 16, 32>}, {pipeline_mode = #tpu.pipeline_mode<synchronous>, transform_indices = @transform_15, window_bounds = array<i64: 16, 32>}, {pipeline_mode = #tpu.pipeline_mode<synchronous>, transform_indices = @transform_16, window_bounds = array<i64: 3, 16>}, {pipeline_mode = #tpu.pipeline_mode<synchronous>, transform_indices = @transform_17, window_bounds = array<i64: 2, 32>}, {pipeline_mode = #tpu.pipeline_mode<synchronous>, transform_indices = @transform_18, window_bounds = array<i64: 2, 4>}, {pipeline_mode = #tpu.pipeline_mode<synchronous>, transform_indices = @transform_19, window_bounds = array<i64: 4, 2, 4>}, {pipeline_mode = #tpu.pipeline_mode<synchronous>, transform_indices = @transform_20, window_bounds = array<i64: 2, 16>}]} {
    %c0 = arith.constant 0 : index
    %c0_0 = arith.constant 0 : index
    %0 = vector.load %arg1[%c0, %c0_0] : memref<288x72xbf16, #tpu.memory_space<vmem>>, vector<288x72xbf16>
    %c0_1 = arith.constant 0 : index
    %c0_2 = arith.constant 0 : index
    %1 = vector.load %arg2[%c0_1, %c0_2] : memref<72x16xbf16, #tpu.memory_space<vmem>>, vector<72x16xbf16>
    %cst = arith.constant dense<0.000000e+00> : vector<288x16xf32>
    %2 = tpu.matmul %0, %1, %cst {dimension_numbers = #tpu.dot_dimension_numbers<[1], [0], [0], [1], [0, 0, 1, 1], [], []>} : vector<288x72xbf16>, vector<72x16xbf16>, vector<288x16xf32> -> vector<288x16xf32>
    %c0_3 = arith.constant 0 : index
    %c0_4 = arith.constant 0 : index
    %3 = vector.load %arg3[%c0_3, %c0_4] : memref<1x16xf32, #tpu.memory_space<vmem>>, vector<1x16xf32>
    %4 = vector.broadcast %3 : vector<1x16xf32> to vector<288x16xf32>
    %5 = arith.addf %2, %4 : vector<288x16xf32>
    %cst_5 = arith.constant 0.000000e+00 : f32
    %6 = vector.broadcast %cst_5 : f32 to vector<288x16xf32>
    %7 = arith.maximumf %5, %6 : vector<288x16xf32>
    %cst_6 = arith.constant 0.000000e+00 : f32
    %8 = vector.broadcast %cst_6 : f32 to vector<8x64xf32>
    %9 = vector.extract_strided_slice %7 {offsets = [0, 0], sizes = [8, 16], strides = [1, 1]} : vector<288x16xf32> to vector<8x16xf32>
    %c0_7 = arith.constant 0 : index
    %c0_8 = arith.constant 0 : index
    %c0_9 = arith.constant 0 : index
    %10 = vector.load %arg4[%c0_7, %c0_8, %c0_9] : memref<36x16x64xf32, #tpu.memory_space<vmem>>, vector<1x16x64xf32>
    %11 = vector.shape_cast %10 : vector<1x16x64xf32> to vector<16x64xf32>
    %cst_10 = arith.constant dense<0.000000e+00> : vector<8x64xf32>
    %12 = tpu.matmul %9, %11, %cst_10 {dimension_numbers = #tpu.dot_dimension_numbers<[1], [0], [0], [1], [0, 0, 1, 1], [], []>} : vector<8x16xf32>, vector<16x64xf32>, vector<8x64xf32> -> vector<8x64xf32>
    %13 = arith.addf %8, %12 : vector<8x64xf32>
    %14 = vector.extract_strided_slice %7 {offsets = [8, 0], sizes = [8, 16], strides = [1, 1]} : vector<288x16xf32> to vector<8x16xf32>
    %c1 = arith.constant 1 : index
    %c0_11 = arith.constant 0 : index
    %c0_12 = arith.constant 0 : index
    %15 = vector.load %arg4[%c1, %c0_11, %c0_12] : memref<36x16x64xf32, #tpu.memory_space<vmem>>, vector<1x16x64xf32>
    %16 = vector.shape_cast %15 : vector<1x16x64xf32> to vector<16x64xf32>
    %cst_13 = arith.constant dense<0.000000e+00> : vector<8x64xf32>
    %17 = tpu.matmul %14, %16, %cst_13 {dimension_numbers = #tpu.dot_dimension_numbers<[1], [0], [0], [1], [0, 0, 1, 1], [], []>} : vector<8x16xf32>, vector<16x64xf32>, vector<8x64xf32> -> vector<8x64xf32>
    %18 = arith.addf %13, %17 : vector<8x64xf32>
    %19 = vector.extract_strided_slice %7 {offsets = [16, 0], sizes = [8, 16], strides = [1, 1]} : vector<288x16xf32> to vector<8x16xf32>
    %c2 = arith.constant 2 : index
    %c0_14 = arith.constant 0 : index
    %c0_15 = arith.constant 0 : index
    %20 = vector.load %arg4[%c2, %c0_14, %c0_15] : memref<36x16x64xf32, #tpu.memory_space<vmem>>, vector<1x16x64xf32>
    %21 = vector.shape_cast %20 : vector<1x16x64xf32> to vector<16x64xf32>
    %cst_16 = arith.constant dense<0.000000e+00> : vector<8x64xf32>
    %22 = tpu.matmul %19, %21, %cst_16 {dimension_numbers = #tpu.dot_dimension_numbers<[1], [0], [0], [1], [0, 0, 1, 1], [], []>} : vector<8x16xf32>, vector<16x64xf32>, vector<8x64xf32> -> vector<8x64xf32>
    %23 = arith.addf %18, %22 : vector<8x64xf32>
    %24 = vector.extract_strided_slice %7 {offsets = [24, 0], sizes = [8, 16], strides = [1, 1]} : vector<288x16xf32> to vector<8x16xf32>
    %c3 = arith.constant 3 : index
    %c0_17 = arith.constant 0 : index
    %c0_18 = arith.constant 0 : index
    %25 = vector.load %arg4[%c3, %c0_17, %c0_18] : memref<36x16x64xf32, #tpu.memory_space<vmem>>, vector<1x16x64xf32>
    %26 = vector.shape_cast %25 : vector<1x16x64xf32> to vector<16x64xf32>
    %cst_19 = arith.constant dense<0.000000e+00> : vector<8x64xf32>
    %27 = tpu.matmul %24, %26, %cst_19 {dimension_numbers = #tpu.dot_dimension_numbers<[1], [0], [0], [1], [0, 0, 1, 1], [], []>} : vector<8x16xf32>, vector<16x64xf32>, vector<8x64xf32> -> vector<8x64xf32>
    %28 = arith.addf %23, %27 : vector<8x64xf32>
    %29 = vector.extract_strided_slice %7 {offsets = [32, 0], sizes = [8, 16], strides = [1, 1]} : vector<288x16xf32> to vector<8x16xf32>
    %c4 = arith.constant 4 : index
    %c0_20 = arith.constant 0 : index
    %c0_21 = arith.constant 0 : index
    %30 = vector.load %arg4[%c4, %c0_20, %c0_21] : memref<36x16x64xf32, #tpu.memory_space<vmem>>, vector<1x16x64xf32>
    %31 = vector.shape_cast %30 : vector<1x16x64xf32> to vector<16x64xf32>
    %cst_22 = arith.constant dense<0.000000e+00> : vector<8x64xf32>
    %32 = tpu.matmul %29, %31, %cst_22 {dimension_numbers = #tpu.dot_dimension_numbers<[1], [0], [0], [1], [0, 0, 1, 1], [], []>} : vector<8x16xf32>, vector<16x64xf32>, vector<8x64xf32> -> vector<8x64xf32>
    %33 = arith.addf %28, %32 : vector<8x64xf32>
    %34 = vector.extract_strided_slice %7 {offsets = [40, 0], sizes = [8, 16], strides = [1, 1]} : vector<288x16xf32> to vector<8x16xf32>
    %c5 = arith.constant 5 : index
    %c0_23 = arith.constant 0 : index
    %c0_24 = arith.constant 0 : index
    %35 = vector.load %arg4[%c5, %c0_23, %c0_24] : memref<36x16x64xf32, #tpu.memory_space<vmem>>, vector<1x16x64xf32>
    %36 = vector.shape_cast %35 : vector<1x16x64xf32> to vector<16x64xf32>
    %cst_25 = arith.constant dense<0.000000e+00> : vector<8x64xf32>
    %37 = tpu.matmul %34, %36, %cst_25 {dimension_numbers = #tpu.dot_dimension_numbers<[1], [0], [0], [1], [0, 0, 1, 1], [], []>} : vector<8x16xf32>, vector<16x64xf32>, vector<8x64xf32> -> vector<8x64xf32>
    %38 = arith.addf %33, %37 : vector<8x64xf32>
    %39 = vector.extract_strided_slice %7 {offsets = [48, 0], sizes = [8, 16], strides = [1, 1]} : vector<288x16xf32> to vector<8x16xf32>
    %c6 = arith.constant 6 : index
    %c0_26 = arith.constant 0 : index
    %c0_27 = arith.constant 0 : index
    %40 = vector.load %arg4[%c6, %c0_26, %c0_27] : memref<36x16x64xf32, #tpu.memory_space<vmem>>, vector<1x16x64xf32>
    %41 = vector.shape_cast %40 : vector<1x16x64xf32> to vector<16x64xf32>
    %cst_28 = arith.constant dense<0.000000e+00> : vector<8x64xf32>
    %42 = tpu.matmul %39, %41, %cst_28 {dimension_numbers = #tpu.dot_dimension_numbers<[1], [0], [0], [1], [0, 0, 1, 1], [], []>} : vector<8x16xf32>, vector<16x64xf32>, vector<8x64xf32> -> vector<8x64xf32>
    %43 = arith.addf %38, %42 : vector<8x64xf32>
    %44 = vector.extract_strided_slice %7 {offsets = [56, 0], sizes = [8, 16], strides = [1, 1]} : vector<288x16xf32> to vector<8x16xf32>
    %c7 = arith.constant 7 : index
    %c0_29 = arith.constant 0 : index
    %c0_30 = arith.constant 0 : index
    %45 = vector.load %arg4[%c7, %c0_29, %c0_30] : memref<36x16x64xf32, #tpu.memory_space<vmem>>, vector<1x16x64xf32>
    %46 = vector.shape_cast %45 : vector<1x16x64xf32> to vector<16x64xf32>
    %cst_31 = arith.constant dense<0.000000e+00> : vector<8x64xf32>
    %47 = tpu.matmul %44, %46, %cst_31 {dimension_numbers = #tpu.dot_dimension_numbers<[1], [0], [0], [1], [0, 0, 1, 1], [], []>} : vector<8x16xf32>, vector<16x64xf32>, vector<8x64xf32> -> vector<8x64xf32>
    %48 = arith.addf %43, %47 : vector<8x64xf32>
    %49 = vector.extract_strided_slice %7 {offsets = [64, 0], sizes = [8, 16], strides = [1, 1]} : vector<288x16xf32> to vector<8x16xf32>
    %c8 = arith.constant 8 : index
    %c0_32 = arith.constant 0 : index
    %c0_33 = arith.constant 0 : index
    %50 = vector.load %arg4[%c8, %c0_32, %c0_33] : memref<36x16x64xf32, #tpu.memory_space<vmem>>, vector<1x16x64xf32>
    %51 = vector.shape_cast %50 : vector<1x16x64xf32> to vector<16x64xf32>
    %cst_34 = arith.constant dense<0.000000e+00> : vector<8x64xf32>
    %52 = tpu.matmul %49, %51, %cst_34 {dimension_numbers = #tpu.dot_dimension_numbers<[1], [0], [0], [1], [0, 0, 1, 1], [], []>} : vector<8x16xf32>, vector<16x64xf32>, vector<8x64xf32> -> vector<8x64xf32>
    %53 = arith.addf %48, %52 : vector<8x64xf32>
    %54 = vector.extract_strided_slice %7 {offsets = [72, 0], sizes = [8, 16], strides = [1, 1]} : vector<288x16xf32> to vector<8x16xf32>
    %c9 = arith.constant 9 : index
    %c0_35 = arith.constant 0 : index
    %c0_36 = arith.constant 0 : index
    %55 = vector.load %arg4[%c9, %c0_35, %c0_36] : memref<36x16x64xf32, #tpu.memory_space<vmem>>, vector<1x16x64xf32>
    %56 = vector.shape_cast %55 : vector<1x16x64xf32> to vector<16x64xf32>
    %cst_37 = arith.constant dense<0.000000e+00> : vector<8x64xf32>
    %57 = tpu.matmul %54, %56, %cst_37 {dimension_numbers = #tpu.dot_dimension_numbers<[1], [0], [0], [1], [0, 0, 1, 1], [], []>} : vector<8x16xf32>, vector<16x64xf32>, vector<8x64xf32> -> vector<8x64xf32>
    %58 = arith.addf %53, %57 : vector<8x64xf32>
    %59 = vector.extract_strided_slice %7 {offsets = [80, 0], sizes = [8, 16], strides = [1, 1]} : vector<288x16xf32> to vector<8x16xf32>
    %c10 = arith.constant 10 : index
    %c0_38 = arith.constant 0 : index
    %c0_39 = arith.constant 0 : index
    %60 = vector.load %arg4[%c10, %c0_38, %c0_39] : memref<36x16x64xf32, #tpu.memory_space<vmem>>, vector<1x16x64xf32>
    %61 = vector.shape_cast %60 : vector<1x16x64xf32> to vector<16x64xf32>
    %cst_40 = arith.constant dense<0.000000e+00> : vector<8x64xf32>
    %62 = tpu.matmul %59, %61, %cst_40 {dimension_numbers = #tpu.dot_dimension_numbers<[1], [0], [0], [1], [0, 0, 1, 1], [], []>} : vector<8x16xf32>, vector<16x64xf32>, vector<8x64xf32> -> vector<8x64xf32>
    %63 = arith.addf %58, %62 : vector<8x64xf32>
    %64 = vector.extract_strided_slice %7 {offsets = [88, 0], sizes = [8, 16], strides = [1, 1]} : vector<288x16xf32> to vector<8x16xf32>
    %c11 = arith.constant 11 : index
    %c0_41 = arith.constant 0 : index
    %c0_42 = arith.constant 0 : index
    %65 = vector.load %arg4[%c11, %c0_41, %c0_42] : memref<36x16x64xf32, #tpu.memory_space<vmem>>, vector<1x16x64xf32>
    %66 = vector.shape_cast %65 : vector<1x16x64xf32> to vector<16x64xf32>
    %cst_43 = arith.constant dense<0.000000e+00> : vector<8x64xf32>
    %67 = tpu.matmul %64, %66, %cst_43 {dimension_numbers = #tpu.dot_dimension_numbers<[1], [0], [0], [1], [0, 0, 1, 1], [], []>} : vector<8x16xf32>, vector<16x64xf32>, vector<8x64xf32> -> vector<8x64xf32>
    %68 = arith.addf %63, %67 : vector<8x64xf32>
    %69 = vector.extract_strided_slice %7 {offsets = [96, 0], sizes = [8, 16], strides = [1, 1]} : vector<288x16xf32> to vector<8x16xf32>
    %c12 = arith.constant 12 : index
    %c0_44 = arith.constant 0 : index
    %c0_45 = arith.constant 0 : index
    %70 = vector.load %arg4[%c12, %c0_44, %c0_45] : memref<36x16x64xf32, #tpu.memory_space<vmem>>, vector<1x16x64xf32>
    %71 = vector.shape_cast %70 : vector<1x16x64xf32> to vector<16x64xf32>
    %cst_46 = arith.constant dense<0.000000e+00> : vector<8x64xf32>
    %72 = tpu.matmul %69, %71, %cst_46 {dimension_numbers = #tpu.dot_dimension_numbers<[1], [0], [0], [1], [0, 0, 1, 1], [], []>} : vector<8x16xf32>, vector<16x64xf32>, vector<8x64xf32> -> vector<8x64xf32>
    %73 = arith.addf %68, %72 : vector<8x64xf32>
    %74 = vector.extract_strided_slice %7 {offsets = [104, 0], sizes = [8, 16], strides = [1, 1]} : vector<288x16xf32> to vector<8x16xf32>
    %c13 = arith.constant 13 : index
    %c0_47 = arith.constant 0 : index
    %c0_48 = arith.constant 0 : index
    %75 = vector.load %arg4[%c13, %c0_47, %c0_48] : memref<36x16x64xf32, #tpu.memory_space<vmem>>, vector<1x16x64xf32>
    %76 = vector.shape_cast %75 : vector<1x16x64xf32> to vector<16x64xf32>
    %cst_49 = arith.constant dense<0.000000e+00> : vector<8x64xf32>
    %77 = tpu.matmul %74, %76, %cst_49 {dimension_numbers = #tpu.dot_dimension_numbers<[1], [0], [0], [1], [0, 0, 1, 1], [], []>} : vector<8x16xf32>, vector<16x64xf32>, vector<8x64xf32> -> vector<8x64xf32>
    %78 = arith.addf %73, %77 : vector<8x64xf32>
    %79 = vector.extract_strided_slice %7 {offsets = [112, 0], sizes = [8, 16], strides = [1, 1]} : vector<288x16xf32> to vector<8x16xf32>
    %c14 = arith.constant 14 : index
    %c0_50 = arith.constant 0 : index
    %c0_51 = arith.constant 0 : index
    %80 = vector.load %arg4[%c14, %c0_50, %c0_51] : memref<36x16x64xf32, #tpu.memory_space<vmem>>, vector<1x16x64xf32>
    %81 = vector.shape_cast %80 : vector<1x16x64xf32> to vector<16x64xf32>
    %cst_52 = arith.constant dense<0.000000e+00> : vector<8x64xf32>
    %82 = tpu.matmul %79, %81, %cst_52 {dimension_numbers = #tpu.dot_dimension_numbers<[1], [0], [0], [1], [0, 0, 1, 1], [], []>} : vector<8x16xf32>, vector<16x64xf32>, vector<8x64xf32> -> vector<8x64xf32>
    %83 = arith.addf %78, %82 : vector<8x64xf32>
    %84 = vector.extract_strided_slice %7 {offsets = [120, 0], sizes = [8, 16], strides = [1, 1]} : vector<288x16xf32> to vector<8x16xf32>
    %c15 = arith.constant 15 : index
    %c0_53 = arith.constant 0 : index
    %c0_54 = arith.constant 0 : index
    %85 = vector.load %arg4[%c15, %c0_53, %c0_54] : memref<36x16x64xf32, #tpu.memory_space<vmem>>, vector<1x16x64xf32>
    %86 = vector.shape_cast %85 : vector<1x16x64xf32> to vector<16x64xf32>
    %cst_55 = arith.constant dense<0.000000e+00> : vector<8x64xf32>
    %87 = tpu.matmul %84, %86, %cst_55 {dimension_numbers = #tpu.dot_dimension_numbers<[1], [0], [0], [1], [0, 0, 1, 1], [], []>} : vector<8x16xf32>, vector<16x64xf32>, vector<8x64xf32> -> vector<8x64xf32>
    %88 = arith.addf %83, %87 : vector<8x64xf32>
    %89 = vector.extract_strided_slice %7 {offsets = [128, 0], sizes = [8, 16], strides = [1, 1]} : vector<288x16xf32> to vector<8x16xf32>
    %c16 = arith.constant 16 : index
    %c0_56 = arith.constant 0 : index
    %c0_57 = arith.constant 0 : index
    %90 = vector.load %arg4[%c16, %c0_56, %c0_57] : memref<36x16x64xf32, #tpu.memory_space<vmem>>, vector<1x16x64xf32>
    %91 = vector.shape_cast %90 : vector<1x16x64xf32> to vector<16x64xf32>
    %cst_58 = arith.constant dense<0.000000e+00> : vector<8x64xf32>
    %92 = tpu.matmul %89, %91, %cst_58 {dimension_numbers = #tpu.dot_dimension_numbers<[1], [0], [0], [1], [0, 0, 1, 1], [], []>} : vector<8x16xf32>, vector<16x64xf32>, vector<8x64xf32> -> vector<8x64xf32>
    %93 = arith.addf %88, %92 : vector<8x64xf32>
    %94 = vector.extract_strided_slice %7 {offsets = [136, 0], sizes = [8, 16], strides = [1, 1]} : vector<288x16xf32> to vector<8x16xf32>
    %c17 = arith.constant 17 : index
    %c0_59 = arith.constant 0 : index
    %c0_60 = arith.constant 0 : index
    %95 = vector.load %arg4[%c17, %c0_59, %c0_60] : memref<36x16x64xf32, #tpu.memory_space<vmem>>, vector<1x16x64xf32>
    %96 = vector.shape_cast %95 : vector<1x16x64xf32> to vector<16x64xf32>
    %cst_61 = arith.constant dense<0.000000e+00> : vector<8x64xf32>
    %97 = tpu.matmul %94, %96, %cst_61 {dimension_numbers = #tpu.dot_dimension_numbers<[1], [0], [0], [1], [0, 0, 1, 1], [], []>} : vector<8x16xf32>, vector<16x64xf32>, vector<8x64xf32> -> vector<8x64xf32>
    %98 = arith.addf %93, %97 : vector<8x64xf32>
    %99 = vector.extract_strided_slice %7 {offsets = [144, 0], sizes = [8, 16], strides = [1, 1]} : vector<288x16xf32> to vector<8x16xf32>
    %c18 = arith.constant 18 : index
    %c0_62 = arith.constant 0 : index
    %c0_63 = arith.constant 0 : index
    %100 = vector.load %arg4[%c18, %c0_62, %c0_63] : memref<36x16x64xf32, #tpu.memory_space<vmem>>, vector<1x16x64xf32>
    %101 = vector.shape_cast %100 : vector<1x16x64xf32> to vector<16x64xf32>
    %cst_64 = arith.constant dense<0.000000e+00> : vector<8x64xf32>
    %102 = tpu.matmul %99, %101, %cst_64 {dimension_numbers = #tpu.dot_dimension_numbers<[1], [0], [0], [1], [0, 0, 1, 1], [], []>} : vector<8x16xf32>, vector<16x64xf32>, vector<8x64xf32> -> vector<8x64xf32>
    %103 = arith.addf %98, %102 : vector<8x64xf32>
    %104 = vector.extract_strided_slice %7 {offsets = [152, 0], sizes = [8, 16], strides = [1, 1]} : vector<288x16xf32> to vector<8x16xf32>
    %c19 = arith.constant 19 : index
    %c0_65 = arith.constant 0 : index
    %c0_66 = arith.constant 0 : index
    %105 = vector.load %arg4[%c19, %c0_65, %c0_66] : memref<36x16x64xf32, #tpu.memory_space<vmem>>, vector<1x16x64xf32>
    %106 = vector.shape_cast %105 : vector<1x16x64xf32> to vector<16x64xf32>
    %cst_67 = arith.constant dense<0.000000e+00> : vector<8x64xf32>
    %107 = tpu.matmul %104, %106, %cst_67 {dimension_numbers = #tpu.dot_dimension_numbers<[1], [0], [0], [1], [0, 0, 1, 1], [], []>} : vector<8x16xf32>, vector<16x64xf32>, vector<8x64xf32> -> vector<8x64xf32>
    %108 = arith.addf %103, %107 : vector<8x64xf32>
    %109 = vector.extract_strided_slice %7 {offsets = [160, 0], sizes = [8, 16], strides = [1, 1]} : vector<288x16xf32> to vector<8x16xf32>
    %c20 = arith.constant 20 : index
    %c0_68 = arith.constant 0 : index
    %c0_69 = arith.constant 0 : index
    %110 = vector.load %arg4[%c20, %c0_68, %c0_69] : memref<36x16x64xf32, #tpu.memory_space<vmem>>, vector<1x16x64xf32>
    %111 = vector.shape_cast %110 : vector<1x16x64xf32> to vector<16x64xf32>
    %cst_70 = arith.constant dense<0.000000e+00> : vector<8x64xf32>
    %112 = tpu.matmul %109, %111, %cst_70 {dimension_numbers = #tpu.dot_dimension_numbers<[1], [0], [0], [1], [0, 0, 1, 1], [], []>} : vector<8x16xf32>, vector<16x64xf32>, vector<8x64xf32> -> vector<8x64xf32>
    %113 = arith.addf %108, %112 : vector<8x64xf32>
    %114 = vector.extract_strided_slice %7 {offsets = [168, 0], sizes = [8, 16], strides = [1, 1]} : vector<288x16xf32> to vector<8x16xf32>
    %c21 = arith.constant 21 : index
    %c0_71 = arith.constant 0 : index
    %c0_72 = arith.constant 0 : index
    %115 = vector.load %arg4[%c21, %c0_71, %c0_72] : memref<36x16x64xf32, #tpu.memory_space<vmem>>, vector<1x16x64xf32>
    %116 = vector.shape_cast %115 : vector<1x16x64xf32> to vector<16x64xf32>
    %cst_73 = arith.constant dense<0.000000e+00> : vector<8x64xf32>
    %117 = tpu.matmul %114, %116, %cst_73 {dimension_numbers = #tpu.dot_dimension_numbers<[1], [0], [0], [1], [0, 0, 1, 1], [], []>} : vector<8x16xf32>, vector<16x64xf32>, vector<8x64xf32> -> vector<8x64xf32>
    %118 = arith.addf %113, %117 : vector<8x64xf32>
    %119 = vector.extract_strided_slice %7 {offsets = [176, 0], sizes = [8, 16], strides = [1, 1]} : vector<288x16xf32> to vector<8x16xf32>
    %c22 = arith.constant 22 : index
    %c0_74 = arith.constant 0 : index
    %c0_75 = arith.constant 0 : index
    %120 = vector.load %arg4[%c22, %c0_74, %c0_75] : memref<36x16x64xf32, #tpu.memory_space<vmem>>, vector<1x16x64xf32>
    %121 = vector.shape_cast %120 : vector<1x16x64xf32> to vector<16x64xf32>
    %cst_76 = arith.constant dense<0.000000e+00> : vector<8x64xf32>
    %122 = tpu.matmul %119, %121, %cst_76 {dimension_numbers = #tpu.dot_dimension_numbers<[1], [0], [0], [1], [0, 0, 1, 1], [], []>} : vector<8x16xf32>, vector<16x64xf32>, vector<8x64xf32> -> vector<8x64xf32>
    %123 = arith.addf %118, %122 : vector<8x64xf32>
    %124 = vector.extract_strided_slice %7 {offsets = [184, 0], sizes = [8, 16], strides = [1, 1]} : vector<288x16xf32> to vector<8x16xf32>
    %c23 = arith.constant 23 : index
    %c0_77 = arith.constant 0 : index
    %c0_78 = arith.constant 0 : index
    %125 = vector.load %arg4[%c23, %c0_77, %c0_78] : memref<36x16x64xf32, #tpu.memory_space<vmem>>, vector<1x16x64xf32>
    %126 = vector.shape_cast %125 : vector<1x16x64xf32> to vector<16x64xf32>
    %cst_79 = arith.constant dense<0.000000e+00> : vector<8x64xf32>
    %127 = tpu.matmul %124, %126, %cst_79 {dimension_numbers = #tpu.dot_dimension_numbers<[1], [0], [0], [1], [0, 0, 1, 1], [], []>} : vector<8x16xf32>, vector<16x64xf32>, vector<8x64xf32> -> vector<8x64xf32>
    %128 = arith.addf %123, %127 : vector<8x64xf32>
    %129 = vector.extract_strided_slice %7 {offsets = [192, 0], sizes = [8, 16], strides = [1, 1]} : vector<288x16xf32> to vector<8x16xf32>
    %c24 = arith.constant 24 : index
    %c0_80 = arith.constant 0 : index
    %c0_81 = arith.constant 0 : index
    %130 = vector.load %arg4[%c24, %c0_80, %c0_81] : memref<36x16x64xf32, #tpu.memory_space<vmem>>, vector<1x16x64xf32>
    %131 = vector.shape_cast %130 : vector<1x16x64xf32> to vector<16x64xf32>
    %cst_82 = arith.constant dense<0.000000e+00> : vector<8x64xf32>
    %132 = tpu.matmul %129, %131, %cst_82 {dimension_numbers = #tpu.dot_dimension_numbers<[1], [0], [0], [1], [0, 0, 1, 1], [], []>} : vector<8x16xf32>, vector<16x64xf32>, vector<8x64xf32> -> vector<8x64xf32>
    %133 = arith.addf %128, %132 : vector<8x64xf32>
    %134 = vector.extract_strided_slice %7 {offsets = [200, 0], sizes = [8, 16], strides = [1, 1]} : vector<288x16xf32> to vector<8x16xf32>
    %c25 = arith.constant 25 : index
    %c0_83 = arith.constant 0 : index
    %c0_84 = arith.constant 0 : index
    %135 = vector.load %arg4[%c25, %c0_83, %c0_84] : memref<36x16x64xf32, #tpu.memory_space<vmem>>, vector<1x16x64xf32>
    %136 = vector.shape_cast %135 : vector<1x16x64xf32> to vector<16x64xf32>
    %cst_85 = arith.constant dense<0.000000e+00> : vector<8x64xf32>
    %137 = tpu.matmul %134, %136, %cst_85 {dimension_numbers = #tpu.dot_dimension_numbers<[1], [0], [0], [1], [0, 0, 1, 1], [], []>} : vector<8x16xf32>, vector<16x64xf32>, vector<8x64xf32> -> vector<8x64xf32>
    %138 = arith.addf %133, %137 : vector<8x64xf32>
    %139 = vector.extract_strided_slice %7 {offsets = [208, 0], sizes = [8, 16], strides = [1, 1]} : vector<288x16xf32> to vector<8x16xf32>
    %c26 = arith.constant 26 : index
    %c0_86 = arith.constant 0 : index
    %c0_87 = arith.constant 0 : index
    %140 = vector.load %arg4[%c26, %c0_86, %c0_87] : memref<36x16x64xf32, #tpu.memory_space<vmem>>, vector<1x16x64xf32>
    %141 = vector.shape_cast %140 : vector<1x16x64xf32> to vector<16x64xf32>
    %cst_88 = arith.constant dense<0.000000e+00> : vector<8x64xf32>
    %142 = tpu.matmul %139, %141, %cst_88 {dimension_numbers = #tpu.dot_dimension_numbers<[1], [0], [0], [1], [0, 0, 1, 1], [], []>} : vector<8x16xf32>, vector<16x64xf32>, vector<8x64xf32> -> vector<8x64xf32>
    %143 = arith.addf %138, %142 : vector<8x64xf32>
    %144 = vector.extract_strided_slice %7 {offsets = [216, 0], sizes = [8, 16], strides = [1, 1]} : vector<288x16xf32> to vector<8x16xf32>
    %c27 = arith.constant 27 : index
    %c0_89 = arith.constant 0 : index
    %c0_90 = arith.constant 0 : index
    %145 = vector.load %arg4[%c27, %c0_89, %c0_90] : memref<36x16x64xf32, #tpu.memory_space<vmem>>, vector<1x16x64xf32>
    %146 = vector.shape_cast %145 : vector<1x16x64xf32> to vector<16x64xf32>
    %cst_91 = arith.constant dense<0.000000e+00> : vector<8x64xf32>
    %147 = tpu.matmul %144, %146, %cst_91 {dimension_numbers = #tpu.dot_dimension_numbers<[1], [0], [0], [1], [0, 0, 1, 1], [], []>} : vector<8x16xf32>, vector<16x64xf32>, vector<8x64xf32> -> vector<8x64xf32>
    %148 = arith.addf %143, %147 : vector<8x64xf32>
    %149 = vector.extract_strided_slice %7 {offsets = [224, 0], sizes = [8, 16], strides = [1, 1]} : vector<288x16xf32> to vector<8x16xf32>
    %c28 = arith.constant 28 : index
    %c0_92 = arith.constant 0 : index
    %c0_93 = arith.constant 0 : index
    %150 = vector.load %arg4[%c28, %c0_92, %c0_93] : memref<36x16x64xf32, #tpu.memory_space<vmem>>, vector<1x16x64xf32>
    %151 = vector.shape_cast %150 : vector<1x16x64xf32> to vector<16x64xf32>
    %cst_94 = arith.constant dense<0.000000e+00> : vector<8x64xf32>
    %152 = tpu.matmul %149, %151, %cst_94 {dimension_numbers = #tpu.dot_dimension_numbers<[1], [0], [0], [1], [0, 0, 1, 1], [], []>} : vector<8x16xf32>, vector<16x64xf32>, vector<8x64xf32> -> vector<8x64xf32>
    %153 = arith.addf %148, %152 : vector<8x64xf32>
    %154 = vector.extract_strided_slice %7 {offsets = [232, 0], sizes = [8, 16], strides = [1, 1]} : vector<288x16xf32> to vector<8x16xf32>
    %c29 = arith.constant 29 : index
    %c0_95 = arith.constant 0 : index
    %c0_96 = arith.constant 0 : index
    %155 = vector.load %arg4[%c29, %c0_95, %c0_96] : memref<36x16x64xf32, #tpu.memory_space<vmem>>, vector<1x16x64xf32>
    %156 = vector.shape_cast %155 : vector<1x16x64xf32> to vector<16x64xf32>
    %cst_97 = arith.constant dense<0.000000e+00> : vector<8x64xf32>
    %157 = tpu.matmul %154, %156, %cst_97 {dimension_numbers = #tpu.dot_dimension_numbers<[1], [0], [0], [1], [0, 0, 1, 1], [], []>} : vector<8x16xf32>, vector<16x64xf32>, vector<8x64xf32> -> vector<8x64xf32>
    %158 = arith.addf %153, %157 : vector<8x64xf32>
    %159 = vector.extract_strided_slice %7 {offsets = [240, 0], sizes = [8, 16], strides = [1, 1]} : vector<288x16xf32> to vector<8x16xf32>
    %c30 = arith.constant 30 : index
    %c0_98 = arith.constant 0 : index
    %c0_99 = arith.constant 0 : index
    %160 = vector.load %arg4[%c30, %c0_98, %c0_99] : memref<36x16x64xf32, #tpu.memory_space<vmem>>, vector<1x16x64xf32>
    %161 = vector.shape_cast %160 : vector<1x16x64xf32> to vector<16x64xf32>
    %cst_100 = arith.constant dense<0.000000e+00> : vector<8x64xf32>
    %162 = tpu.matmul %159, %161, %cst_100 {dimension_numbers = #tpu.dot_dimension_numbers<[1], [0], [0], [1], [0, 0, 1, 1], [], []>} : vector<8x16xf32>, vector<16x64xf32>, vector<8x64xf32> -> vector<8x64xf32>
    %163 = arith.addf %158, %162 : vector<8x64xf32>
    %164 = vector.extract_strided_slice %7 {offsets = [248, 0], sizes = [8, 16], strides = [1, 1]} : vector<288x16xf32> to vector<8x16xf32>
    %c31 = arith.constant 31 : index
    %c0_101 = arith.constant 0 : index
    %c0_102 = arith.constant 0 : index
    %165 = vector.load %arg4[%c31, %c0_101, %c0_102] : memref<36x16x64xf32, #tpu.memory_space<vmem>>, vector<1x16x64xf32>
    %166 = vector.shape_cast %165 : vector<1x16x64xf32> to vector<16x64xf32>
    %cst_103 = arith.constant dense<0.000000e+00> : vector<8x64xf32>
    %167 = tpu.matmul %164, %166, %cst_103 {dimension_numbers = #tpu.dot_dimension_numbers<[1], [0], [0], [1], [0, 0, 1, 1], [], []>} : vector<8x16xf32>, vector<16x64xf32>, vector<8x64xf32> -> vector<8x64xf32>
    %168 = arith.addf %163, %167 : vector<8x64xf32>
    %169 = vector.extract_strided_slice %7 {offsets = [256, 0], sizes = [8, 16], strides = [1, 1]} : vector<288x16xf32> to vector<8x16xf32>
    %c32 = arith.constant 32 : index
    %c0_104 = arith.constant 0 : index
    %c0_105 = arith.constant 0 : index
    %170 = vector.load %arg4[%c32, %c0_104, %c0_105] : memref<36x16x64xf32, #tpu.memory_space<vmem>>, vector<1x16x64xf32>
    %171 = vector.shape_cast %170 : vector<1x16x64xf32> to vector<16x64xf32>
    %cst_106 = arith.constant dense<0.000000e+00> : vector<8x64xf32>
    %172 = tpu.matmul %169, %171, %cst_106 {dimension_numbers = #tpu.dot_dimension_numbers<[1], [0], [0], [1], [0, 0, 1, 1], [], []>} : vector<8x16xf32>, vector<16x64xf32>, vector<8x64xf32> -> vector<8x64xf32>
    %173 = arith.addf %168, %172 : vector<8x64xf32>
    %174 = vector.extract_strided_slice %7 {offsets = [264, 0], sizes = [8, 16], strides = [1, 1]} : vector<288x16xf32> to vector<8x16xf32>
    %c33 = arith.constant 33 : index
    %c0_107 = arith.constant 0 : index
    %c0_108 = arith.constant 0 : index
    %175 = vector.load %arg4[%c33, %c0_107, %c0_108] : memref<36x16x64xf32, #tpu.memory_space<vmem>>, vector<1x16x64xf32>
    %176 = vector.shape_cast %175 : vector<1x16x64xf32> to vector<16x64xf32>
    %cst_109 = arith.constant dense<0.000000e+00> : vector<8x64xf32>
    %177 = tpu.matmul %174, %176, %cst_109 {dimension_numbers = #tpu.dot_dimension_numbers<[1], [0], [0], [1], [0, 0, 1, 1], [], []>} : vector<8x16xf32>, vector<16x64xf32>, vector<8x64xf32> -> vector<8x64xf32>
    %178 = arith.addf %173, %177 : vector<8x64xf32>
    %179 = vector.extract_strided_slice %7 {offsets = [272, 0], sizes = [8, 16], strides = [1, 1]} : vector<288x16xf32> to vector<8x16xf32>
    %c34 = arith.constant 34 : index
    %c0_110 = arith.constant 0 : index
    %c0_111 = arith.constant 0 : index
    %180 = vector.load %arg4[%c34, %c0_110, %c0_111] : memref<36x16x64xf32, #tpu.memory_space<vmem>>, vector<1x16x64xf32>
    %181 = vector.shape_cast %180 : vector<1x16x64xf32> to vector<16x64xf32>
    %cst_112 = arith.constant dense<0.000000e+00> : vector<8x64xf32>
    %182 = tpu.matmul %179, %181, %cst_112 {dimension_numbers = #tpu.dot_dimension_numbers<[1], [0], [0], [1], [0, 0, 1, 1], [], []>} : vector<8x16xf32>, vector<16x64xf32>, vector<8x64xf32> -> vector<8x64xf32>
    %183 = arith.addf %178, %182 : vector<8x64xf32>
    %184 = vector.extract_strided_slice %7 {offsets = [280, 0], sizes = [8, 16], strides = [1, 1]} : vector<288x16xf32> to vector<8x16xf32>
    %c35 = arith.constant 35 : index
    %c0_113 = arith.constant 0 : index
    %c0_114 = arith.constant 0 : index
    %185 = vector.load %arg4[%c35, %c0_113, %c0_114] : memref<36x16x64xf32, #tpu.memory_space<vmem>>, vector<1x16x64xf32>
    %186 = vector.shape_cast %185 : vector<1x16x64xf32> to vector<16x64xf32>
    %cst_115 = arith.constant dense<0.000000e+00> : vector<8x64xf32>
    %187 = tpu.matmul %184, %186, %cst_115 {dimension_numbers = #tpu.dot_dimension_numbers<[1], [0], [0], [1], [0, 0, 1, 1], [], []>} : vector<8x16xf32>, vector<16x64xf32>, vector<8x64xf32> -> vector<8x64xf32>
    %188 = arith.addf %183, %187 : vector<8x64xf32>
    %c0_116 = arith.constant 0 : index
    %c0_117 = arith.constant 0 : index
    %189 = vector.load %arg5[%c0_116, %c0_117] : memref<1x64xf32, #tpu.memory_space<vmem>>, vector<1x64xf32>
    %190 = vector.broadcast %189 : vector<1x64xf32> to vector<8x64xf32>
    %191 = arith.addf %188, %190 : vector<8x64xf32>
    %cst_118 = arith.constant 0.000000e+00 : f32
    %192 = vector.broadcast %cst_118 : f32 to vector<8x64xf32>
    %193 = arith.maximumf %191, %192 : vector<8x64xf32>
    %c0_119 = arith.constant 0 : index
    %c0_120 = arith.constant 0 : index
    %194 = vector.load %arg6[%c0_119, %c0_120] : memref<64x48xf32, #tpu.memory_space<vmem>>, vector<64x48xf32>
    %cst_121 = arith.constant dense<0.000000e+00> : vector<8x48xf32>
    %195 = tpu.matmul %193, %194, %cst_121 {dimension_numbers = #tpu.dot_dimension_numbers<[1], [0], [0], [1], [0, 0, 1, 1], [], []>} : vector<8x64xf32>, vector<64x48xf32>, vector<8x48xf32> -> vector<8x48xf32>
    %c0_122 = arith.constant 0 : index
    %c0_123 = arith.constant 0 : index
    %196 = vector.load %arg7[%c0_122, %c0_123] : memref<1x48xf32, #tpu.memory_space<vmem>>, vector<1x48xf32>
    %197 = vector.broadcast %196 : vector<1x48xf32> to vector<8x48xf32>
    %198 = arith.addf %195, %197 : vector<8x48xf32>
    %cst_124 = arith.constant 0.000000e+00 : f32
    %199 = vector.broadcast %cst_124 : f32 to vector<8x48xf32>
    %200 = arith.maximumf %198, %199 : vector<8x48xf32>
    %c0_125 = arith.constant 0 : index
    %c0_126 = arith.constant 0 : index
    %201 = vector.load %arg8[%c0_125, %c0_126] : memref<48x32xf32, #tpu.memory_space<vmem>>, vector<48x32xf32>
    %cst_127 = arith.constant dense<0.000000e+00> : vector<8x32xf32>
    %202 = tpu.matmul %200, %201, %cst_127 {dimension_numbers = #tpu.dot_dimension_numbers<[1], [0], [0], [1], [0, 0, 1, 1], [], []>} : vector<8x48xf32>, vector<48x32xf32>, vector<8x32xf32> -> vector<8x32xf32>
    %c0_128 = arith.constant 0 : index
    %c0_129 = arith.constant 0 : index
    %203 = vector.load %arg9[%c0_128, %c0_129] : memref<1x32xf32, #tpu.memory_space<vmem>>, vector<1x32xf32>
    %204 = vector.broadcast %203 : vector<1x32xf32> to vector<8x32xf32>
    %205 = arith.addf %202, %204 : vector<8x32xf32>
    %206 = vector.shape_cast %205 : vector<8x32xf32> to vector<4x2x32xf32>
    %c0_130 = arith.constant 0 : index
    %c0_131 = arith.constant 0 : index
    %c0_132 = arith.constant 0 : index
    %207 = vector.load %arg22[%c0_130, %c0_131, %c0_132] : memref<4x2x32xf32, #tpu.memory_space<vmem>>, vector<4x2x32xf32>
    tpu.vector_store %arg22[%c0_130, %c0_131, %c0_132], %206 {strides = array<i32>} : memref<4x2x32xf32, #tpu.memory_space<vmem>>, vector<4x2x32xf32>,
    %c0_133 = arith.constant 0 : index
    %c0_134 = arith.constant 0 : index
    %208 = vector.load %arg14[%c0_133, %c0_134] : memref<16x32xf32, #tpu.memory_space<vmem>>, vector<16x32xf32>
    %c0_135 = arith.constant 0 : index
    %c0_136 = arith.constant 0 : index
    %209 = vector.load %arg15[%c0_135, %c0_136] : memref<16x32xf32, #tpu.memory_space<vmem>>, vector<16x32xf32>
    %c0_137 = arith.constant 0 : index
    %c0_138 = arith.constant 0 : index
    %210 = vector.load %arg16[%c0_137, %c0_138] : memref<16x32xf32, #tpu.memory_space<vmem>>, vector<16x32xf32>
    %c0_139 = arith.constant 0 : index
    %c0_140 = arith.constant 0 : index
    %211 = vector.load %arg17[%c0_139, %c0_140] : memref<3x16xf32, #tpu.memory_space<vmem>>, vector<3x16xf32>
    %212 = vector.extract_strided_slice %211 {offsets = [0, 0], sizes = [1, 16], strides = [1, 1]} : vector<3x16xf32> to vector<1x16xf32>
    %213 = vector.extract_strided_slice %211 {offsets = [1, 0], sizes = [1, 16], strides = [1, 1]} : vector<3x16xf32> to vector<1x16xf32>
    %214 = vector.extract_strided_slice %211 {offsets = [2, 0], sizes = [1, 16], strides = [1, 1]} : vector<3x16xf32> to vector<1x16xf32>
    %c0_141 = arith.constant 0 : index
    %c0_142 = arith.constant 0 : index
    %215 = vector.load %arg18[%c0_141, %c0_142] : memref<2x32xf32, #tpu.memory_space<vmem>>, vector<2x32xf32>
    %216 = vector.extract_strided_slice %215 {offsets = [0, 0], sizes = [1, 32], strides = [1, 1]} : vector<2x32xf32> to vector<1x32xf32>
    %217 = vector.extract_strided_slice %215 {offsets = [1, 0], sizes = [1, 32], strides = [1, 1]} : vector<2x32xf32> to vector<1x32xf32>
    %cst_143 = arith.constant 6.000000e+00 : f32
    %218 = vector.broadcast %cst_143 : f32 to vector<1x16xf32>
    %219 = arith.mulf %214, %218 : vector<1x16xf32>
    %220 = arith.mulf %212, %213 : vector<1x16xf32>
    %c0_144 = arith.constant 0 : index
    %c0_145 = arith.constant 0 : index
    %221 = vector.load %arg10[%c0_144, %c0_145] : memref<2x16xf32, #tpu.memory_space<vmem>>, vector<2x16xf32>
    %c0_i32 = arith.constant 0 : i32
    %c4_i32 = arith.constant 4 : i32
    %222 = arith.addi %c0_i32, %c4_i32 : i32
    %c1_i32 = arith.constant 1 : i32
    %223 = scf.for %arg24 = %c0_i32 to %222 step %c1_i32 iter_args(%arg25 = %221) -> (vector<2x16xf32>)  : i32 {
      %237 = arith.index_cast %arg24 : i32 to index
      %c0_157 = arith.constant 0 : index
      %c0_158 = arith.constant 0 : index
      %238 = vector.load %arg22[%237, %c0_157, %c0_158] : memref<4x2x32xf32, #tpu.memory_space<vmem>>, vector<1x2x32xf32>
      %239 = vector.shape_cast %238 : vector<1x2x32xf32> to vector<2x32xf32>
      %240 = vector.broadcast %216 : vector<1x32xf32> to vector<2x32xf32>
      %241 = arith.mulf %239, %240 : vector<2x32xf32>
      %242 = vector.broadcast %217 : vector<1x32xf32> to vector<2x32xf32>
      %243 = arith.addf %241, %242 : vector<2x32xf32>
      %c0_159 = arith.constant 0 : index
      %c0_160 = arith.constant 0 : index
      %244 = vector.load %arg11[%c0_159, %c0_160] : memref<32x32xf32, #tpu.memory_space<vmem>>, vector<32x32xf32>
      %245 = vector.shape_cast %244 : vector<32x32xf32> to vector<1x32x32xf32>
      %246 = vector.shape_cast %243 : vector<2x32xf32> to vector<2x32x1xf32>
      %c0_161 = arith.constant 0 : index
      %c0_162 = arith.constant 0 : index
      %247 = vector.load %arg12[%c0_161, %c0_162] : memref<32x32xf32, #tpu.memory_space<vmem>>, vector<32x32xf32>
      %248 = vector.shape_cast %247 : vector<32x32xf32> to vector<1x32x32xf32>
      %249 = vector.broadcast %246 : vector<2x32x1xf32> to vector<2x32x32xf32>
      %250 = vector.broadcast %248 : vector<1x32x32xf32> to vector<2x32x32xf32>
      %251 = arith.subf %249, %250 : vector<2x32x32xf32>
      %c0_163 = arith.constant 0 : index
      %c0_164 = arith.constant 0 : index
      %252 = vector.load %arg13[%c0_163, %c0_164] : memref<32x32xf32, #tpu.memory_space<vmem>>, vector<32x32xf32>
      %253 = vector.shape_cast %252 : vector<32x32xf32> to vector<1x32x32xf32>
      %254 = vector.broadcast %253 : vector<1x32x32xf32> to vector<2x32x32xf32>
      %255 = arith.mulf %251, %254 : vector<2x32x32xf32>
      %cst_165 = arith.constant 5.000000e-01 : f32
      %256 = vector.broadcast %cst_165 : f32 to vector<2x32x32xf32>
      %257 = arith.mulf %256, %255 : vector<2x32x32xf32>
      %258 = math.tanh %257 : vector<2x32x32xf32>
      %cst_166 = arith.constant 5.000000e-01 : f32
      %259 = vector.broadcast %cst_166 : f32 to vector<2x32x32xf32>
      %260 = arith.mulf %259, %258 : vector<2x32x32xf32>
      %cst_167 = arith.constant 5.000000e-01 : f32
      %261 = vector.broadcast %cst_167 : f32 to vector<2x32x32xf32>
      %262 = arith.addf %260, %261 : vector<2x32x32xf32>
      %263 = vector.broadcast %245 : vector<1x32x32xf32> to vector<2x32x32xf32>
      %264 = arith.mulf %263, %262 : vector<2x32x32xf32>
      %cst_168 = arith.constant dense<0.000000e+00> : vector<2x32xf32>
      %265 = vector.multi_reduction <add>, %264, %cst_168 [1] : vector<2x32x32xf32> to vector<2x32xf32>
      %266 = vector.extract_strided_slice %265 {offsets = [0, 0], sizes = [2, 16], strides = [1, 1]} : vector<2x32xf32> to vector<2x16xf32>
      %267 = vector.extract_strided_slice %265 {offsets = [0, 16], sizes = [2, 16], strides = [1, 1]} : vector<2x32xf32> to vector<2x16xf32>
      %268 = vector.shape_cast %208 : vector<16x32xf32> to vector<1x16x32xf32>
      %269 = vector.shape_cast %arg25 : vector<2x16xf32> to vector<2x16x1xf32>
      %270 = vector.shape_cast %209 : vector<16x32xf32> to vector<1x16x32xf32>
      %271 = vector.broadcast %269 : vector<2x16x1xf32> to vector<2x16x32xf32>
      %272 = vector.broadcast %270 : vector<1x16x32xf32> to vector<2x16x32xf32>
      %273 = arith.subf %271, %272 : vector<2x16x32xf32>
      %274 = vector.shape_cast %210 : vector<16x32xf32> to vector<1x16x32xf32>
      %275 = vector.broadcast %274 : vector<1x16x32xf32> to vector<2x16x32xf32>
      %276 = arith.mulf %273, %275 : vector<2x16x32xf32>
      %cst_169 = arith.constant 5.000000e-01 : f32
      %277 = vector.broadcast %cst_169 : f32 to vector<2x16x32xf32>
      %278 = arith.mulf %277, %276 : vector<2x16x32xf32>
      %279 = math.tanh %278 : vector<2x16x32xf32>
      %cst_170 = arith.constant 5.000000e-01 : f32
      %280 = vector.broadcast %cst_170 : f32 to vector<2x16x32xf32>
      %281 = arith.mulf %280, %279 : vector<2x16x32xf32>
      %cst_171 = arith.constant 5.000000e-01 : f32
      %282 = vector.broadcast %cst_171 : f32 to vector<2x16x32xf32>
      %283 = arith.addf %281, %282 : vector<2x16x32xf32>
      %284 = vector.broadcast %268 : vector<1x16x32xf32> to vector<2x16x32xf32>
      %285 = arith.mulf %284, %283 : vector<2x16x32xf32>
      %cst_172 = arith.constant dense<0.000000e+00> : vector<2x32xf32>
      %286 = vector.multi_reduction <add>, %285, %cst_172 [1] : vector<2x16x32xf32> to vector<2x32xf32>
      %287 = vector.broadcast %219 : vector<1x16xf32> to vector<2x16xf32>
      %288 = arith.mulf %287, %arg25 : vector<2x16xf32>
      %289 = vector.broadcast %220 : vector<1x16xf32> to vector<2x16xf32>
      %290 = arith.addf %288, %289 : vector<2x16xf32>
      %291 = vector.extract_strided_slice %286 {offsets = [0, 0], sizes = [2, 16], strides = [1, 1]} : vector<2x32xf32> to vector<2x16xf32>
      %292 = arith.addf %291, %266 : vector<2x16xf32>
      %293 = arith.addf %290, %292 : vector<2x16xf32>
      %294 = arith.addf %219, %212 : vector<1x16xf32>
      %295 = vector.extract_strided_slice %286 {offsets = [0, 16], sizes = [2, 16], strides = [1, 1]} : vector<2x32xf32> to vector<2x16xf32>
      %296 = arith.addf %295, %267 : vector<2x16xf32>
      %297 = vector.broadcast %294 : vector<1x16xf32> to vector<2x16xf32>
      %298 = arith.addf %297, %296 : vector<2x16xf32>
      %cst_173 = arith.constant 9.99999993E-9 : f32
      %299 = vector.broadcast %cst_173 : f32 to vector<2x16xf32>
      %300 = arith.addf %298, %299 : vector<2x16xf32>
      %301 = arith.divf %293, %300 : vector<2x16xf32>
      %302 = vector.shape_cast %208 : vector<16x32xf32> to vector<1x16x32xf32>
      %303 = vector.shape_cast %301 : vector<2x16xf32> to vector<2x16x1xf32>
      %304 = vector.shape_cast %209 : vector<16x32xf32> to vector<1x16x32xf32>
      %305 = vector.broadcast %303 : vector<2x16x1xf32> to vector<2x16x32xf32>
      %306 = vector.broadcast %304 : vector<1x16x32xf32> to vector<2x16x32xf32>
      %307 = arith.subf %305, %306 : vector<2x16x32xf32>
      %308 = vector.shape_cast %210 : vector<16x32xf32> to vector<1x16x32xf32>
      %309 = vector.broadcast %308 : vector<1x16x32xf32> to vector<2x16x32xf32>
      %310 = arith.mulf %307, %309 : vector<2x16x32xf32>
      %cst_174 = arith.constant 5.000000e-01 : f32
      %311 = vector.broadcast %cst_174 : f32 to vector<2x16x32xf32>
      %312 = arith.mulf %311, %310 : vector<2x16x32xf32>
      %313 = math.tanh %312 : vector<2x16x32xf32>
      %cst_175 = arith.constant 5.000000e-01 : f32
      %314 = vector.broadcast %cst_175 : f32 to vector<2x16x32xf32>
      %315 = arith.mulf %314, %313 : vector<2x16x32xf32>
      %cst_176 = arith.constant 5.000000e-01 : f32
      %316 = vector.broadcast %cst_176 : f32 to vector<2x16x32xf32>
      %317 = arith.addf %315, %316 : vector<2x16x32xf32>
      %318 = vector.broadcast %302 : vector<1x16x32xf32> to vector<2x16x32xf32>
      %319 = arith.mulf %318, %317 : vector<2x16x32xf32>
      %cst_177 = arith.constant dense<0.000000e+00> : vector<2x32xf32>
      %320 = vector.multi_reduction <add>, %319, %cst_177 [1] : vector<2x16x32xf32> to vector<2x32xf32>
      %321 = vector.broadcast %219 : vector<1x16xf32> to vector<2x16xf32>
      %322 = arith.mulf %321, %301 : vector<2x16xf32>
      %323 = vector.broadcast %220 : vector<1x16xf32> to vector<2x16xf32>
      %324 = arith.addf %322, %323 : vector<2x16xf32>
      %325 = vector.extract_strided_slice %320 {offsets = [0, 0], sizes = [2, 16], strides = [1, 1]} : vector<2x32xf32> to vector<2x16xf32>
      %326 = arith.addf %325, %266 : vector<2x16xf32>
      %327 = arith.addf %324, %326 : vector<2x16xf32>
      %328 = arith.addf %219, %212 : vector<1x16xf32>
      %329 = vector.extract_strided_slice %320 {offsets = [0, 16], sizes = [2, 16], strides = [1, 1]} : vector<2x32xf32> to vector<2x16xf32>
      %330 = arith.addf %329, %267 : vector<2x16xf32>
      %331 = vector.broadcast %328 : vector<1x16xf32> to vector<2x16xf32>
      %332 = arith.addf %331, %330 : vector<2x16xf32>
      %cst_178 = arith.constant 9.99999993E-9 : f32
      %333 = vector.broadcast %cst_178 : f32 to vector<2x16xf32>
      %334 = arith.addf %332, %333 : vector<2x16xf32>
      %335 = arith.divf %327, %334 : vector<2x16xf32>
      %336 = vector.shape_cast %208 : vector<16x32xf32> to vector<1x16x32xf32>
      %337 = vector.shape_cast %335 : vector<2x16xf32> to vector<2x16x1xf32>
      %338 = vector.shape_cast %209 : vector<16x32xf32> to vector<1x16x32xf32>
      %339 = vector.broadcast %337 : vector<2x16x1xf32> to vector<2x16x32xf32>
      %340 = vector.broadcast %338 : vector<1x16x32xf32> to vector<2x16x32xf32>
      %341 = arith.subf %339, %340 : vector<2x16x32xf32>
      %342 = vector.shape_cast %210 : vector<16x32xf32> to vector<1x16x32xf32>
      %343 = vector.broadcast %342 : vector<1x16x32xf32> to vector<2x16x32xf32>
      %344 = arith.mulf %341, %343 : vector<2x16x32xf32>
      %cst_179 = arith.constant 5.000000e-01 : f32
      %345 = vector.broadcast %cst_179 : f32 to vector<2x16x32xf32>
      %346 = arith.mulf %345, %344 : vector<2x16x32xf32>
      %347 = math.tanh %346 : vector<2x16x32xf32>
      %cst_180 = arith.constant 5.000000e-01 : f32
      %348 = vector.broadcast %cst_180 : f32 to vector<2x16x32xf32>
      %349 = arith.mulf %348, %347 : vector<2x16x32xf32>
      %cst_181 = arith.constant 5.000000e-01 : f32
      %350 = vector.broadcast %cst_181 : f32 to vector<2x16x32xf32>
      %351 = arith.addf %349, %350 : vector<2x16x32xf32>
      %352 = vector.broadcast %336 : vector<1x16x32xf32> to vector<2x16x32xf32>
      %353 = arith.mulf %352, %351 : vector<2x16x32xf32>
      %cst_182 = arith.constant dense<0.000000e+00> : vector<2x32xf32>
      %354 = vector.multi_reduction <add>, %353, %cst_182 [1] : vector<2x16x32xf32> to vector<2x32xf32>
      %355 = vector.broadcast %219 : vector<1x16xf32> to vector<2x16xf32>
      %356 = arith.mulf %355, %335 : vector<2x16xf32>
      %357 = vector.broadcast %220 : vector<1x16xf32> to vector<2x16xf32>
      %358 = arith.addf %356, %357 : vector<2x16xf32>
      %359 = vector.extract_strided_slice %354 {offsets = [0, 0], sizes = [2, 16], strides = [1, 1]} : vector<2x32xf32> to vector<2x16xf32>
      %360 = arith.addf %359, %266 : vector<2x16xf32>
      %361 = arith.addf %358, %360 : vector<2x16xf32>
      %362 = arith.addf %219, %212 : vector<1x16xf32>
      %363 = vector.extract_strided_slice %354 {offsets = [0, 16], sizes = [2, 16], strides = [1, 1]} : vector<2x32xf32> to vector<2x16xf32>
      %364 = arith.addf %363, %267 : vector<2x16xf32>
      %365 = vector.broadcast %362 : vector<1x16xf32> to vector<2x16xf32>
      %366 = arith.addf %365, %364 : vector<2x16xf32>
      %cst_183 = arith.constant 9.99999993E-9 : f32
      %367 = vector.broadcast %cst_183 : f32 to vector<2x16xf32>
      %368 = arith.addf %366, %367 : vector<2x16xf32>
      %369 = arith.divf %361, %368 : vector<2x16xf32>
      %370 = vector.shape_cast %208 : vector<16x32xf32> to vector<1x16x32xf32>
      %371 = vector.shape_cast %369 : vector<2x16xf32> to vector<2x16x1xf32>
      %372 = vector.shape_cast %209 : vector<16x32xf32> to vector<1x16x32xf32>
      %373 = vector.broadcast %371 : vector<2x16x1xf32> to vector<2x16x32xf32>
      %374 = vector.broadcast %372 : vector<1x16x32xf32> to vector<2x16x32xf32>
      %375 = arith.subf %373, %374 : vector<2x16x32xf32>
      %376 = vector.shape_cast %210 : vector<16x32xf32> to vector<1x16x32xf32>
      %377 = vector.broadcast %376 : vector<1x16x32xf32> to vector<2x16x32xf32>
      %378 = arith.mulf %375, %377 : vector<2x16x32xf32>
      %cst_184 = arith.constant 5.000000e-01 : f32
      %379 = vector.broadcast %cst_184 : f32 to vector<2x16x32xf32>
      %380 = arith.mulf %379, %378 : vector<2x16x32xf32>
      %381 = math.tanh %380 : vector<2x16x32xf32>
      %cst_185 = arith.constant 5.000000e-01 : f32
      %382 = vector.broadcast %cst_185 : f32 to vector<2x16x32xf32>
      %383 = arith.mulf %382, %381 : vector<2x16x32xf32>
      %cst_186 = arith.constant 5.000000e-01 : f32
      %384 = vector.broadcast %cst_186 : f32 to vector<2x16x32xf32>
      %385 = arith.addf %383, %384 : vector<2x16x32xf32>
      %386 = vector.broadcast %370 : vector<1x16x32xf32> to vector<2x16x32xf32>
      %387 = arith.mulf %386, %385 : vector<2x16x32xf32>
      %cst_187 = arith.constant dense<0.000000e+00> : vector<2x32xf32>
      %388 = vector.multi_reduction <add>, %387, %cst_187 [1] : vector<2x16x32xf32> to vector<2x32xf32>
      %389 = vector.broadcast %219 : vector<1x16xf32> to vector<2x16xf32>
      %390 = arith.mulf %389, %369 : vector<2x16xf32>
      %391 = vector.broadcast %220 : vector<1x16xf32> to vector<2x16xf32>
      %392 = arith.addf %390, %391 : vector<2x16xf32>
      %393 = vector.extract_strided_slice %388 {offsets = [0, 0], sizes = [2, 16], strides = [1, 1]} : vector<2x32xf32> to vector<2x16xf32>
      %394 = arith.addf %393, %266 : vector<2x16xf32>
      %395 = arith.addf %392, %394 : vector<2x16xf32>
      %396 = arith.addf %219, %212 : vector<1x16xf32>
      %397 = vector.extract_strided_slice %388 {offsets = [0, 16], sizes = [2, 16], strides = [1, 1]} : vector<2x32xf32> to vector<2x16xf32>
      %398 = arith.addf %397, %267 : vector<2x16xf32>
      %399 = vector.broadcast %396 : vector<1x16xf32> to vector<2x16xf32>
      %400 = arith.addf %399, %398 : vector<2x16xf32>
      %cst_188 = arith.constant 9.99999993E-9 : f32
      %401 = vector.broadcast %cst_188 : f32 to vector<2x16xf32>
      %402 = arith.addf %400, %401 : vector<2x16xf32>
      %403 = arith.divf %395, %402 : vector<2x16xf32>
      %404 = vector.shape_cast %208 : vector<16x32xf32> to vector<1x16x32xf32>
      %405 = vector.shape_cast %403 : vector<2x16xf32> to vector<2x16x1xf32>
      %406 = vector.shape_cast %209 : vector<16x32xf32> to vector<1x16x32xf32>
      %407 = vector.broadcast %405 : vector<2x16x1xf32> to vector<2x16x32xf32>
      %408 = vector.broadcast %406 : vector<1x16x32xf32> to vector<2x16x32xf32>
      %409 = arith.subf %407, %408 : vector<2x16x32xf32>
      %410 = vector.shape_cast %210 : vector<16x32xf32> to vector<1x16x32xf32>
      %411 = vector.broadcast %410 : vector<1x16x32xf32> to vector<2x16x32xf32>
      %412 = arith.mulf %409, %411 : vector<2x16x32xf32>
      %cst_189 = arith.constant 5.000000e-01 : f32
      %413 = vector.broadcast %cst_189 : f32 to vector<2x16x32xf32>
      %414 = arith.mulf %413, %412 : vector<2x16x32xf32>
      %415 = math.tanh %414 : vector<2x16x32xf32>
      %cst_190 = arith.constant 5.000000e-01 : f32
      %416 = vector.broadcast %cst_190 : f32 to vector<2x16x32xf32>
      %417 = arith.mulf %416, %415 : vector<2x16x32xf32>
      %cst_191 = arith.constant 5.000000e-01 : f32
      %418 = vector.broadcast %cst_191 : f32 to vector<2x16x32xf32>
      %419 = arith.addf %417, %418 : vector<2x16x32xf32>
      %420 = vector.broadcast %404 : vector<1x16x32xf32> to vector<2x16x32xf32>
      %421 = arith.mulf %420, %419 : vector<2x16x32xf32>
      %cst_192 = arith.constant dense<0.000000e+00> : vector<2x32xf32>
      %422 = vector.multi_reduction <add>, %421, %cst_192 [1] : vector<2x16x32xf32> to vector<2x32xf32>
      %423 = vector.broadcast %219 : vector<1x16xf32> to vector<2x16xf32>
      %424 = arith.mulf %423, %403 : vector<2x16xf32>
      %425 = vector.broadcast %220 : vector<1x16xf32> to vector<2x16xf32>
      %426 = arith.addf %424, %425 : vector<2x16xf32>
      %427 = vector.extract_strided_slice %422 {offsets = [0, 0], sizes = [2, 16], strides = [1, 1]} : vector<2x32xf32> to vector<2x16xf32>
      %428 = arith.addf %427, %266 : vector<2x16xf32>
      %429 = arith.addf %426, %428 : vector<2x16xf32>
      %430 = arith.addf %219, %212 : vector<1x16xf32>
      %431 = vector.extract_strided_slice %422 {offsets = [0, 16], sizes = [2, 16], strides = [1, 1]} : vector<2x32xf32> to vector<2x16xf32>
      %432 = arith.addf %431, %267 : vector<2x16xf32>
      %433 = vector.broadcast %430 : vector<1x16xf32> to vector<2x16xf32>
      %434 = arith.addf %433, %432 : vector<2x16xf32>
      %cst_193 = arith.constant 9.99999993E-9 : f32
      %435 = vector.broadcast %cst_193 : f32 to vector<2x16xf32>
      %436 = arith.addf %434, %435 : vector<2x16xf32>
      %437 = arith.divf %429, %436 : vector<2x16xf32>
      %438 = vector.shape_cast %208 : vector<16x32xf32> to vector<1x16x32xf32>
      %439 = vector.shape_cast %437 : vector<2x16xf32> to vector<2x16x1xf32>
      %440 = vector.shape_cast %209 : vector<16x32xf32> to vector<1x16x32xf32>
      %441 = vector.broadcast %439 : vector<2x16x1xf32> to vector<2x16x32xf32>
      %442 = vector.broadcast %440 : vector<1x16x32xf32> to vector<2x16x32xf32>
      %443 = arith.subf %441, %442 : vector<2x16x32xf32>
      %444 = vector.shape_cast %210 : vector<16x32xf32> to vector<1x16x32xf32>
      %445 = vector.broadcast %444 : vector<1x16x32xf32> to vector<2x16x32xf32>
      %446 = arith.mulf %443, %445 : vector<2x16x32xf32>
      %cst_194 = arith.constant 5.000000e-01 : f32
      %447 = vector.broadcast %cst_194 : f32 to vector<2x16x32xf32>
      %448 = arith.mulf %447, %446 : vector<2x16x32xf32>
      %449 = math.tanh %448 : vector<2x16x32xf32>
      %cst_195 = arith.constant 5.000000e-01 : f32
      %450 = vector.broadcast %cst_195 : f32 to vector<2x16x32xf32>
      %451 = arith.mulf %450, %449 : vector<2x16x32xf32>
      %cst_196 = arith.constant 5.000000e-01 : f32
      %452 = vector.broadcast %cst_196 : f32 to vector<2x16x32xf32>
      %453 = arith.addf %451, %452 : vector<2x16x32xf32>
      %454 = vector.broadcast %438 : vector<1x16x32xf32> to vector<2x16x32xf32>
      %455 = arith.mulf %454, %453 : vector<2x16x32xf32>
      %cst_197 = arith.constant dense<0.000000e+00> : vector<2x32xf32>
      %456 = vector.multi_reduction <add>, %455, %cst_197 [1] : vector<2x16x32xf32> to vector<2x32xf32>
      %457 = vector.broadcast %219 : vector<1x16xf32> to vector<2x16xf32>
      %458 = arith.mulf %457, %437 : vector<2x16xf32>
      %459 = vector.broadcast %220 : vector<1x16xf32> to vector<2x16xf32>
      %460 = arith.addf %458, %459 : vector<2x16xf32>
      %461 = vector.extract_strided_slice %456 {offsets = [0, 0], sizes = [2, 16], strides = [1, 1]} : vector<2x32xf32> to vector<2x16xf32>
      %462 = arith.addf %461, %266 : vector<2x16xf32>
      %463 = arith.addf %460, %462 : vector<2x16xf32>
      %464 = arith.addf %219, %212 : vector<1x16xf32>
      %465 = vector.extract_strided_slice %456 {offsets = [0, 16], sizes = [2, 16], strides = [1, 1]} : vector<2x32xf32> to vector<2x16xf32>
      %466 = arith.addf %465, %267 : vector<2x16xf32>
      %467 = vector.broadcast %464 : vector<1x16xf32> to vector<2x16xf32>
      %468 = arith.addf %467, %466 : vector<2x16xf32>
      %cst_198 = arith.constant 9.99999993E-9 : f32
      %469 = vector.broadcast %cst_198 : f32 to vector<2x16xf32>
      %470 = arith.addf %468, %469 : vector<2x16xf32>
      %471 = arith.divf %463, %470 : vector<2x16xf32>
      %472 = arith.index_cast %arg24 : i32 to index
      %c0_199 = arith.constant 0 : index
      %c0_200 = arith.constant 0 : index
      %473 = vector.load %arg23[%472, %c0_199, %c0_200] : memref<4x2x16xf32, #tpu.memory_space<vmem>>, vector<1x2x16xf32>
      %474 = vector.shape_cast %473 : vector<1x2x16xf32> to vector<2x16xf32>
      %475 = vector.shape_cast %471 : vector<2x16xf32> to vector<1x2x16xf32>
      tpu.vector_store %arg23[%472, %c0_199, %c0_200], %475 {strides = array<i32>} : memref<4x2x16xf32, #tpu.memory_space<vmem>>, vector<1x2x16xf32>,
      scf.yield %471 : vector<2x16xf32>
    }
    %c4_i32_146 = arith.constant 4 : i32
    %c0_147 = arith.constant 0 : index
    %c0_148 = arith.constant 0 : index
    %224 = vector.load %arg21[%c0_147, %c0_148] : memref<2x16xf32, #tpu.memory_space<vmem>>, vector<2x16xf32>
    tpu.vector_store %arg21[%c0_147, %c0_148], %223 {strides = array<i32>} : memref<2x16xf32, #tpu.memory_space<vmem>>, vector<2x16xf32>,
    %c0_149 = arith.constant 0 : index
    %c0_150 = arith.constant 0 : index
    %225 = vector.load %arg19[%c0_149, %c0_150] : memref<2x4xf32, #tpu.memory_space<vmem>>, vector<2x4xf32>
    %226 = vector.extract_strided_slice %225 {offsets = [0, 0], sizes = [1, 4], strides = [1, 1]} : vector<2x4xf32> to vector<1x4xf32>
    %227 = vector.extract_strided_slice %225 {offsets = [1, 0], sizes = [1, 4], strides = [1, 1]} : vector<2x4xf32> to vector<1x4xf32>
    %c0_151 = arith.constant 0 : index
    %c0_152 = arith.constant 0 : index
    %c0_153 = arith.constant 0 : index
    %228 = vector.load %arg23[%c0_151, %c0_152, %c0_153] : memref<4x2x16xf32, #tpu.memory_space<vmem>>, vector<4x2x16xf32>
    %229 = vector.extract_strided_slice %228 {offsets = [0, 0, 0], sizes = [4, 2, 4], strides = [1, 1, 1]} : vector<4x2x16xf32> to vector<4x2x4xf32>
    %230 = vector.shape_cast %226 : vector<1x4xf32> to vector<1x1x4xf32>
    %231 = vector.broadcast %230 : vector<1x1x4xf32> to vector<4x2x4xf32>
    %232 = arith.mulf %229, %231 : vector<4x2x4xf32>
    %233 = vector.shape_cast %227 : vector<1x4xf32> to vector<1x1x4xf32>
    %234 = vector.broadcast %233 : vector<1x1x4xf32> to vector<4x2x4xf32>
    %235 = arith.addf %232, %234 : vector<4x2x4xf32>
    %c0_154 = arith.constant 0 : index
    %c0_155 = arith.constant 0 : index
    %c0_156 = arith.constant 0 : index
    %236 = vector.load %arg20[%c0_154, %c0_155, %c0_156] : memref<4x2x4xf32, #tpu.memory_space<vmem>>, vector<4x2x4xf32>
    tpu.vector_store %arg20[%c0_154, %c0_155, %c0_156], %235 {strides = array<i32>} : memref<4x2x4xf32, #tpu.memory_space<vmem>>, vector<4x2x4xf32>,
    return
  }
  func.func @transform_0(%arg0: i32) -> (i32, i32) {
    %c0_i32 = arith.constant 0 : i32
    %c0_i32_0 = arith.constant 0 : i32
    %c0_i32_1 = arith.constant 0 : i32
    return %c0_i32, %c0_i32_0 : i32, i32
  }
  func.func @transform_1(%arg0: i32) -> (i32, i32) {
    %c0_i32 = arith.constant 0 : i32
    %c0_i32_0 = arith.constant 0 : i32
    %c0_i32_1 = arith.constant 0 : i32
    return %c0_i32, %c0_i32_0 : i32, i32
  }
  func.func @transform_2(%arg0: i32) -> (i32, i32) {
    %c0_i32 = arith.constant 0 : i32
    %c0_i32_0 = arith.constant 0 : i32
    %c0_i32_1 = arith.constant 0 : i32
    return %c0_i32, %c0_i32_0 : i32, i32
  }
  func.func @transform_3(%arg0: i32) -> (i32, i32, i32) {
    %c0_i32 = arith.constant 0 : i32
    %c0_i32_0 = arith.constant 0 : i32
    %c0_i32_1 = arith.constant 0 : i32
    %c0_i32_2 = arith.constant 0 : i32
    return %c0_i32, %c0_i32_0, %c0_i32_1 : i32, i32, i32
  }
  func.func @transform_4(%arg0: i32) -> (i32, i32) {
    %c0_i32 = arith.constant 0 : i32
    %c0_i32_0 = arith.constant 0 : i32
    %c0_i32_1 = arith.constant 0 : i32
    return %c0_i32, %c0_i32_0 : i32, i32
  }
  func.func @transform_5(%arg0: i32) -> (i32, i32) {
    %c0_i32 = arith.constant 0 : i32
    %c0_i32_0 = arith.constant 0 : i32
    %c0_i32_1 = arith.constant 0 : i32
    return %c0_i32, %c0_i32_0 : i32, i32
  }
  func.func @transform_6(%arg0: i32) -> (i32, i32) {
    %c0_i32 = arith.constant 0 : i32
    %c0_i32_0 = arith.constant 0 : i32
    %c0_i32_1 = arith.constant 0 : i32
    return %c0_i32, %c0_i32_0 : i32, i32
  }
  func.func @transform_7(%arg0: i32) -> (i32, i32) {
    %c0_i32 = arith.constant 0 : i32
    %c0_i32_0 = arith.constant 0 : i32
    %c0_i32_1 = arith.constant 0 : i32
    return %c0_i32, %c0_i32_0 : i32, i32
  }
  func.func @transform_8(%arg0: i32) -> (i32, i32) {
    %c0_i32 = arith.constant 0 : i32
    %c0_i32_0 = arith.constant 0 : i32
    %c0_i32_1 = arith.constant 0 : i32
    return %c0_i32, %c0_i32_0 : i32, i32
  }
  func.func @transform_9(%arg0: i32) -> (i32, i32) {
    %c0_i32 = arith.constant 0 : i32
    %c0_i32_0 = arith.constant 0 : i32
    %c0_i32_1 = arith.constant 0 : i32
    return %c0_i32, %c0_i32_0 : i32, i32
  }
  func.func @transform_10(%arg0: i32) -> (i32, i32) {
    %c0_i32 = arith.constant 0 : i32
    %c0_i32_0 = arith.constant 0 : i32
    %c0_i32_1 = arith.constant 0 : i32
    return %c0_i32, %c0_i32_0 : i32, i32
  }
  func.func @transform_11(%arg0: i32) -> (i32, i32) {
    %c0_i32 = arith.constant 0 : i32
    %c0_i32_0 = arith.constant 0 : i32
    %c0_i32_1 = arith.constant 0 : i32
    return %c0_i32, %c0_i32_0 : i32, i32
  }
  func.func @transform_12(%arg0: i32) -> (i32, i32) {
    %c0_i32 = arith.constant 0 : i32
    %c0_i32_0 = arith.constant 0 : i32
    %c0_i32_1 = arith.constant 0 : i32
    return %c0_i32, %c0_i32_0 : i32, i32
  }
  func.func @transform_13(%arg0: i32) -> (i32, i32) {
    %c0_i32 = arith.constant 0 : i32
    %c0_i32_0 = arith.constant 0 : i32
    %c0_i32_1 = arith.constant 0 : i32
    return %c0_i32, %c0_i32_0 : i32, i32
  }
  func.func @transform_14(%arg0: i32) -> (i32, i32) {
    %c0_i32 = arith.constant 0 : i32
    %c0_i32_0 = arith.constant 0 : i32
    %c0_i32_1 = arith.constant 0 : i32
    return %c0_i32, %c0_i32_0 : i32, i32
  }
  func.func @transform_15(%arg0: i32) -> (i32, i32) {
    %c0_i32 = arith.constant 0 : i32
    %c0_i32_0 = arith.constant 0 : i32
    %c0_i32_1 = arith.constant 0 : i32
    return %c0_i32, %c0_i32_0 : i32, i32
  }
  func.func @transform_16(%arg0: i32) -> (i32, i32) {
    %c0_i32 = arith.constant 0 : i32
    %c0_i32_0 = arith.constant 0 : i32
    %c0_i32_1 = arith.constant 0 : i32
    return %c0_i32, %c0_i32_0 : i32, i32
  }
  func.func @transform_17(%arg0: i32) -> (i32, i32) {
    %c0_i32 = arith.constant 0 : i32
    %c0_i32_0 = arith.constant 0 : i32
    %c0_i32_1 = arith.constant 0 : i32
    return %c0_i32, %c0_i32_0 : i32, i32
  }
  func.func @transform_18(%arg0: i32) -> (i32, i32) {
    %c0_i32 = arith.constant 0 : i32
    %c0_i32_0 = arith.constant 0 : i32
    %c0_i32_1 = arith.constant 0 : i32
    return %c0_i32, %c0_i32_0 : i32, i32
  }
  func.func @transform_19(%arg0: i32) -> (i32, i32, i32) {
    %c0_i32 = arith.constant 0 : i32
    %c0_i32_0 = arith.constant 0 : i32
    %c0_i32_1 = arith.constant 0 : i32
    %c0_i32_2 = arith.constant 0 : i32
    return %c0_i32, %c0_i32_0, %c0_i32_1 : i32, i32, i32
  }
  func.func @transform_20(%arg0: i32) -> (i32, i32) {
    %c0_i32 = arith.constant 0 : i32
    %c0_i32_0 = arith.constant 0 : i32
    %c0_i32_1 = arith.constant 0 : i32
    return %c0_i32, %c0_i32_0 : i32, i32
  }
}

</mosaic_0001>

<bundles_post_ra>
// kernel: model_forward.2
= control target key start
LH: loop header
LB: loop body
LE: loop exit
PB: predicated region body
PF: predicated region fallthrough
CT: control target
= control target key end

     0   :  { %vm413_vm0 = vcmask 1044480   ;;  %vm414_vm1 = vcmask 1045504   ;;  %v998_v2 = vmov 65535   ;;  %vm409_vm2 = vcmask 613376   ;;  %s1495_s1 = inlined_call_operand.vmem [shape: bf16[75,1568], index: 1, kind: input, shape index: {}]   ;;  %s1496_s0 = inlined_call_operand.vmem [shape: bf16[8,75], index: 0, kind: input, shape index: {}]   ;;  %s1497_s2 = inlined_call_operand.vmem [shape: f32[8,1], index: 2, kind: input, shape index: {}]   ;;  %s1498_s3 = inlined_call_operand.vmem [shape: bf16[8,1568], index: 3, kind: output, shape index: {}]  }
   0x1   :  { %v867_v0 = vld [vmem:[%s1495_s1 + $0x1a0] sm:$0xf]  ;;  %v988_v1 = vld [vmem:[%s1495_s1 + $0x1d0] sm:$0x30]  ;;  %v415_v3 = vsel %vm413_vm0, 4294967295, %v998_v2  ;;  %vm651_vm3 = vcmask 257024  }
   0x2   :  { %v868_v4 = vor.u32 %v988_v1, %v867_v0  ;;  %v1026_v5 = vsel %vm414_vm1, %v415_v3, 0  ;;  %v982_v6 = vld [vmem:[%s1495_s1 + $0x1a4] sm:$0xf]  ;;  %v869_v7 = vld [vmem:[%s1495_s1 + $0x1d4] sm:$0x30] }
   0x3   :  { %v872_v8 = vor.u32 %v982_v6, %v869_v7  ;;  %v875_v9 = vld [vmem:[%s1495_s1 + $0x1a8] sm:$0xf]  ;;  %v989_v10 = vld [vmem:[%s1495_s1 + $0x1d8] sm:$0x30]  ;;  %v983_v11 = vld [vmem:[%s1495_s1 + $0x1ac] sm:$0xf] }
   0x4   :  { %v418_v12 = vand.u32 %v868_v4, %v1026_v5  ;;  %v876_v13 = vor.u32 %v989_v10, %v875_v9  ;;  %v877_v14 = vld [vmem:[%s1495_s1 + $0x1dc] sm:$0x30]  ;;  %v815_v15 = vld [vmem:[%s1495_s1 + $0x138] sm:$0xf]  ;;  %v975_v16 = vld [vmem:[%s1495_s1 + $0x168] sm:$0xf0] }
   0x5   :  { %v421_v17 = vand.u32 %v872_v8, %v1026_v5  ;;  %v880_v18 = vor.u32 %v983_v11, %v877_v14  ;;  %v969_v19 = vld [vmem:[%s1495_s1 + $0x13c] sm:$0xf]  ;;  %v817_v20 = vld [vmem:[%s1495_s1 + $0x16c] sm:$0xf0]  ;;  %v823_v21 = vld [vmem:[%s1495_s1 + $0x140] sm:$0xf]  ;;  %v816_v23 = vor.u32 %v975_v16, %v815_v15 }
   0x6   :  { %459 = vmatpush.bf16.msra.mxu0 %v418_v12  ;;  %v424_v22 = vand.u32 %v876_v13, %v1026_v5  ;;  %v976_v24 = vld [vmem:[%s1495_s1 + $0x170] sm:$0xf0]  ;;  %v970_v25 = vld [vmem:[%s1495_s1 + $0x144] sm:$0xf]  ;;  %v825_v26 = vld [vmem:[%s1495_s1 + $0x174] sm:$0xf0]  ;;  %v820_v28 = vor.u32 %v969_v19, %v817_v20 }
   0x7   :  { %472 = vmatpush.bf16.msra.mxu1 %v421_v17  ;;  %v427_v27 = vand.u32 %v880_v18, %v1026_v5  ;;  %v763_v29 = vld [vmem:[%s1495_s1 + $0xd0] sm:$0xf]  ;;  %v962_v30 = vld [vmem:[%s1495_s1 + $0x100] sm:$0xf0]  ;;  %v824_v31 = vor.u32 %v976_v24, %v823_v21  ;;  %v956_v32 = vld [vmem:[%s1495_s1 + $0xd4] sm:$0xf]  ;;  %v828_v34 = vor.u32 %v970_v25, %v825_v26 }
   0x8   :  { %485 = vmatpush.bf16.msra.mxu2 %v424_v22  ;;  %v765_v33 = vld [vmem:[%s1495_s1 + $0x104] sm:$0xf0]  ;;  %v771_v35 = vld [vmem:[%s1495_s1 + $0xd8] sm:$0xf]  ;;  %v963_v36 = vld [vmem:[%s1495_s1 + $0x108] sm:$0xf0]  ;;  %v764_v37 = vor.u32 %v962_v30, %v763_v29 }
   0x9   :  { %498 = vmatpush.bf16.msra.mxu3 %v427_v27  ;;  %v957_v38 = vld [vmem:[%s1495_s1 + $0xdc] sm:$0xf]  ;;  %v773_v39 = vld [vmem:[%s1495_s1 + $0x10c] sm:$0xf0]  ;;  %v711_v40 = vld [vmem:[%s1495_s1 + $0x68] sm:$0xf]  ;;  %v768_v41 = vor.u32 %v956_v32, %v765_v33  ;;  %v772_v45 = vor.u32 %v963_v36, %v771_v35 }
   0xa   :  { %460 = vmatpush.bf16.msra.mxu0 %v816_v23  ;;  %v949_v42 = vld [vmem:[%s1495_s1 + $0x98] sm:$0xf0]  ;;  %v943_v43 = vld [vmem:[%s1495_s1 + $0x6c] sm:$0xf]  ;;  %v713_v44 = vld [vmem:[%s1495_s1 + $0x9c] sm:$0xf0]  ;;  %v776_v49 = vor.u32 %v957_v38, %v773_v39 }
   0xb   :  { %473 = vmatpush.bf16.msra.mxu1 %v820_v28  ;;  %v719_v46 = vld [vmem:[%s1495_s1 + $0x70] sm:$0xf]  ;;  %v950_v47 = vld [vmem:[%s1495_s1 + $0xa0] sm:$0xf0]  ;;  %v944_v48 = vld [vmem:[%s1495_s1 + $0x74] sm:$0xf]  ;;  %v712_v53 = vor.u32 %v949_v42, %v711_v40  ;;  %v716_v57 = vor.u32 %v943_v43, %v713_v44 }
   0xc   :  { %486 = vmatpush.bf16.msra.mxu2 %v824_v31  ;;  %v721_v50 = vld [vmem:[%s1495_s1 + $0xa4] sm:$0xf0]  ;;  %v659_v51 = vld [vmem:[%s1495_s1] sm:$0xf]  ;;  %v883_v52 = vld [vmem:[%s1495_s1 + $0x1b0] sm:$0xf]  ;;  %v720_v62 = vor.u32 %v950_v47, %v719_v46 }
   0xd   :  { %499 = vmatpush.bf16.msra.mxu3 %v828_v34  ;;  %v990_v54 = vld [vmem:[%s1495_s1 + $0x1e0] sm:$0x30]  ;;  %v984_v55 = vld [vmem:[%s1495_s1 + $0x1b4] sm:$0xf]  ;;  %v885_v56 = vld [vmem:[%s1495_s1 + $0x1e4] sm:$0x30]  ;;  %v724_v3 = vor.u32 %v944_v48, %v721_v50 }
   0xe   :  { %461 = vmatpush.bf16.msra.mxu0 %v764_v37  ;;  %v936_v58 = vld [vmem:[%s1495_s1 + $0x30] sm:$0xf0]  ;;  %v930_v59 = vld [vmem:[%s1495_s1 + $0x4] sm:$0xf]  ;;  %v661_v60 = vld [vmem:[%s1495_s1 + $0x34] sm:$0xf0]  ;;  %v884_v61 = vor.u32 %v990_v54, %v883_v52  ;;  %v888_v63 = vor.u32 %v984_v55, %v885_v56 }
   0xf   :  { %474 = vmatpush.bf16.msra.mxu1 %v768_v41  ;;  %v667_v0 = vld [vmem:[%s1495_s1 + $0x8] sm:$0xf]  ;;  %v937_v1 = vld [vmem:[%s1495_s1 + $0x38] sm:$0xf0]  ;;  %v891_v2 = vld [vmem:[%s1495_s1 + $0x1b8] sm:$0xf]  ;;  %v660_v8 = vor.u32 %v936_v58, %v659_v51  ;;  %v664_v13 = vor.u32 %v930_v59, %v661_v60 }
  0x10   :  { %487 = vmatpush.bf16.msra.mxu2 %v772_v45  ;;  %v991_v4 = vld [vmem:[%s1495_s1 + $0x1e8] sm:$0x30]  ;;  %v985_v6 = vld [vmem:[%s1495_s1 + $0x1bc] sm:$0xf]  ;;  %v893_v7 = vld [vmem:[%s1495_s1 + $0x1ec] sm:$0x30]  ;;  %v430_v14 = vand.u32 %v884_v61, %v1026_v5  ;;  %v433_v15 = vand.u32 %v888_v63, %v1026_v5  ;;  %v668_v16 = vor.u32 %v937_v1, %v667_v0 }
  0x11   :  { %500 = vmatpush.bf16.msra.mxu3 %v776_v49  ;;  %v931_v9 = vld [vmem:[%s1495_s1 + $0xc] sm:$0xf]  ;;  %v669_v10 = vld [vmem:[%s1495_s1 + $0x3c] sm:$0xf0]  ;;  %v892_v11 = vor.u32 %v991_v4, %v891_v2  ;;  %v896_v12 = vor.u32 %v985_v6, %v893_v7  ;;  %v831_v17 = vld [vmem:[%s1495_s1 + $0x148] sm:$0xf] }
  0x12   :  { %462 = vmatpush.bf16.msra.mxu0 %v712_v53  ;;  %v977_v18 = vld [vmem:[%s1495_s1 + $0x178] sm:$0xf0]  ;;  %v672_v19 = vor.u32 %v931_v9, %v669_v10  ;;  %v971_v20 = vld [vmem:[%s1495_s1 + $0x14c] sm:$0xf]  ;;  %v833_v21 = vld [vmem:[%s1495_s1 + $0x17c] sm:$0xf0] }
  0x13   :  { %475 = vmatpush.bf16.msra.mxu1 %v716_v57  ;;  %v1187_v22 = vld [vmem:[%s1496_s0] sm:$0xf]  ;;  %v436_v23 = vand.u32 %v892_v11, %v1026_v5  ;;  %v439_v24 = vand.u32 %v896_v12, %v1026_v5  ;;  %v839_v25 = vld [vmem:[%s1495_s1 + $0x150] sm:$0xf]  ;;  %v832_v26 = vor.u32 %v977_v18, %v831_v17  ;;  %v978_v27 = vld [vmem:[%s1495_s1 + $0x180] sm:$0xf0]  ;;  %v836_v30 = vor.u32 %v971_v20, %v833_v21 }
  0x14   :  { %488 = vmatpush.bf16.msra.mxu2 %v720_v62  ;;  %v972_v28 = vld [vmem:[%s1495_s1 + $0x154] sm:$0xf]  ;;  %v841_v29 = vld [vmem:[%s1495_s1 + $0x184] sm:$0xf0]  ;;  %v779_v31 = vld [vmem:[%s1495_s1 + $0xe0] sm:$0xf]  ;;  %v840_v36 = vor.u32 %v978_v27, %v839_v25 }
  0x15   :  { %501 = vmatpush.bf16.msra.mxu3 %v724_v3  ;;  %v964_v32 = vld [vmem:[%s1495_s1 + $0x110] sm:$0xf0]  ;;  %v958_v33 = vld [vmem:[%s1495_s1 + $0xe4] sm:$0xf]  ;;  %v781_v34 = vld [vmem:[%s1495_s1 + $0x114] sm:$0xf0]  ;;  %v844_v37 = vor.u32 %v972_v28, %v841_v29 }
  0x16   :  { %463 = vmatpush.bf16.msra.mxu0 %v660_v8  ;;  %v787_v35 = vld [vmem:[%s1495_s1 + $0xe8] sm:$0xf]  ;;  %v965_v38 = vld [vmem:[%s1495_s1 + $0x118] sm:$0xf0]  ;;  %v959_v39 = vld [vmem:[%s1495_s1 + $0xec] sm:$0xf]  ;;  %v780_v40 = vor.u32 %v964_v32, %v779_v31  ;;  %v784_v44 = vor.u32 %v958_v33, %v781_v34 }
  0x17   :  { %476 = vmatpush.bf16.msra.mxu1 %v664_v13  ;;  %v789_v41 = vld [vmem:[%s1495_s1 + $0x11c] sm:$0xf0]  ;;  %v727_v42 = vld [vmem:[%s1495_s1 + $0x78] sm:$0xf]  ;;  %v951_v43 = vld [vmem:[%s1495_s1 + $0xa8] sm:$0xf0]  ;;  %v788_v53 = vor.u32 %v965_v38, %v787_v35 }
  0x18   :  { %489 = vmatpush.bf16.msra.mxu2 %v668_v16  ;;  %v945_v45 = vld [vmem:[%s1495_s1 + $0x7c] sm:$0xf]  ;;  %v729_v46 = vld [vmem:[%s1495_s1 + $0xac] sm:$0xf0]  ;;  %v86_v47 = vld [vmem:[%s1497_s2] sm:$0xff]  ;;  %v999_v48 = vmov 0   ;;  %v792_v54 = vor.u32 %v959_v39, %v789_v41  ;;  %v728_v58 = vor.u32 %v951_v43, %v727_v42 }
  0x19   :  { %917 = vmatmul.msk.bf16.vlgmr.msra.gmra.mxu0 %vm409_vm2, %v1187_v22  ;;  %502 = vmatpush.bf16.msra.mxu3 %v672_v19  ;;  %v735_v49 = vld [vmem:[%s1495_s1 + $0x80] sm:$0xf]  ;;  %v952_v50 = vld [vmem:[%s1495_s1 + $0xb0] sm:$0xf0]  ;;  %v946_v55 = vld [vmem:[%s1495_s1 + $0x84] sm:$0xf]  ;;  %v732_v62 = vor.u32 %v945_v45, %v729_v46 }
  0x1a   :  { %511 = vmatpush.bf16.msrb.mxu0 %v430_v14  ;;  %918 = vmatmul.msk.bf16.vlgmr.msra.gmra.mxu1 %vm409_vm2, %v1187_v22  ;;  %v899_v51 = vld [vmem:[%s1495_s1 + $0x1c0] sm:$0xf]  ;;  %v992_v52 = vld [vmem:[%s1495_s1 + $0x1f0] sm:$0x30]  ;;  %v986_v56 = vld [vmem:[%s1495_s1 + $0x1c4] sm:$0xf]  ;;  %v736_v8 = vor.u32 %v952_v50, %v735_v49 }
  0x1b   :  { %524 = vmatpush.bf16.msrb.mxu1 %v433_v15  ;;  %919 = vmatmul.msk.bf16.vlgmr.msra.gmra.mxu2 %vm409_vm2, %v1187_v22  ;;  %v901_v57 = vld [vmem:[%s1495_s1 + $0x1f4] sm:$0x30]  ;;  %v675_v60 = vld [vmem:[%s1495_s1 + $0x10] sm:$0xf]  ;;  %v938_v61 = vld [vmem:[%s1495_s1 + $0x40] sm:$0xf0]  ;;  %v900_v0 = vor.u32 %v992_v52, %v899_v51 }
  0x1c   :  { %537 = vmatpush.bf16.msrb.mxu2 %v436_v23  ;;  %920 = vmatmul.msk.bf16.vlgmr.msra.gmra.mxu3 %vm409_vm2, %v1187_v22  ;;  %v737_v59 = vld [vmem:[%s1495_s1 + $0xb4] sm:$0xf0]  ;;  %v932_v63 = vld [vmem:[%s1495_s1 + $0x14] sm:$0xf]  ;;  %v907_v1 = vld [vmem:[%s1495_s1 + $0x1c8] sm:$0xf]  ;;  %v904_v4 = vor.u32 %v986_v56, %v901_v57  ;;  %v676_v10 = vor.u32 %v938_v61, %v675_v60 }
  0x1d   :  { %550 = vmatpush.bf16.msrb.mxu3 %v439_v24  ;;  %997 = vset.pattern.permute.xlu0 %v999_v48  ;;  %v993_v2 = vld [vmem:[%s1495_s1 + $0x1f8] sm:$0x30]  ;;  %v677_v3 = vld [vmem:[%s1495_s1 + $0x44] sm:$0xf0]  ;;  %v987_v6 = vld [vmem:[%s1495_s1 + $0x1cc] sm:$0xf]  ;;  %v740_v9 = vor.u32 %v946_v55, %v737_v59  ;;  %v442_v15 = vand.u32 %v900_v0, %v1026_v5 }
  0x1e   :  { %512 = vmatpush.bf16.msrb.mxu0 %v832_v26  ;;  %89 = vperm.xlu0 %997, %v86_v47   ;;  %v909_v7 = vld [vmem:[%s1495_s1 + $0x1fc] sm:$0x30]  ;;  %v683_v11 = vld [vmem:[%s1495_s1 + $0x18] sm:$0xf]  ;;  %v939_v12 = vld [vmem:[%s1495_s1 + $0x48] sm:$0xf0]  ;;  %v908_v13 = vor.u32 %v993_v2, %v907_v1  ;;  %v680_v14 = vor.u32 %v932_v63, %v677_v3  ;;  %v445_v19 = vand.u32 %v904_v4, %v1026_v5 }
  0x1f   :  { %525 = vmatpush.bf16.msrb.mxu1 %v836_v30  ;;  %v933_v16 = vld [vmem:[%s1495_s1 + $0x1c] sm:$0xf]  ;;  %v685_v17 = vld [vmem:[%s1495_s1 + $0x4c] sm:$0xf0]  ;;  %v912_v18 = vor.u32 %v987_v6, %v909_v7  ;;  %v847_v20 = vld [vmem:[%s1495_s1 + $0x158] sm:$0xf]  ;;  %v684_v21 = vor.u32 %v939_v12, %v683_v11 }
  0x20   :  { %538 = vmatpush.bf16.msrb.mxu2 %v840_v36  ;;  %v979_v23 = vld [vmem:[%s1495_s1 + $0x188] sm:$0xf0]  ;;  %v973_v24 = vld [vmem:[%s1495_s1 + $0x15c] sm:$0xf]  ;;  %v849_v25 = vld [vmem:[%s1495_s1 + $0x18c] sm:$0xf0]  ;;  %v688_v26 = vor.u32 %v933_v16, %v685_v17  ;;  %v448_v27 = vand.u32 %v908_v13, %v1026_v5 }
  0x21   :  { %551 = vmatpush.bf16.msrb.mxu3 %v844_v37  ;;  %v451_v28 = vand.u32 %v912_v18, %v1026_v5  ;;  %v855_v29 = vld [vmem:[%s1495_s1 + $0x160] sm:$0xf]  ;;  %v980_v30 = vld [vmem:[%s1495_s1 + $0x190] sm:$0xf0]  ;;  %v848_v31 = vor.u32 %v979_v23, %v847_v20  ;;  %v852_v32 = vor.u32 %v973_v24, %v849_v25  ;;  %v974_v33 = vld [vmem:[%s1495_s1 + $0x164] sm:$0xf] }
  0x22   :  { %513 = vmatpush.bf16.msrb.mxu0 %v780_v40  ;;  %v857_v34 = vld [vmem:[%s1495_s1 + $0x194] sm:$0xf0]  ;;  %v795_v35 = vld [vmem:[%s1495_s1 + $0xf0] sm:$0xf]  ;;  %v966_v36 = vld [vmem:[%s1495_s1 + $0x120] sm:$0xf0]  ;;  %v856_v39 = vor.u32 %v980_v30, %v855_v29 }
  0x23   :  { %526 = vmatpush.bf16.msrb.mxu1 %v784_v44  ;;  %v960_v37 = vld [vmem:[%s1495_s1 + $0xf4] sm:$0xf]  ;;  %v797_v38 = vld [vmem:[%s1495_s1 + $0x124] sm:$0xf0]  ;;  %v860_v40 = vor.u32 %v974_v33, %v857_v34  ;;  %v803_v41 = vld [vmem:[%s1495_s1 + $0xf8] sm:$0xf]  ;;  %v796_v43 = vor.u32 %v966_v36, %v795_v35 }
  0x24   :  { %539 = vmatpush.bf16.msrb.mxu2 %v788_v53  ;;  %v967_v42 = vld [vmem:[%s1495_s1 + $0x128] sm:$0xf0]  ;;  %v800_v44 = vor.u32 %v960_v37, %v797_v38  ;;  %v961_v45 = vld [vmem:[%s1495_s1 + $0xfc] sm:$0xf]  ;;  %v805_v46 = vld [vmem:[%s1495_s1 + $0x12c] sm:$0xf0] }
  0x25   :  { %552 = vmatpush.bf16.msrb.mxu3 %v792_v54  ;;  %v743_v47 = vld [vmem:[%s1495_s1 + $0x88] sm:$0xf]  ;;  %v953_v48 = vld [vmem:[%s1495_s1 + $0xb8] sm:$0xf0]  ;;  %v947_v49 = vld [vmem:[%s1495_s1 + $0x8c] sm:$0xf]  ;;  %v804_v51 = vor.u32 %v967_v42, %v803_v41  ;;  %v808_v54 = vor.u32 %v961_v45, %v805_v46 }
  0x26   :  { %514 = vmatpush.bf16.msrb.mxu0 %v728_v58  ;;  %v745_v50 = vld [vmem:[%s1495_s1 + $0xbc] sm:$0xf0]  ;;  %v915_v52 = vld [vmem:[%s1495_s1 + $0x1d0] sm:$0xf]  ;;  %v994_v53 = vld [vmem:[%s1495_s1 + $0x200] sm:$0x30]  ;;  %v744_v57 = vor.u32 %v953_v48, %v743_v47 }
  0x27   :  { %527 = vmatpush.bf16.msrb.mxu1 %v732_v62  ;;  %v751_v55 = vld [vmem:[%s1495_s1 + $0x90] sm:$0xf]  ;;  %v954_v56 = vld [vmem:[%s1495_s1 + $0xc0] sm:$0xf0]  ;;  %v748_v58 = vor.u32 %v947_v49, %v745_v50  ;;  %v948_v59 = vld [vmem:[%s1495_s1 + $0x94] sm:$0xf]  ;;  %v916_v1 = vor.u32 %v994_v53, %v915_v52 }
  0x28   :  { %540 = vmatpush.bf16.msrb.mxu2 %v736_v8  ;;  %v753_v60 = vld [vmem:[%s1495_s1 + $0xc4] sm:$0xf0]  ;;  %v691_v61 = vld [vmem:[%s1495_s1 + $0x20] sm:$0xf]  ;;  %v940_v62 = vld [vmem:[%s1495_s1 + $0x50] sm:$0xf0]  ;;  %v752_v2 = vor.u32 %v954_v56, %v751_v55 }
  0x29   :  { %553 = vmatpush.bf16.msrb.mxu3 %v740_v9  ;;  %v934_v63 = vld [vmem:[%s1495_s1 + $0x24] sm:$0xf]  ;;  %v693_v0 = vld [vmem:[%s1495_s1 + $0x54] sm:$0xf0]  ;;  %v756_v3 = vor.u32 %v948_v59, %v753_v60  ;;  %v699_v4 = vld [vmem:[%s1495_s1 + $0x28] sm:$0xf]  ;;  %v692_v7 = vor.u32 %v940_v62, %v691_v61  ;;  %v454_v11 = vand.u32 %v916_v1, %v1026_v5 }
  0x2a   :  { %515 = vmatpush.bf16.msrb.mxu0 %v676_v10  ;;  %v941_v6 = vld [vmem:[%s1495_s1 + $0x58] sm:$0xf0]  ;;  %v696_v8 = vor.u32 %v934_v63, %v693_v0  ;;  %v935_v9 = vld [vmem:[%s1495_s1 + $0x2c] sm:$0xf]  ;;  %v701_v10 = vld [vmem:[%s1495_s1 + $0x5c] sm:$0xf0] }
  0x2b   :  { %528 = vmatpush.bf16.msrb.mxu1 %v680_v14  ;;  %v700_v12 = vor.u32 %v941_v6, %v699_v4  ;;  %v863_v13 = vld [vmem:[%s1495_s1 + $0x168] sm:$0xf]  ;;  %v981_v14 = vld [vmem:[%s1495_s1 + $0x198] sm:$0xf0]  ;;  %v811_v5 = vld [vmem:[%s1495_s1 + $0x100] sm:$0xf] }
  0x2c   :  { %541 = vmatpush.bf16.msrb.mxu2 %v684_v21  ;;  %v864_v16 = vor.u32 %v981_v14, %v863_v13  ;;  %v968_v17 = vld [vmem:[%s1495_s1 + $0x130] sm:$0xf0]  ;;  %v955_v20 = vld [vmem:[%s1495_s1 + $0xc8] sm:$0xf0]  ;;  %v707_v23 = vld [vmem:[%s1495_s1 + $0x30] sm:$0xf] }
  0x2d   :  { %921 = vmatmul.msk.bf16.vlgmr.msrb.gmra.mxu0 %vm409_vm2, %v1187_v22  ;;  %554 = vmatpush.bf16.msrb.mxu3 %v688_v26  ;;  %v812_v18 = vor.u32 %v968_v17, %v811_v5  ;;  %v942_v24 = vld [vmem:[%s1495_s1 + $0x60] sm:$0xf0] }
  0x2e   :  { %563 = vmatpush.bf16.msra.mxu0 %v442_v15  ;;  %922 = vmatmul.msk.bf16.vlgmr.msrb.gmra.mxu1 %vm409_vm2, %v1187_v22  ;;  %v704_v15 = vor.u32 %v935_v9, %v701_v10  ;;  %v708_v25 = vor.u32 %v942_v24, %v707_v23 }
  0x2f   :  { %576 = vmatpush.bf16.msra.mxu1 %v445_v19  ;;  %923 = vmatmul.msk.bf16.vlgmr.msrb.gmra.mxu2 %vm409_vm2, %v1187_v22  ;;  %v759_v19 = vld [vmem:[%s1495_s1 + $0x98] sm:$0xf] }
  0x30   :  { %589 = vmatpush.bf16.msra.mxu2 %v448_v27  ;;  %924 = vmatmul.msk.bf16.vlgmr.msrb.gmra.mxu3 %vm409_vm2, %v1187_v22  ;;  %v760_v21 = vor.u32 %v955_v20, %v759_v19 }
  0x31   :  { %602 = vmatpush.bf16.msra.mxu3 %v451_v28 }
  0x32   :  { %564 = vmatpush.bf16.msra.mxu0 %v848_v31 }
  0x33   :  { %577 = vmatpush.bf16.msra.mxu1 %v852_v32 }
  0x34   :  { %590 = vmatpush.bf16.msra.mxu2 %v856_v39 }
  0x35   :  { %603 = vmatpush.bf16.msra.mxu3 %v860_v40 }
  0x36   :  { %565 = vmatpush.bf16.msra.mxu0 %v796_v43 }
  0x37   :  { %578 = vmatpush.bf16.msra.mxu1 %v800_v44 }
  0x38   :  { %591 = vmatpush.bf16.msra.mxu2 %v804_v51 }
  0x39   :  { %604 = vmatpush.bf16.msra.mxu3 %v808_v54 }
  0x3a   :  { %566 = vmatpush.bf16.msra.mxu0 %v744_v57 }
  0x3b   :  { %579 = vmatpush.bf16.msra.mxu1 %v748_v58 }
  0x3c   :  { %592 = vmatpush.bf16.msra.mxu2 %v752_v2 }
  0x3d   :  { %605 = vmatpush.bf16.msra.mxu3 %v756_v3 }
  0x3e   :  { %567 = vmatpush.bf16.msra.mxu0 %v692_v7 }
  0x3f   :  { %580 = vmatpush.bf16.msra.mxu1 %v696_v8 }
  0x40   :  { %593 = vmatpush.bf16.msra.mxu2 %v700_v12 }
  0x41   :  { %925 = vmatmul.msk.bf16.vlgmr.msra.gmra.mxu0 %vm409_vm2, %v1187_v22  ;;  %606 = vmatpush.bf16.msra.mxu3 %v704_v15 }
  0x42   :  { %615 = vmatpush.bf16.msrb.mxu0 %v454_v11  ;;  %926 = vmatmul.msk.bf16.vlgmr.msra.gmra.mxu1 %vm409_vm2, %v1187_v22 }
  0x43   :  { %927 = vmatmul.msk.bf16.vlgmr.msra.gmra.mxu2 %vm409_vm2, %v1187_v22 }
  0x44   :  { %928 = vmatmul.msk.bf16.vlgmr.msra.gmra.mxu3 %vm409_vm2, %v1187_v22 }
  0x46   :  { %616 = vmatpush.bf16.msrb.mxu0 %v864_v16 }
  0x4a   :  { %617 = vmatpush.bf16.msrb.mxu0 %v812_v18 }
  0x4e   :  { %618 = vmatpush.bf16.msrb.mxu0 %v760_v21 }
  0x52   :  { %619 = vmatpush.bf16.msrb.mxu0 %v708_v25 }
  0x55   :  { %929 = vmatmul.msk.bf16.vlgmr.msrb.gmra.mxu0 %vm409_vm2, %v1187_v22 }
  0x90   :  { %v1459_v26 = vpop.permute.xlu0 %89 }
  0x96   :  { %v465_v27 = vpop.f32.mrf.mxu0 }
  0x97   :  { %v466_v28 = vadd.f32 %v465_v27, %v1459_v26  ;;  %v478_v29 = vpop.f32.mrf.mxu1 }
  0x98   :  { %v479_v30 = vadd.f32 %v478_v29, %v1459_v26 }
  0x99   :  { %v625_v31 = vmax.f32 %v466_v28, 0.0 }
  0x9a   :  { %v626_v32 = vmax.f32 %v479_v30, 0.0 }
  0x9c   :  { %v638_v33 = vpack.c.bf16 %v626_v32, %v625_v31 }
  0x9e   :  { %v467_v34 = vpop.f32.mrf.mxu0  ;;  %645 = vst [vmem:[%s1498_s3] sm:$0xff] %v638_v33  ;;  %v491_v35 = vpop.f32.mrf.mxu2 }
  0x9f   :  { %v480_v36 = vpop.f32.mrf.mxu1  ;;  %v492_v22 = vadd.f32 %v491_v35, %v1459_v26  ;;  %v504_v37 = vpop.f32.mrf.mxu3 }
  0xa0   :  { %v505_v38 = vadd.f32 %v504_v37, %v1459_v26 }
  0xa1   :  { %v627_v39 = vmax.f32 %v492_v22, 0.0 }
  0xa2   :  { %v628_v40 = vmax.f32 %v505_v38, 0.0 }
  0xa4   :  { %v639_v41 = vpack.c.bf16 %v628_v40, %v627_v39 }
  0xa6   :  { %646 = vst [vmem:[%s1498_s3 + $0x8] sm:$0xff] %v639_v41  ;;  %v493_v43 = vpop.f32.mrf.mxu2 }
  0xa7   :  { %v506_v45 = vpop.f32.mrf.mxu3 }
  0xaa   :  { %v517_v42 = vpop.f32.mrf.mxu0 }
  0xab   :  { %v518_v44 = vadd.f32 %v517_v42, %v1459_v26  ;;  %v530_v46 = vpop.f32.mrf.mxu1 }
  0xac   :  { %v531_v48 = vadd.f32 %v530_v46, %v1459_v26 }
  0xad   :  { %v629_v47 = vmax.f32 %v518_v44, 0.0 }
  0xae   :  { %v630_v49 = vmax.f32 %v531_v48, 0.0 }
  0xb0   :  { %v640_v50 = vpack.c.bf16 %v630_v49, %v629_v47 }
  0xb2   :  { %v519_v51 = vpop.f32.mrf.mxu0  ;;  %647 = vst [vmem:[%s1498_s3 + $0x10] sm:$0xff] %v640_v50  ;;  %v543_v53 = vpop.f32.mrf.mxu2 }
  0xb3   :  { %v532_v52 = vpop.f32.mrf.mxu1  ;;  %v544_v54 = vadd.f32 %v543_v53, %v1459_v26  ;;  %v556_v55 = vpop.f32.mrf.mxu3 }
  0xb4   :  { %v557_v56 = vadd.f32 %v556_v55, %v1459_v26 }
  0xb5   :  { %v631_v57 = vmax.f32 %v544_v54, 0.0 }
  0xb6   :  { %v632_v58 = vmax.f32 %v557_v56, 0.0 }
  0xb8   :  { %v641_v59 = vpack.c.bf16 %v632_v58, %v631_v57 }
  0xba   :  { %648 = vst [vmem:[%s1498_s3 + $0x18] sm:$0xff] %v641_v59  ;;  %v545_v61 = vpop.f32.mrf.mxu2 }
  0xbb   :  { %v558_v63 = vpop.f32.mrf.mxu3 }
  0xbe   :  { %v569_v60 = vpop.f32.mrf.mxu0 }
  0xbf   :  { %v570_v62 = vadd.f32 %v569_v60, %v1459_v26  ;;  %v582_v0 = vpop.f32.mrf.mxu1 }
  0xc0   :  { %v583_v1 = vadd.f32 %v582_v0, %v1459_v26 }
  0xc1   :  { %v633_v2 = vmax.f32 %v570_v62, 0.0 }
  0xc2   :  { %v634_v3 = vmax.f32 %v583_v1, 0.0 }
  0xc4   :  { %v642_v4 = vpack.c.bf16 %v634_v3, %v633_v2 }
  0xc6   :  { %649 = vst [vmem:[%s1498_s3 + $0x20] sm:$0xff] %v642_v4  ;;  %v571_v6 = vpop.f32.mrf.mxu0  ;;  %v595_v7 = vpop.f32.mrf.mxu2 }
  0xc7   :  { %v596_v8 = vadd.f32 %v595_v7, %v1459_v26  ;;  %v608_v9 = vpop.f32.mrf.mxu3  ;;  %v584_v10 = vpop.f32.mrf.mxu1 }
  0xc8   :  { %v609_v11 = vadd.f32 %v608_v9, %v1459_v26 }
  0xc9   :  { %v635_v12 = vmax.f32 %v596_v8, 0.0 }
  0xca   :  { %v636_v13 = vmax.f32 %v609_v11, 0.0 }
  0xcc   :  { %v643_v14 = vpack.c.bf16 %v636_v13, %v635_v12 }
  0xce   :  { %650 = vst [vmem:[%s1498_s3 + $0x28] sm:$0xff] %v643_v14  ;;  %v597_v15 = vpop.f32.mrf.mxu2 }
  0xcf   :  { %v610_v16 = vpop.f32.mrf.mxu3 }
  0xd2   :  { %v621_v5 = vpop.f32.mrf.mxu0 }
  0xd3   :  { %v622_v17 = vadd.f32 %v621_v5, %v1459_v26 }
  0xd5   :  { %v637_v18 = vmax.f32 %v622_v17, 0.0 }
  0xd7   :  { %v644_v19 = vpack.c.bf16 %v637_v18, %v637_v18 }
  0xd9   :  { %652 = vst.msk [vmem:[%s1498_s3 + $0x30] sm:$0xf] %vm651_vm3, %v644_v19 }
  0xda   :  { %v623_v20 = vpop.f32.mrf.mxu0 }

// kernel: model_forward.3
= control target key start
LH: loop header
LB: loop body
LE: loop exit
PB: predicated region body
PF: predicated region fallthrough
CT: control target
= control target key end

     0   :  { %s3603_s0 = inlined_call_operand.vmem [shape: bf16[288,72], index: 0, kind: input, shape index: {}]   ;;  %s3604_s1 = inlined_call_operand.vmem [shape: bf16[72,16], index: 1, kind: input, shape index: {}]   ;;  %s3605_s2 = inlined_call_operand.vmem [shape: f32[1,16], index: 2, kind: input, shape index: {}]   ;;  %s3606_s3 = inlined_call_operand.vmem [shape: f32[36,16,64], index: 3, kind: input, shape index: {}]   ;;  %s3607_s4 = inlined_call_operand.vmem [shape: f32[1,64], index: 4, kind: input, shape index: {}]   ;;  %s3608_s5 = inlined_call_operand.vmem [shape: f32[64,48], index: 5, kind: input, shape index: {}]   ;;  %s3609_s6 = inlined_call_operand.vmem [shape: f32[1,48], index: 6, kind: input, shape index: {}]   ;;  %s3610_s7 = inlined_call_operand.vmem [shape: f32[48,32], index: 7, kind: input, shape index: {}]   ;;  %s3611_s8 = inlined_call_operand.vmem [shape: f32[1,32], index: 8, kind: input, shape index: {}]   ;;  %s3612_s9 = inlined_call_operand.vmem [shape: f32[2,16], index: 9, kind: input, shape index: {}]   ;;  %s3613_s10 = inlined_call_operand.vmem [shape: f32[32,32], index: 10, kind: input, shape index: {}]   ;;  %s3614_s11 = inlined_call_operand.vmem [shape: f32[32,32], index: 11, kind: input, shape index: {}]   ;;  %s3615_s12 = inlined_call_operand.vmem [shape: f32[32,32], index: 12, kind: input, shape index: {}]   ;;  %s3616_s13 = inlined_call_operand.vmem [shape: f32[16,32], index: 13, kind: input, shape index: {}]   ;;  %s3617_s14 = inlined_call_operand.vmem [shape: f32[16,32], index: 14, kind: input, shape index: {}]   ;;  %s3618_s15 = inlined_call_operand.vmem [shape: f32[16,32], index: 15, kind: input, shape index: {}]   ;;  %s3619_s16 = inlined_call_operand.vmem [shape: f32[3,16], index: 16, kind: input, shape index: {}]   ;;  %s3620_s17 = inlined_call_operand.vmem [shape: f32[2,32], index: 17, kind: input, shape index: {}]   ;;  %s3621_s18 = inlined_call_operand.vmem [shape: f32[2,4], index: 18, kind: input, shape index: {}]   ;;  %s3622_s19 = inlined_call_operand.vmem [shape: f32[4,2,4], index: 19, kind: output, shape index: {0}]   ;;  %s3623_s20 = inlined_call_operand.hbm [shape: f32[2,16], index: 20, kind: output, shape index: {1}]  }
   0x1   :  { %3627 = sst [smem:[#allocation7_spill]] %s3603_s0 }
   0x2   :  { %3628 = sst [smem:[#allocation8_spill]] %s3604_s1 }
   0x3   :  { %3629 = sst [smem:[#allocation9_spill]] %s3605_s2 }
   0x4   :  { %3630 = sst [smem:[#allocation10_spill]] %s3606_s3 }
   0x5   :  { %3631 = sst [smem:[#allocation11_spill]] %s3607_s4 }
   0x6   :  { %26 = vsyncpa [#allocation5], 0  ;;  %s3632_s23 = sld [smem:[#allocation8_spill]]  ;;  %vm287_vm0 = vcmask 1043456   ;;  %vm232_vm1 = vcmask 588800   ;;  %vm431_vm2 = vcmask 130048  }
   0x7   :  { %s3633_s0 = sld [smem:[#allocation7_spill]]  ;;  %vm1414_vm3 = vcmask 523264   ;;  %vm1449_vm4 = vcmask 392192   ;;  %vm1480_vm5 = vcmask 254976  }
   0x8   :  { %s3634_s22 = sld [smem:[#allocation10_spill]] }
   0x9   :  { %s3635_s30 = sld [smem:[#allocation9_spill]] }
   0xa   :  { %s3636_s27 = sld [smem:[#allocation11_spill]] }
   0xc   :  { %v110_v0 = vld [vmem:[%s3632_s23 + $0x20] sm:$0xf]  ;;  %v2564_v4 = vld [vmem:[%s3632_s23 + $0x18] sm:$0xff]  ;;  %v2563_v5 = vld [vmem:[%s3632_s23 + $0x10] sm:$0xff] }
   0xd   :  { %v222_v1 = vunpack.c.l.b16 %v110_v0  ;;  %v2562_v6 = vld [vmem:[%s3632_s23 + $0x8] sm:$0xff]  ;;  %v2561_v7 = vld [vmem:[%s3632_s23] sm:$0xff]  ;;  %v2545_v10 = vld [vmem:[%s3633_s0 + $0x10] sm:$0xff] }
   0xe   :  { %v2543_v8 = vld [vmem:[%s3633_s0] sm:$0xff]  ;;  %v2544_v9 = vld [vmem:[%s3633_s0 + $0x8] sm:$0xff]  ;;  %v2546_v11 = vld [vmem:[%s3633_s0 + $0x18] sm:$0xff] }
   0xf   :  { %v227_v2 = vpack.c.b16 %v222_v1, %v222_v1  ;;  %v2547_v12 = vld [vmem:[%s3633_s0 + $0x20] sm:$0xff]  ;;  %v2552_v13 = vld [vmem:[%s3633_s0 + $0x48] sm:$0xff]  ;;  %v2554_v14 = vld [vmem:[%s3633_s0 + $0x58] sm:$0xff] }
  0x10   :  { %v2557_v15 = vld [vmem:[%s3633_s0 + $0x70] sm:$0xff]  ;;  %v2439_v16 = vld [vmem:[%s3634_s22 + $0x28] sm:$0xff]  ;;  %v2555_v19 = vld [vmem:[%s3633_s0 + $0x60] sm:$0xff] }
  0x11   :  { %v289_v3 = vsel %vm287_vm0, %v227_v2, 0  ;;  %v2548_v17 = vld [vmem:[%s3633_s0 + $0x28] sm:$0xff]  ;;  %v2553_v18 = vld [vmem:[%s3633_s0 + $0x50] sm:$0xff]  ;;  %v2558_v20 = vld [vmem:[%s3633_s0 + $0x78] sm:$0xff] }
  0x12   :  { %294 = vmatpush.bf16.msra.mxu0 %v289_v3  ;;  %2565 = vmatpush.bf16.msra.mxu1 %v289_v3  ;;  %v2549_v21 = vld [vmem:[%s3633_s0 + $0x30] sm:$0xff]  ;;  %v2435_v22 = vld [vmem:[%s3634_s22 + $0x18] sm:$0xff]  ;;  %v2556_v24 = vld [vmem:[%s3633_s0 + $0x68] sm:$0xff] }
  0x13   :  { %2566 = vmatpush.bf16.msra.mxu2 %v289_v3  ;;  %2567 = vmatpush.bf16.msra.mxu3 %v289_v3  ;;  %v2434_v23 = vld [vmem:[%s3634_s22 + $0x10] sm:$0xff]  ;;  %v2559_v25 = vld [vmem:[%s3633_s0 + $0x80] sm:$0xff]  ;;  %v2550_v26 = vld [vmem:[%s3633_s0 + $0x38] sm:$0xff] }
  0x14   :  { %v427_v27 = vld [vmem:[%s3634_s22 + $0x8] sm:$0xff]  ;;  %v426_v28 = vld [vmem:[%s3634_s22] sm:$0xff]  ;;  %v2448_v38 = vld [vmem:[%s3634_s22 + $0x58] sm:$0xff] }
  0x15   :  { %v2438_v29 = vld [vmem:[%s3634_s22 + $0x20] sm:$0xff]  ;;  %v2560_v30 = vld [vmem:[%s3633_s0 + $0x88] sm:$0xff]  ;;  %v2442_v40 = vld [vmem:[%s3634_s22 + $0x38] sm:$0xff] }
  0x16   :  { %295 = vmatpush.bf16.msra.mxu0 %v2564_v4  ;;  %2568 = vmatpush.bf16.msra.mxu1 %v2564_v4  ;;  %v2551_v31 = vld [vmem:[%s3633_s0 + $0x40] sm:$0xff]  ;;  %v2445_v33 = vld [vmem:[%s3634_s22 + $0x48] sm:$0xff]  ;;  %v2447_v41 = vld [vmem:[%s3634_s22 + $0x50] sm:$0xff] }
  0x17   :  { %2569 = vmatpush.bf16.msra.mxu2 %v2564_v4  ;;  %2570 = vmatpush.bf16.msra.mxu3 %v2564_v4  ;;  %v2444_v34 = vld [vmem:[%s3634_s22 + $0x40] sm:$0xff]  ;;  %v2441_v42 = vld [vmem:[%s3634_s22 + $0x30] sm:$0xff]  ;;  %v2451_v48 = vld [vmem:[%s3634_s22 + $0x68] sm:$0xff] }
  0x18   :  { %v2958_v35 = vld [vmem:[%s3635_s30] ss:$0 sm:$0xff]  ;;  %v2454_v52 = vld [vmem:[%s3634_s22 + $0x78] sm:$0xff]  ;;  %v2453_v54 = vld [vmem:[%s3634_s22 + $0x70] sm:$0xff] }
  0x19   :  { %v2450_v49 = vld [vmem:[%s3634_s22 + $0x60] sm:$0xff]  ;;  %v2457_v57 = vld [vmem:[%s3634_s22 + $0x88] sm:$0xff]  ;;  %v2460_v62 = vld [vmem:[%s3634_s22 + $0x98] sm:$0xff] }
  0x1a   :  { %296 = vmatpush.bf16.msra.mxu0 %v2563_v5  ;;  %2571 = vmatpush.bf16.msra.mxu1 %v2563_v5  ;;  %v2456_v59 = vld [vmem:[%s3634_s22 + $0x80] sm:$0xff]  ;;  %v2459_v0 = vld [vmem:[%s3634_s22 + $0x90] sm:$0xff]  ;;  %v2463_v3 = vld [vmem:[%s3634_s22 + $0xa8] sm:$0xff] }
  0x1b   :  { %2572 = vmatpush.bf16.msra.mxu2 %v2563_v5  ;;  %2573 = vmatpush.bf16.msra.mxu3 %v2563_v5  ;;  %v2462_v5 = vld [vmem:[%s3634_s22 + $0xa0] sm:$0xff] }
  0x1e   :  { %297 = vmatpush.bf16.msra.mxu0 %v2562_v6  ;;  %2574 = vmatpush.bf16.msra.mxu1 %v2562_v6 }
  0x1f   :  { %2575 = vmatpush.bf16.msra.mxu2 %v2562_v6  ;;  %2576 = vmatpush.bf16.msra.mxu3 %v2562_v6 }
  0x22   :  { %298 = vmatpush.bf16.msra.mxu0 %v2561_v7  ;;  %2577 = vmatpush.bf16.msra.mxu1 %v2561_v7 }
  0x23   :  { %2578 = vmatpush.bf16.msra.mxu2 %v2561_v7  ;;  %2579 = vmatpush.bf16.msra.mxu3 %v2561_v7 }
  0x25   :  { %2416 = vmatmul.msk.bf16.vlgmr.msra.gmra.mxu0 %vm232_vm1, %v2543_v8  ;;  %2425 = vmatmul.msk.bf16.vlgmr.msra.gmra.mxu1 %vm232_vm1, %v2552_v13  ;;  %v2466_v8 = vld [vmem:[%s3634_s22 + $0xb8] sm:$0xff]  ;;  %v2469_v13 = vld [vmem:[%s3634_s22 + $0xc8] sm:$0xff] }
  0x26   :  { %2427 = vmatmul.msk.bf16.vlgmr.msra.gmra.mxu2 %vm232_vm1, %v2554_v14  ;;  %2430 = vmatmul.msk.bf16.vlgmr.msra.gmra.mxu3 %vm232_vm1, %v2557_v15  ;;  %v2468_v15 = vld [vmem:[%s3634_s22 + $0xc0] sm:$0xff] }
  0x27   :  { %498 = vmatpush.msrb.mxu0 %v2439_v16  ;;  %449 = vmatpush.msrb.mxu1 %v2435_v22 }
  0x28   :  { %552 = vmatpush.msrb.mxu2 %v2445_v33  ;;  %579 = vmatpush.msrb.mxu3 %v2448_v38  ;;  %v2480_v38 = vld [vmem:[%s3634_s22 + $0x100] sm:$0xff] }
  0x29   :  { %450 = vmatpush.msrb.mxu1 %v2434_v23  ;;  %499 = vmatpush.msrb.mxu0 %v2438_v29  ;;  %v2475_v23 = vld [vmem:[%s3634_s22 + $0xe8] sm:$0xff] }
  0x2a   :  { %553 = vmatpush.msrb.mxu2 %v2444_v34  ;;  %580 = vmatpush.msrb.mxu3 %v2447_v41  ;;  %v2481_v34 = vld [vmem:[%s3634_s22 + $0x108] sm:$0xff] }
  0x2b   :  { %472 = vmatpush.msra.mxu1 %v427_v27 }
  0x2c   :  { %633 = vmatpush.msra.mxu2 %v2454_v52  ;;  %660 = vmatpush.msra.mxu3 %v2457_v57 }
  0x2d   :  { %473 = vmatpush.msra.mxu1 %v426_v28  ;;  %v2478_v28 = vld [vmem:[%s3634_s22 + $0xf8] sm:$0xff] }
  0x2e   :  { %634 = vmatpush.msra.mxu2 %v2453_v54  ;;  %661 = vmatpush.msra.mxu3 %v2456_v59  ;;  %v2493_v54 = vld [vmem:[%s3634_s22 + $0x148] sm:$0xff] }
  0x35   :  { %2417 = vmatmul.msk.bf16.gmra.mxu0 %vm232_vm1, %v2544_v9  ;;  %2426 = vmatmul.msk.bf16.gmra.mxu1 %vm232_vm1, %v2553_v18  ;;  %v2472_v18 = vld [vmem:[%s3634_s22 + $0xd8] sm:$0xff] }
  0x36   :  { %2428 = vmatmul.msk.bf16.gmra.mxu2 %vm232_vm1, %v2555_v19  ;;  %2431 = vmatmul.msk.bf16.gmra.mxu3 %vm232_vm1, %v2558_v20  ;;  %v2471_v20 = vld [vmem:[%s3634_s22 + $0xd0] sm:$0xff] }
  0x45   :  { %2418 = vmatmul.msk.bf16.gmra.mxu0 %vm232_vm1, %v2545_v10  ;;  %v2465_v10 = vld [vmem:[%s3634_s22 + $0xb0] sm:$0xff] }
  0x46   :  { %2429 = vmatmul.msk.bf16.gmra.mxu2 %vm232_vm1, %v2556_v24  ;;  %2432 = vmatmul.msk.bf16.gmra.mxu3 %vm232_vm1, %v2559_v25  ;;  %v2474_v25 = vld [vmem:[%s3634_s22 + $0xe0] sm:$0xff] }
  0x55   :  { %2419 = vmatmul.msk.bf16.gmra.mxu0 %vm232_vm1, %v2546_v11 }
  0x56   :  { %2433 = vmatmul.msk.bf16.gmra.mxu3 %vm232_vm1, %v2560_v30  ;;  %v2477_v30 = vld [vmem:[%s3634_s22 + $0xf0] sm:$0xff] }
  0x65   :  { %2420 = vmatmul.msk.bf16.gmra.mxu0 %vm232_vm1, %v2547_v12 }
  0x75   :  { %2421 = vmatmul.msk.bf16.gmra.mxu0 %vm232_vm1, %v2548_v17 }
  0x85   :  { %2422 = vmatmul.msk.bf16.gmra.mxu0 %vm232_vm1, %v2549_v21 }
  0x95   :  { %2423 = vmatmul.msk.bf16.gmra.mxu0 %vm232_vm1, %v2550_v26 }
  0xa2   :  { %v300_v32 = vpop.f32.mrf.mxu0  ;;  %v345_v41 = vpop.f32.mrf.mxu1 }
  0xa3   :  { %v301_v43 = vadd.f32 %v2958_v35, %v300_v32 }
  0xa5   :  { %2424 = vmatmul.msk.bf16.gmra.mxu0 %vm232_vm1, %v2551_v31  ;;  %v390_v46 = vmax.f32 %v301_v43, 0.0 }
  0xa9   :  { %v3057_v33 = vpop.f32.mrf.mxu2 }
  0xaa   :  { %v302_v36 = vpop.f32.mrf.mxu0  ;;  %v347_v52 = vpop.f32.mrf.mxu1 }
  0xab   :  { %v303_v37 = vadd.f32 %v2958_v35, %v302_v36 }
  0xad   :  { %v391_v39 = vmax.f32 %v303_v37, 0.0  ;;  %v2487_v37 = vld [vmem:[%s3634_s22 + $0x128] sm:$0xff] }
  0xaf   :  { %2436 = vmatmul.msk.f32.vlgmr.msrb.gmra.mxu1 %vm431_vm2, %v391_v39  ;;  %v2486_v39 = vld [vmem:[%s3634_s22 + $0x120] sm:$0xff] }
  0xb0   :  { %525 = vmatpush.msrb.mxu1 %v2442_v40  ;;  %v2484_v40 = vld [vmem:[%s3634_s22 + $0x118] sm:$0xff] }
  0xb2   :  { %v305_v44 = vpop.f32.mrf.mxu0  ;;  %526 = vmatpush.msrb.mxu1 %v2441_v42 }
  0xb3   :  { %v306_v45 = vadd.f32 %v2958_v35, %v305_v44 }
  0xb5   :  { %v392_v47 = vmax.f32 %v306_v45, 0.0  ;;  %v3076_v45 = vpop.f32.mrf.mxu2 }
  0xb7   :  { %2437 = vmatmul.msk.f32.vlgmr.msra.gmra.mxu1 %vm431_vm2, %v390_v46  ;;  %2440 = vmatmul.msk.f32.vlgmr.msrb.gmra.mxu0 %vm431_vm2, %v392_v47  ;;  %v2483_v46 = vld [vmem:[%s3634_s22 + $0x110] sm:$0xff]  ;;  %v2490_v47 = vld [vmem:[%s3634_s22 + $0x138] sm:$0xff] }
  0xb8   :  { %606 = vmatpush.msra.mxu1 %v2451_v48  ;;  %v2489_v48 = vld [vmem:[%s3634_s22 + $0x130] sm:$0xff] }
  0xba   :  { %v307_v50 = vpop.f32.mrf.mxu0  ;;  %607 = vmatpush.msra.mxu1 %v2450_v49 }
  0xbb   :  { %v308_v51 = vadd.f32 %v2958_v35, %v307_v50  ;;  %v3088_v50 = vpop.f32.mrf.mxu3 }
  0xbd   :  { %v393_v53 = vmax.f32 %v308_v51, 0.0 }
  0xbf   :  { %2443 = vmatmul.msk.f32.vlgmr.msrb.gmra.mxu1 %vm431_vm2, %v393_v53 }
  0xc0   :  { %687 = vmatpush.msrb.mxu1 %v2460_v62  ;;  %v2496_v62 = vld [vmem:[%s3634_s22 + $0x158] sm:$0xff] }
  0xc2   :  { %v310_v55 = vpop.f32.mrf.mxu0  ;;  %688 = vmatpush.msrb.mxu1 %v2459_v0  ;;  %v2495_v0 = vld [vmem:[%s3634_s22 + $0x150] sm:$0xff] }
  0xc3   :  { %v311_v56 = vadd.f32 %v2958_v35, %v310_v55  ;;  %v360_v55 = vpop.f32.mrf.mxu2  ;;  %v3099_v59 = vpop.f32.mrf.mxu3 }
  0xc5   :  { %v394_v58 = vmax.f32 %v311_v56, 0.0  ;;  %v2492_v56 = vld [vmem:[%s3634_s22 + $0x140] sm:$0xff] }
  0xc7   :  { %2446 = vmatmul.msk.f32.vlgmr.msrb.gmra.mxu2 %vm431_vm2, %v394_v58 }
  0xc8   :  { %714 = vmatpush.msrb.mxu2 %v2463_v3 }
  0xca   :  { %v312_v60 = vpop.f32.mrf.mxu0  ;;  %715 = vmatpush.msrb.mxu2 %v2462_v5 }
  0xcb   :  { %v313_v61 = vadd.f32 %v2958_v35, %v312_v60 }
  0xcd   :  { %v395_v63 = vmax.f32 %v313_v61, 0.0  ;;  %v350_v61 = vpop.f32.mrf.mxu1 }
  0xcf   :  { %2449 = vmatmul.msk.f32.vlgmr.msrb.gmra.mxu3 %vm431_vm2, %v395_v63  ;;  %v346_v63 = vadd.f32 %v2958_v35, %v345_v41  ;;  %v2522_v41 = vld [vmem:[%s3634_s22 + $0x1e0] sm:$0xff] }
  0xd0   :  { %741 = vmatpush.msrb.mxu3 %v2466_v8  ;;  %v3116_v8 = vpop.f32.mrf.mxu3 }
  0xd1   :  { %v408_v3 = vmax.f32 %v346_v63, 0.0 }
  0xd2   :  { %v315_v1 = vpop.f32.mrf.mxu0  ;;  %742 = vmatpush.msrb.mxu3 %v2465_v10  ;;  %v2498_v10 = vld [vmem:[%s3634_s22 + $0x160] sm:$0xff] }
  0xd3   :  { %v316_v2 = vadd.f32 %v2958_v35, %v315_v1  ;;  %v362_v1 = vpop.f32.mrf.mxu2 }
  0xd5   :  { %v396_v4 = vmax.f32 %v316_v2, 0.0 }
  0xd7   :  { %2452 = vmatmul.msk.f32.vlgmr.msra.gmra.mxu1 %vm431_vm2, %v396_v4 }
  0xd8   :  { %768 = vmatpush.msra.mxu1 %v2469_v13  ;;  %v348_v13 = vadd.f32 %v2958_v35, %v347_v52 }
  0xda   :  { %v317_v6 = vpop.f32.mrf.mxu0  ;;  %769 = vmatpush.msra.mxu1 %v2468_v15 }
  0xdb   :  { %v318_v7 = vadd.f32 %v2958_v35, %v317_v6  ;;  %v2499_v6 = vld [vmem:[%s3634_s22 + $0x168] sm:$0xff] }
  0xdd   :  { %v397_v9 = vmax.f32 %v318_v7, 0.0  ;;  %v2505_v7 = vld [vmem:[%s3634_s22 + $0x188] sm:$0xff] }
  0xdf   :  { %2455 = vmatmul.msk.f32.vlgmr.msra.gmra.mxu2 %vm431_vm2, %v397_v9  ;;  %v352_v9 = vpop.f32.mrf.mxu1 }
  0xe0   :  { %795 = vmatpush.msra.mxu2 %v2472_v18  ;;  %v409_v18 = vmax.f32 %v348_v13, 0.0 }
  0xe2   :  { %v320_v11 = vpop.f32.mrf.mxu0  ;;  %796 = vmatpush.msra.mxu2 %v2471_v20  ;;  %v2502_v20 = vld [vmem:[%s3634_s22 + $0x178] sm:$0xff] }
  0xe3   :  { %v321_v12 = vadd.f32 %v2958_v35, %v320_v11  ;;  %v2504_v11 = vld [vmem:[%s3634_s22 + $0x180] sm:$0xff] }
  0xe5   :  { %v398_v14 = vmax.f32 %v321_v12, 0.0  ;;  %v353_v12 = vadd.f32 %v2958_v35, %v352_v9 }
  0xe7   :  { %2458 = vmatmul.msk.f32.vlgmr.msra.gmra.mxu3 %vm431_vm2, %v398_v14 }
  0xe8   :  { %822 = vmatpush.msra.mxu3 %v2475_v23  ;;  %v351_v23 = vadd.f32 %v2958_v35, %v350_v61 }
  0xea   :  { %v322_v16 = vpop.f32.mrf.mxu0  ;;  %823 = vmatpush.msra.mxu3 %v2474_v25  ;;  %v361_v25 = vadd.f32 %v2958_v35, %v360_v55  ;;  %v2531_v55 = vld [vmem:[%s3634_s22 + $0x210] sm:$0xff] }
  0xeb   :  { %v323_v17 = vadd.f32 %v2958_v35, %v322_v16  ;;  %v365_v16 = vpop.f32.mrf.mxu2 }
  0xec   :  { %v366_v52 = vadd.f32 %v2958_v35, %v365_v16 }
  0xed   :  { %v399_v19 = vmax.f32 %v323_v17, 0.0  ;;  %v411_v17 = vmax.f32 %v353_v12, 0.0 }
  0xef   :  { %2461 = vmatmul.msk.f32.vlgmr.msrb.gmra.mxu1 %vm431_vm2, %v399_v19 }
  0xf0   :  { %849 = vmatpush.msrb.mxu1 %v2478_v28  ;;  %v2513_v28 = vld [vmem:[%s3634_s22 + $0x1b0] sm:$0xff] }
  0xf2   :  { %v325_v21 = vpop.f32.mrf.mxu0  ;;  %850 = vmatpush.msrb.mxu1 %v2477_v30  ;;  %v410_v30 = vmax.f32 %v351_v23, 0.0 }
  0xf3   :  { %v326_v22 = vadd.f32 %v2958_v35, %v325_v21  ;;  %v2508_v21 = vld [vmem:[%s3634_s22 + $0x198] sm:$0xff] }
  0xf5   :  { %v400_v24 = vmax.f32 %v326_v22, 0.0  ;;  %v2514_v22 = vld [vmem:[%s3634_s22 + $0x1b8] sm:$0xff] }
  0xf7   :  { %2464 = vmatmul.msk.f32.vlgmr.msrb.gmra.mxu2 %vm431_vm2, %v400_v24  ;;  %v2501_v24 = vld [vmem:[%s3634_s22 + $0x170] sm:$0xff] }
  0xf8   :  { %876 = vmatpush.msrb.mxu2 %v2481_v34  ;;  %v367_v34 = vpop.f32.mrf.mxu2 }
  0xfa   :  { %v327_v26 = vpop.f32.mrf.mxu0  ;;  %877 = vmatpush.msrb.mxu2 %v2480_v38  ;;  %v2510_v38 = vld [vmem:[%s3634_s22 + $0x1a0] sm:$0xff] }
  0xfb   :  { %v328_v27 = vadd.f32 %v2958_v35, %v327_v26  ;;  %v3145_v26 = vpop.f32.mrf.mxu3 }
  0xfd   :  { %v401_v29 = vmax.f32 %v328_v27, 0.0  ;;  %v2507_v27 = vld [vmem:[%s3634_s22 + $0x190] sm:$0xff] }
  0xff   :  { %2467 = vmatmul.msk.f32.vlgmr.msrb.gmra.mxu3 %vm431_vm2, %v401_v29  ;;  %v356_v29 = vadd.f32 %v2958_v35, %v3057_v33  ;;  %v2523_v33 = vld [vmem:[%s3634_s22 + $0x1e8] sm:$0xff] }
 0x100   :  { %903 = vmatpush.msrb.mxu3 %v2484_v40  ;;  %v2516_v40 = vld [vmem:[%s3634_s22 + $0x1c0] sm:$0xff] }
 0x102   :  { %v330_v31 = vpop.f32.mrf.mxu0  ;;  %904 = vmatpush.msrb.mxu3 %v2483_v46 }
 0x103   :  { %v331_v32 = vadd.f32 %v2958_v35, %v330_v31  ;;  %v414_v31 = vmax.f32 %v361_v25, 0.0 }
 0x105   :  { %v402_v36 = vmax.f32 %v331_v32, 0.0  ;;  %v412_v32 = vmax.f32 %v356_v29, 0.0 }
 0x107   :  { %2470 = vmatmul.msk.f32.vlgmr.msra.gmra.mxu1 %vm431_vm2, %v402_v36  ;;  %v2511_v36 = vld [vmem:[%s3634_s22 + $0x1a8] sm:$0xff] }
 0x108   :  { %930 = vmatpush.msra.mxu1 %v2487_v37  ;;  %v2517_v37 = vld [vmem:[%s3634_s22 + $0x1c8] sm:$0xff] }
 0x10a   :  { %v332_v42 = vpop.f32.mrf.mxu0  ;;  %931 = vmatpush.msra.mxu1 %v2486_v39  ;;  %v368_v39 = vadd.f32 %v2958_v35, %v367_v34 }
 0x10b   :  { %v333_v43 = vadd.f32 %v2958_v35, %v332_v42  ;;  %v358_v42 = vadd.f32 %v2958_v35, %v3076_v45  ;;  %v2532_v45 = vld [vmem:[%s3634_s22 + $0x218] sm:$0xff] }
 0x10c   :  { %v417_v46 = vmax.f32 %v368_v39, 0.0 }
 0x10d   :  { %v403_v44 = vmax.f32 %v333_v43, 0.0  ;;  %v363_v43 = vadd.f32 %v2958_v35, %v362_v1  ;;  %v2534_v1 = vld [vmem:[%s3634_s22 + $0x220] sm:$0xff] }
 0x10f   :  { %2473 = vmatmul.msk.f32.vlgmr.msra.gmra.mxu2 %vm431_vm2, %v403_v44  ;;  %v380_v44 = vpop.f32.mrf.mxu3 }
 0x110   :  { %957 = vmatpush.msra.mxu2 %v2490_v47  ;;  %v413_v47 = vmax.f32 %v358_v42, 0.0 }
 0x112   :  { %v335_v49 = vpop.f32.mrf.mxu0  ;;  %958 = vmatpush.msra.mxu2 %v2489_v48  ;;  %v415_v48 = vmax.f32 %v363_v43, 0.0 }
 0x113   :  { %v336_v51 = vadd.f32 %v2958_v35, %v335_v49  ;;  %v2520_v49 = vld [vmem:[%s3634_s22 + $0x1d8] sm:$0xff] }
 0x115   :  { %v404_v53 = vmax.f32 %v336_v51, 0.0  ;;  %v2526_v51 = vld [vmem:[%s3634_s22 + $0x1f8] sm:$0xff] }
 0x117   :  { %2476 = vmatmul.msk.f32.vlgmr.msra.gmra.mxu3 %vm431_vm2, %v404_v53  ;;  %v2519_v53 = vld [vmem:[%s3634_s22 + $0x1d0] sm:$0xff] }
 0x118   :  { %984 = vmatpush.msra.mxu3 %v2493_v54  ;;  %v2525_v54 = vld [vmem:[%s3634_s22 + $0x1f0] sm:$0xff] }
 0x11a   :  { %v337_v57 = vpop.f32.mrf.mxu0  ;;  %985 = vmatpush.msra.mxu3 %v2492_v56  ;;  %v371_v56 = vadd.f32 %v2958_v35, %v3088_v50  ;;  %v2535_v50 = vld [vmem:[%s3634_s22 + $0x228] sm:$0xff] }
 0x11b   :  { %v338_v58 = vadd.f32 %v2958_v35, %v337_v57  ;;  %v376_v57 = vadd.f32 %v2958_v35, %v3116_v8 }
 0x11c   :  { %v418_v61 = vmax.f32 %v371_v56, 0.0 }
 0x11d   :  { %v405_v60 = vmax.f32 %v338_v58, 0.0  ;;  %v416_v58 = vmax.f32 %v366_v52, 0.0  ;;  %v420_v63 = vmax.f32 %v376_v57, 0.0 }
 0x11f   :  { %2479 = vmatmul.msk.f32.vlgmr.msrb.gmra.mxu1 %vm431_vm2, %v405_v60  ;;  %v382_v60 = vpop.f32.mrf.mxu3 }
 0x120   :  { %1011 = vmatpush.msrb.mxu1 %v2496_v62  ;;  %v2529_v62 = vld [vmem:[%s3634_s22 + $0x208] sm:$0xff] }
 0x122   :  { %v340_v2 = vpop.f32.mrf.mxu0  ;;  %1012 = vmatpush.msrb.mxu1 %v2495_v0  ;;  %v2528_v0 = vld [vmem:[%s3634_s22 + $0x200] sm:$0xff] }
 0x123   :  { %v341_v4 = vadd.f32 %v2958_v35, %v340_v2  ;;  %v373_v2 = vadd.f32 %v2958_v35, %v3099_v59  ;;  %v2537_v59 = vld [vmem:[%s3634_s22 + $0x230] sm:$0xff] }
 0x125   :  { %v406_v5 = vmax.f32 %v341_v4, 0.0  ;;  %v383_v4 = vadd.f32 %v2958_v35, %v382_v60 }
 0x127   :  { %2482 = vmatmul.msk.f32.vlgmr.msrb.gmra.mxu2 %vm431_vm2, %v406_v5  ;;  %2488 = vmatmul.msk.f32.vlgmr.msra.gmra.mxu1 %vm431_vm2, %v408_v3  ;;  %v378_v3 = vadd.f32 %v2958_v35, %v3145_v26  ;;  %v419_v5 = vmax.f32 %v373_v2, 0.0  ;;  %v423_v8 = vmax.f32 %v383_v4, 0.0  ;;  %v385_v9 = vpop.f32.mrf.mxu3  ;;  %v1406_v2 = vld [vmem:[%s3608_s5 + $0x20] sm:$0xff] }
 0x128   :  { %1038 = vmatpush.msrb.mxu2 %v2499_v6  ;;  %1092 = vmatpush.msra.mxu1 %v2505_v7  ;;  %v2538_v7 = vld [vmem:[%s3634_s22 + $0x238] sm:$0xff] }
 0x129   :  { %v421_v6 = vmax.f32 %v378_v3, 0.0 }
 0x12a   :  { %v342_v14 = vpop.f32.mrf.mxu0  ;;  %1039 = vmatpush.msrb.mxu2 %v2498_v10  ;;  %1093 = vmatpush.msra.mxu1 %v2504_v11  ;;  %v386_v10 = vadd.f32 %v2958_v35, %v385_v9  ;;  %v381_v11 = vadd.f32 %v2958_v35, %v380_v44 }
 0x12b   :  { %v343_v15 = vadd.f32 %v2958_v35, %v342_v14 }
 0x12c   :  { %v424_v12 = vmax.f32 %v386_v10, 0.0  ;;  %v422_v13 = vmax.f32 %v381_v11, 0.0  ;;  %v1403_v10 = vld [vmem:[%s3608_s5 + $0x8] sm:$0xff] }
 0x12d   :  { %v407_v19 = vmax.f32 %v343_v15, 0.0 }
 0x12f   :  { %2485 = vmatmul.msk.f32.vlgmr.msrb.gmra.mxu3 %vm431_vm2, %v407_v19  ;;  %2491 = vmatmul.msk.f32.vlgmr.msra.gmra.mxu2 %vm431_vm2, %v409_v18  ;;  %v387_v14 = vpop.f32.mrf.mxu3 }
 0x130   :  { %2497 = vmatmul.msk.f32.vlgmr.msrb.gmra.mxu1 %vm431_vm2, %v411_v17  ;;  %1065 = vmatpush.msrb.mxu3 %v2502_v20  ;;  %v388_v15 = vadd.f32 %v2958_v35, %v387_v14  ;;  %v452_v17 = vpop.f32.mrf.mxu1  ;;  %v1443_v14 = vld [vmem:[%s3610_s7 + $0x20] sm:$0xff] }
 0x131   :  { %1119 = vmatpush.msra.mxu2 %v2508_v21  ;;  %1173 = vmatpush.msrb.mxu1 %v2514_v22 }
 0x132   :  { %1066 = vmatpush.msrb.mxu3 %v2501_v24  ;;  %v425_v16 = vmax.f32 %v388_v15, 0.0 }
 0x133   :  { %1120 = vmatpush.msra.mxu2 %v2507_v27  ;;  %1174 = vmatpush.msrb.mxu1 %v2513_v28 }
 0x134   :  { %v501_v23 = vpop.f32.mrf.mxu0 }
 0x137   :  { %2494 = vmatmul.msk.f32.vlgmr.msra.gmra.mxu3 %vm431_vm2, %v410_v30  ;;  %2500 = vmatmul.msk.f32.vlgmr.msrb.gmra.mxu2 %vm431_vm2, %v412_v32 }
 0x138   :  { %2506 = vmatmul.msk.f32.vlgmr.msra.gmra.mxu1 %vm431_vm2, %v414_v31  ;;  %1146 = vmatpush.msra.mxu3 %v2511_v36  ;;  %v475_v18 = vpop.f32.mrf.mxu1 }
 0x139   :  { %1200 = vmatpush.msrb.mxu2 %v2517_v37  ;;  %1254 = vmatpush.msra.mxu1 %v2523_v33  ;;  %v476_v21 = vadd.f32 %v475_v18, %v452_v17  ;;  %v1442_v17 = vld [vmem:[%s3610_s7 + $0x18] sm:$0xff] }
 0x13a   :  { %1147 = vmatpush.msra.mxu3 %v2510_v38 }
 0x13b   :  { %1201 = vmatpush.msrb.mxu2 %v2516_v40  ;;  %1255 = vmatpush.msra.mxu1 %v2522_v41  ;;  %v504_v24 = vadd.f32 %v501_v23, %v476_v21 }
 0x13f   :  { %2503 = vmatmul.msk.f32.vlgmr.msrb.gmra.mxu3 %vm431_vm2, %v413_v47  ;;  %2509 = vmatmul.msk.f32.vlgmr.msra.gmra.mxu2 %vm431_vm2, %v415_v48 }
 0x140   :  { %2515 = vmatmul.msk.f32.vlgmr.msrb.gmra.mxu1 %vm431_vm2, %v417_v46  ;;  %1227 = vmatpush.msrb.mxu3 %v2520_v49  ;;  %v528_v19 = vpop.f32.mrf.mxu1 }
 0x141   :  { %1281 = vmatpush.msra.mxu2 %v2526_v51  ;;  %1335 = vmatpush.msrb.mxu1 %v2532_v45  ;;  %v531_v25 = vadd.f32 %v528_v19, %v504_v24 }
 0x142   :  { %1228 = vmatpush.msrb.mxu3 %v2519_v53 }
 0x143   :  { %1282 = vmatpush.msra.mxu2 %v2525_v54  ;;  %1336 = vmatpush.msrb.mxu1 %v2531_v55 }
 0x147   :  { %2512 = vmatmul.msk.f32.vlgmr.msra.gmra.mxu3 %vm431_vm2, %v416_v58  ;;  %2518 = vmatmul.msk.f32.vlgmr.msrb.gmra.mxu2 %vm431_vm2, %v418_v61  ;;  %v1409_v61 = vld [vmem:[%s3608_s5 + $0x38] sm:$0xff] }
 0x148   :  { %2524 = vmatmul.msk.f32.vlgmr.msra.gmra.mxu1 %vm431_vm2, %v420_v63  ;;  %1308 = vmatpush.msra.mxu3 %v2529_v62  ;;  %v1408_v63 = vld [vmem:[%s3608_s5 + $0x30] sm:$0xff] }
 0x149   :  { %1362 = vmatpush.msrb.mxu2 %v2535_v50  ;;  %1426 = vmatpush.msra.mxu1 %v1409_v61 }
 0x14a   :  { %1309 = vmatpush.msra.mxu3 %v2528_v0  ;;  %v555_v22 = vpop.f32.mrf.mxu2 }
 0x14b   :  { %1363 = vmatpush.msrb.mxu2 %v2534_v1  ;;  %v558_v28 = vadd.f32 %v555_v22, %v531_v25  ;;  %1427 = vmatpush.msra.mxu1 %v1408_v63  ;;  %v1407_v1 = vld [vmem:[%s3608_s5 + $0x28] sm:$0xff] }
 0x14d   :  { %1428 = vmatpush.msra.mxu1 %v1407_v1 }
 0x14f   :  { %2521 = vmatmul.msk.f32.vlgmr.msrb.gmra.mxu3 %vm431_vm2, %v419_v5  ;;  %2527 = vmatmul.msk.f32.vlgmr.msra.gmra.mxu2 %vm431_vm2, %v421_v6  ;;  %v1405_v6 = vld [vmem:[%s3608_s5 + $0x18] sm:$0xff] }
 0x150   :  { %2533 = vmatmul.msk.f32.vlgmr.msrb.gmra.mxu1 %vm431_vm2, %v423_v8  ;;  %1389 = vmatpush.msrb.mxu3 %v2538_v7  ;;  %v1404_v8 = vld [vmem:[%s3608_s5 + $0x10] sm:$0xff] }
 0x151   :  { %1429 = vmatpush.msra.mxu1 %v1406_v2 }
 0x152   :  { %1390 = vmatpush.msrb.mxu3 %v2537_v59  ;;  %v582_v26 = vpop.f32.mrf.mxu3  ;;  %v1402_v59 = vld [vmem:[%s3608_s5] sm:$0xff] }
 0x153   :  { %v585_v30 = vadd.f32 %v582_v26, %v558_v28  ;;  %1430 = vmatpush.msra.mxu1 %v1405_v6 }
 0x154   :  { %v609_v20 = vpop.f32.mrf.mxu1 }
 0x155   :  { %v612_v31 = vadd.f32 %v609_v20, %v585_v30  ;;  %1431 = vmatpush.msra.mxu1 %v1404_v8 }
 0x157   :  { %2530 = vmatmul.msk.f32.vlgmr.msra.gmra.mxu3 %vm431_vm2, %v422_v13  ;;  %2536 = vmatmul.msk.f32.vlgmr.msrb.gmra.mxu2 %vm431_vm2, %v424_v12  ;;  %v1444_v13 = vld [vmem:[%s3610_s7 + $0x28] sm:$0xff] }
 0x158   :  { %1432 = vmatpush.msra.mxu1 %v1403_v10  ;;  %1463 = vmatpush.msra.mxu2 %v1444_v13 }
 0x15a   :  { %1433 = vmatpush.msra.mxu1 %v1402_v59  ;;  %1464 = vmatpush.msra.mxu2 %v1443_v14 }
 0x15c   :  { %1465 = vmatpush.msra.mxu2 %v1442_v17 }
 0x15f   :  { %2539 = vmatmul.msk.f32.vlgmr.msrb.gmra.mxu3 %vm431_vm2, %v425_v16 }
 0x162   :  { %v636_v29 = vpop.f32.mrf.mxu2 }
 0x163   :  { %v639_v34 = vadd.f32 %v636_v29, %v612_v31 }
 0x16a   :  { %v663_v32 = vpop.f32.mrf.mxu3 }
 0x16b   :  { %v666_v37 = vadd.f32 %v663_v32, %v639_v34 }
 0x16c   :  { %v690_v27 = vpop.f32.mrf.mxu1 }
 0x16d   :  { %v693_v33 = vadd.f32 %v690_v27, %v666_v37 }
 0x17a   :  { %v717_v36 = vpop.f32.mrf.mxu2 }
 0x17b   :  { %v720_v40 = vadd.f32 %v717_v36, %v693_v33 }
 0x182   :  { %v744_v38 = vpop.f32.mrf.mxu3 }
 0x183   :  { %v747_v42 = vadd.f32 %v744_v38, %v720_v40  ;;  %v1441_v38 = vld [vmem:[%s3610_s7 + $0x10] sm:$0xff]  ;;  %v1439_v40 = vld [vmem:[%s3610_s7] sm:$0xff] }
 0x184   :  { %v771_v35 = vpop.f32.mrf.mxu1  ;;  %1466 = vmatpush.msra.mxu2 %v1441_v38 }
 0x185   :  { %v774_v43 = vadd.f32 %v771_v35, %v747_v42  ;;  %v2599_v35 = vld [vmem:[%s3636_s27] ss:$0 sm:$0xff] }
 0x192   :  { %v798_v41 = vpop.f32.mrf.mxu2 }
 0x193   :  { %v801_v46 = vadd.f32 %v798_v41, %v774_v43  ;;  %v2600_v41 = vld [vmem:[%s3609_s6] ss:$0 sm:$0xff] }
 0x19a   :  { %v825_v44 = vpop.f32.mrf.mxu3 }
 0x19b   :  { %v828_v49 = vadd.f32 %v825_v44, %v801_v46  ;;  %v3293_v46 = vld [vmem:[%s3619_s16] sm:$0x7] }
 0x19c   :  { %v852_v39 = vpop.f32.mrf.mxu1 }
 0x19d   :  { %v855_v51 = vadd.f32 %v852_v39, %v828_v49  ;;  %v1440_v39 = vld [vmem:[%s3610_s7 + $0x8] sm:$0xff] }
 0x19e   :  { %1467 = vmatpush.msra.mxu2 %v1440_v39  ;;  %v3304_v49 = vld [vmem:[%s3616_s13 + $0x8] sm:$0xff] }
 0x1a0   :  { %1468 = vmatpush.msra.mxu2 %v1439_v40 }
 0x1a4   :  { %v933_v47 = vpop.f32.mrf.mxu1 }
 0x1aa   :  { %v879_v48 = vpop.f32.mrf.mxu2 }
 0x1ab   :  { %v882_v45 = vadd.f32 %v879_v48, %v855_v51  ;;  %v3299_v48 = vld [vmem:[%s3616_s13] sm:$0xff] }
 0x1ac   :  { %v3309_v51 = vld [vmem:[%s3617_s14] sm:$0xff] }
 0x1ad   :  { %v1014_v55 = vpop.f32.mrf.mxu1 }
 0x1b2   :  { %v906_v52 = vpop.f32.mrf.mxu3  ;;  %v960_v53 = vpop.f32.mrf.mxu2 }
 0x1b3   :  { %v909_v54 = vadd.f32 %v906_v52, %v882_v45  ;;  %v3312_v45 = vmul.f32 6.0, %v3293_v46 }
 0x1b5   :  { %v936_v56 = vadd.f32 %v933_v47, %v909_v54  ;;  %v1095_v0 = vpop.f32.mrf.mxu1  ;;  %v1495_v47 = vrot.slane %v3293_v46, 1  ;;  %v3325_v54 = vld [vmem:[%s3618_s15] sm:$0xff] }
 0x1b7   :  { %v963_v57 = vadd.f32 %v960_v53, %v936_v56  ;;  %v3315_v52 = vmul.f32 %v1495_v47, %v3293_v46  ;;  %v3320_v53 = vld [vmem:[%s3617_s14 + $0x8] sm:$0xff]  ;;  %v3335_v56 = vld [vmem:[%s3620_s17] sm:$0x3] }
 0x1ba   :  { %v987_v58 = vpop.f32.mrf.mxu3  ;;  %v1041_v60 = vpop.f32.mrf.mxu2 }
 0x1bb   :  { %v990_v62 = vadd.f32 %v987_v58, %v963_v57  ;;  %v1498_v57 = vld [vmem:[%s3612_s9] sm:$0x3]  }
 0x1bc   :  { %v2601_v58 = vld [vmem:[%s3611_s8] ss:$0 sm:$0xff] }
 0x1bd   :  { %v1017_v50 = vadd.f32 %v1014_v55, %v990_v62  ;;  %v1176_v11 = vpop.f32.mrf.mxu1  ;;  %v3330_v55 = vld [vmem:[%s3618_s15 + $0x8] sm:$0xff]  ;;  %s3345_s15 = smov 0  }
 0x1bf   :  { %v1044_v3 = vadd.f32 %v1041_v60, %v1017_v50 }
 0x1c2   :  { %v1068_v4 = vpop.f32.mrf.mxu3  ;;  %v1122_v5 = vpop.f32.mrf.mxu2 }
 0x1c3   :  { %v1071_v7 = vadd.f32 %v1068_v4, %v1044_v3 }
 0x1c5   :  { %v1098_v9 = vadd.f32 %v1095_v0, %v1071_v7  ;;  %v1257_v21 = vpop.f32.mrf.mxu1 }
 0x1c7   :  { %v1125_v12 = vadd.f32 %v1122_v5, %v1098_v9 }
 0x1ca   :  { %v1149_v15 = vpop.f32.mrf.mxu3  ;;  %v1203_v18 = vpop.f32.mrf.mxu2 }
 0x1cb   :  { %v1152_v16 = vadd.f32 %v1149_v15, %v1125_v12 }
 0x1cd   :  { %v1179_v19 = vadd.f32 %v1176_v11, %v1152_v16  ;;  %v1338_v29 = vpop.f32.mrf.mxu1 }
 0x1cf   :  { %v1206_v20 = vadd.f32 %v1203_v18, %v1179_v19 }
 0x1d2   :  { %v1230_v22 = vpop.f32.mrf.mxu3  ;;  %v1284_v25 = vpop.f32.mrf.mxu2 }
 0x1d3   :  { %v1233_v23 = vadd.f32 %v1230_v22, %v1206_v20 }
 0x1d5   :  { %v1260_v24 = vadd.f32 %v1257_v21, %v1233_v23 }
 0x1d7   :  { %v1287_v26 = vadd.f32 %v1284_v25, %v1260_v24 }
 0x1da   :  { %v1311_v27 = vpop.f32.mrf.mxu3  ;;  %v1365_v31 = vpop.f32.mrf.mxu2 }
 0x1db   :  { %v1314_v28 = vadd.f32 %v1311_v27, %v1287_v26 }
 0x1dd   :  { %v1341_v30 = vadd.f32 %v1338_v29, %v1314_v28 }
 0x1df   :  { %v1368_v32 = vadd.f32 %v1365_v31, %v1341_v30 }
 0x1e2   :  { %v1392_v34 = vpop.f32.mrf.mxu3 }
 0x1e3   :  { %v1395_v36 = vadd.f32 %v1392_v34, %v1368_v32 }
 0x1e5   :  { %v1400_v37 = vadd.f32 %v2599_v35, %v1395_v36 }
 0x1e7   :  { %v1401_v33 = vmax.f32 %v1400_v37, 0.0 }
 0x1e9   :  { %2540 = vmatmul.msk.f32.vlgmr.msra.gmra.mxu1 %vm1414_vm3, %v1401_v33 }
 0x266   :  { %v1435_v42 = vpop.f32.mrf.mxu1 }
 0x267   :  { %v1436_v43 = vadd.f32 %v2600_v41, %v1435_v42 }
 0x269   :  { %v1438_v44 = vmax.f32 %v1436_v43, 0.0 }
 0x26b   :  { %2541 = vmatmul.msk.f32.vlgmr.msra.gmra.mxu2 %vm1449_vm4, %v1438_v44 }
 0x2ee   :  { %v1470_v60 = vpop.f32.mrf.mxu2 }
 0x2ef   :  { %v1471_v61 = vadd.f32 %v2601_v58, %v1470_v60 }
 0x2f1   :  { %v1474_v62 = vrot.slane %v1471_v61, 2  ;;  %v1475_v63 = vrot.slane %v1471_v61, 4  ;;  %v1476_v50 = vrot.slane %v1471_v61, 6  ;;  %1481 = vst.msk [vmem:[#allocation2] sm:$0x3] %vm1480_vm5, %v1471_v61 }
 0x2f3   :  { %1482 = vst.msk [vmem:[#allocation2 + $0x2] sm:$0x3] %vm1480_vm5, %v1474_v62 }
 0x2f4   :  { %1483 = vst.msk [vmem:[#allocation2 + $0x4] sm:$0x3] %vm1480_vm5, %v1475_v63 }
 0x2f5   :  { %1484 = vst.msk [vmem:[#allocation2 + $0x6] sm:$0x3] %vm1480_vm5, %v1476_v50 }
 0x2f6 LB: > { %v1518_v0 = vlaneseq  ;;  %v1509_v1 = vperm.slane %v3335_v56, 0  ;;  %s2542_s8 = sshll.u32 %s2735_s15, 1  ;;  %v1511_v3 = vperm.slane %v3335_v56, 1  ;;  %v1658_v11 = vperm.slane %v2731_v57, 0  ;;  %v1567_v17 = vld [vmem:[%s3614_s11] sm:$0xff]  ;;  %v1568_v18 = vld [vmem:[%s3614_s11 + $0x8] sm:$0xff]  ;;  %s2735_s15 = sphi %s3345_s15, %s1504_s15   ;;  %v2731_v57 = vphi %v1498_v57, %v3637_v57  }
 0x2f7   : > { %s1507_s9 = scalar_lea.vmem [#allocation2], %s2542_s8  ;;  %v1671_v12 = vperm.slane %v2731_v57, 1  ;;  %v1579_v22 = vld [vmem:[%s3615_s12] sm:$0xff]  ;;  %v1580_v24 = vld [vmem:[%s3615_s12 + $0x8] sm:$0xff]  ;;  %v1569_v26 = vld [vmem:[%s3614_s11 + $0x10] sm:$0xff]  ;;  %vm1631_vm6 = vcmask 261120  }
 0x2f8   : > { %v3354_v2 = vshrl.u32 %v1518_v0, 7  ;;  %v1570_v30 = vld [vmem:[%s3614_s11 + $0x18] sm:$0xff]  ;;  %v1581_v34 = vld [vmem:[%s3615_s12 + $0x10] sm:$0xff]  ;;  %vm1738_vm7 = vcmask 1041409   ;;  %s2737_s1 = smov 112   ;;  %s2271_s23 = scalar_lea.vmem [#allocation3], %s2542_s8 }
 0x2f9   : > { %v1582_v40 = vld [vmem:[%s3615_s12 + $0x18] sm:$0xff]  ;;  %s1504_s15 = sadd.s32 1, %s2735_s15  }
 0x2fa   : > { %2604 = vset.pattern.permute.xlu1 %v3354_v2  ;;  %v3360_v4 = vadd.s32 8, %v3354_v2  ;;  %v1532_v6 = vadd.s32 16, %v3354_v2  ;;  %v1538_v59 = vadd.s32 24, %v3354_v2  ;;  %p1501_p0 = scmp.ge.s32.totalorder %s1504_s15, 4  }
 0x2fb   :  { %s2738_s8 = smov (%p1501_p0), [#allocation4]   ;;  %s2305_s6 = sshll.u32 (%p1501_p0), %s3623_s20, 4  ;;  %s2306_s6 = int_to_ptr.hbm [resolvable:$true] %s2305_s6 }
 0x2fc   : > { %v1508_v5 = vld [vmem:[%s1507_s9] sm:$0x3]  ;;  %2602 = vset.pattern.permute.xlu0 %v3360_v4  ;;  %2606 = vset.pattern.permute.xlu2 %v1532_v6  ;;  %s2303_s25 = sshll.u32 (%p1501_p0), %s2738_s8, 4  ;;  %s2304_s25 = int_to_ptr.vmem [resolvable:$true] %s2303_s25 }
 0x2fd   : > { %v1510_v7 = vmul.f32 %v1509_v1, %v1508_v5 }
 0x2ff   : > { %v1512_v8 = vadd.f32 %v1511_v3, %v1510_v7 }
 0x301   : > { %v1542_v9 = vperm.slane %v1512_v8, 1  ;;  %v1517_v10 = vperm.slane %v1512_v8, 0 }
 0x303   : > { %1547 = vperm.xlu1 %2604, %v1542_v9  }
 0x304   : > { %1528 = vperm.xlu0 %2602, %v1517_v10   ;;  %1534 = vperm.xlu2 %2606, %v1517_v10  }
 0x30b   : > { %2605 = vset.pattern.permute.xlu1 %v3360_v4 }
 0x30c   : > { %2603 = vset.pattern.permute.xlu0 %v3354_v2  ;;  %1559 = vperm.xlu2 %2606, %v1542_v9  }
 0x313   : > { %1553 = vperm.xlu1 %2605, %v1542_v9  }
 0x314   : > { %1522 = vperm.xlu0 %2603, %v1517_v10   ;;  %2608 = vset.pattern.permute.xlu2 %v1538_v59 }
 0x31b   : > { %2607 = vset.pattern.permute.xlu1 %v1538_v59 }
 0x31c   : > { %1565 = vperm.xlu2 %2608, %v1542_v9   ;;  %1663 = vperm.xlu0 %2603, %v1658_v11  }
 0x323   : > { %1540 = vperm.xlu1 %2607, %v1517_v10  }
 0x324   : > { %2610 = vset.pattern.permute.xlu2 %v3354_v2 }
 0x32b   : > { %2609 = vset.pattern.permute.xlu1 %v3360_v4 }
 0x32c   : > { %1676 = vperm.xlu2 %2610, %v1671_v12  }
 0x333   : > { %1669 = vperm.xlu1 %2609, %v1658_v11  }
 0x33b   : > { %1682 = vperm.xlu1 %2609, %v1671_v12  }
 0x35e   : > { %v1535_v13 = vpop.permute.xlu2 %1534 }
 0x35f   : > { %v1573_v32 = vsub.f32 %v1535_v13, %v1569_v26 }
 0x361   : > { %v1585_v41 = vmul.f32 %v1581_v34, %v1573_v32 }
 0x363   : > { %v1593_v63 = vmul.f32 0.5, %v1585_v41  ;;  %v1515_v41 = vld [vmem:[%s3613_s10 + $0x10] sm:$0xff] }
 0x366   : > { %v1560_v16 = vpop.permute.xlu2 %1559 }
 0x367   : > { %v1577_v36 = vsub.f32 %v1560_v16, %v1569_v26 }
 0x369   : > { %v1589_v44 = vmul.f32 %v1581_v34, %v1577_v36 }
 0x36b   : > { %v1597_v50 = vmul.f32 0.5, %v1589_v44 }
 0x375   : > { %v1548_v14 = vpop.permute.xlu1 %1547 }
 0x376   : > { %v1529_v15 = vpop.permute.xlu0 %1528  ;;  %v1575_v20 = vsub.f32 %v1548_v14, %v1567_v17  ;;  %v1566_v31 = vpop.permute.xlu2 %1565 }
 0x377   : > { %v1572_v25 = vsub.f32 %v1529_v15, %v1568_v18  ;;  %v1578_v38 = vsub.f32 %v1566_v31, %v1570_v30 }
 0x378   : > { %v1587_v28 = vmul.f32 %v1579_v22, %v1575_v20 }
 0x379   : > { %v1584_v35 = vmul.f32 %v1580_v24, %v1572_v25  ;;  %v1590_v58 = vmul.f32 %v1582_v40, %v1578_v38 }
 0x37a   : > { %v1595_v33 = vmul.f32 0.5, %v1587_v28  ;;  %v1513_v28 = vld [vmem:[%s3613_s10] sm:$0xff] }
 0x37b   : > { %v1592_v42 = vmul.f32 0.5, %v1584_v35  ;;  %v1598_v1 = vmul.f32 0.5, %v1590_v58  ;;  %v1516_v58 = vld [vmem:[%s3613_s10 + $0x18] sm:$0xff] }
 0x37c   : > { %2619 = vtanh.f32 %v1595_v33 }
 0x382   : > { %v2620_v6 = vpop.eup %2619 }
 0x383   : > { %v1611_v14 = vmul.f32 0.5, %v2620_v6 }
 0x385   : > { %v1554_v19 = vpop.permute.xlu1 %1553 }
 0x386   : > { %v1523_v21 = vpop.permute.xlu0 %1522  ;;  %v1576_v23 = vsub.f32 %v1554_v19, %v1568_v18  ;;  %v1677_v7 = vpop.permute.xlu2 %1676 }
 0x387   : > { %v1571_v27 = vsub.f32 %v1523_v21, %v1567_v17  ;;  %v1686_v11 = vsub.f32 %v1677_v7, %v3309_v51 }
 0x388   : > { %v1588_v29 = vmul.f32 %v1580_v24, %v1576_v23  ;;  %v1619_v23 = vadd.f32 0.5, %v1611_v14 }
 0x389   : > { %v1583_v37 = vmul.f32 %v1579_v22, %v1571_v27  ;;  %v1690_v18 = vmul.f32 %v1686_v11, %v3325_v54  ;;  %v1514_v22 = vld [vmem:[%s3613_s10 + $0x8] sm:$0xff] }
 0x38a   : > { %v1596_v39 = vmul.f32 0.5, %v1588_v29  ;;  %v1627_v33 = vmul.f32 %v1619_v23, %v1513_v28 }
 0x38b   : > { %v1591_v47 = vmul.f32 0.5, %v1583_v37  ;;  %v1694_v32 = vmul.f32 0.5, %v1690_v18 }
 0x38c   : > { %2621 = vtanh.f32 %v1596_v39 }
 0x38d   : > { %2623 = vtanh.f32 %v1592_v42 }
 0x38e   : > { %v1664_v43 = vpop.permute.xlu0 %1663  ;;  %2625 = vtanh.f32 %v1591_v47 }
 0x38f   : > { %v1684_v62 = vsub.f32 %v1664_v43, %v3309_v51  ;;  %2627 = vtanh.f32 %v1593_v63 }
 0x390   : > { %2629 = vtanh.f32 %v1597_v50 }
 0x391   : > { %v1688_v5 = vmul.f32 %v1684_v62, %v3325_v54  ;;  %2631 = vtanh.f32 %v1598_v1  ;;  %v1645_v62 = vsel %vm1631_vm6, %v1627_v33, 0.0 }
 0x392   : > { %v2622_v8 = vpop.eup %2621 }
 0x393   : > { %v2624_v9 = vpop.eup %2623  ;;  %v1692_v59 = vmul.f32 0.5, %v1688_v5  ;;  %v1612_v12 = vmul.f32 0.5, %v2622_v8 }
 0x394   : > { %v2626_v10 = vpop.eup %2625  ;;  %v1608_v15 = vmul.f32 0.5, %v2624_v9 }
 0x395   : > { %v1541_v60 = vpop.permute.xlu1 %1540  ;;  %v2628_v13 = vpop.eup %2627  ;;  %v1607_v16 = vmul.f32 0.5, %v2626_v10  ;;  %v1620_v20 = vadd.f32 0.5, %v1612_v12 }
 0x396   : > { %v1574_v61 = vsub.f32 %v1541_v60, %v1570_v30  ;;  %v2630_v17 = vpop.eup %2629  ;;  %v1616_v24 = vadd.f32 0.5, %v1608_v15  ;;  %v1609_v29 = vmul.f32 0.5, %v2628_v13 }
 0x397   : > { %v2632_v19 = vpop.eup %2631  ;;  %v1613_v25 = vmul.f32 0.5, %v2630_v17  ;;  %v1615_v26 = vadd.f32 0.5, %v1607_v16  ;;  %v1628_v35 = vmul.f32 %v1620_v20, %v1514_v22 }
 0x398   : > { %v1586_v0 = vmul.f32 %v1582_v40, %v1574_v61  ;;  %v1614_v30 = vmul.f32 0.5, %v2632_v19  ;;  %v1624_v38 = vmul.f32 %v1616_v24, %v1514_v22  ;;  %v1617_v42 = vadd.f32 0.5, %v1609_v29 }
 0x399   : > { %v1621_v39 = vadd.f32 0.5, %v1613_v25  ;;  %v1623_v40 = vmul.f32 %v1615_v26, %v1513_v28  ;;  %v1646_v47 = vsel %vm1631_vm6, %v1628_v35, 0.0 }
 0x39a   : > { %v1594_v3 = vmul.f32 0.5, %v1586_v0  ;;  %v1622_v43 = vadd.f32 0.5, %v1614_v30  ;;  %v1633_v63 = vsel %vm1631_vm6, %v1624_v38, 0.0  ;;  %v1647_v5 = vadd.f32 %v1646_v47, %v1645_v62 }
 0x39b   : > { %v1629_v50 = vmul.f32 %v1621_v39, %v1515_v41  ;;  %v1632_v0 = vsel %vm1631_vm6, %v1623_v40, 0.0 }
 0x39c   : > { %2633 = vtanh.f32 %v1594_v3  ;;  %v1625_v3 = vmul.f32 %v1617_v42, %v1515_v41  ;;  %v1630_v6 = vmul.f32 %v1622_v43, %v1516_v58 }
 0x39d   : > { %2635 = vtanh.f32 %v1692_v59  ;;  %v1634_v59 = vadd.f32 %v1633_v63, %v1632_v0  ;;  %v1648_v12 = vsel %vm1631_vm6, %v1629_v50, 0.0 }
 0x39e   : > { %2637 = vtanh.f32 %v1694_v32  ;;  %v1635_v14 = vsel %vm1631_vm6, %v1625_v3, 0.0  ;;  %v1649_v15 = vadd.f32 %v1648_v12, %v1647_v5  ;;  %v1650_v16 = vsel %vm1631_vm6, %v1630_v6, 0.0 }
 0x39f   : > { %v1636_v22 = vadd.f32 %v1635_v14, %v1634_v59 }
 0x3a0   : > { %v1651_v24 = vadd.f32 %v1650_v16, %v1649_v15  ;;  %v1742_v15 = vrot.slane %v3293_v46, 6 }
 0x3a2   : > { %v2634_v21 = vpop.eup %2633  ;;  %v1744_v16 = vadd.f32 %v1742_v15, %v3312_v45 }
 0x3a3   : > { %v1610_v34 = vmul.f32 0.5, %v2634_v21  ;;  %v2636_v36 = vpop.eup %2635 }
 0x3a4   : > { %v1700_v61 = vmul.f32 0.5, %v2636_v36  ;;  %v2638_v10 = vpop.eup %2637 }
 0x3a5   : > { %v1670_v27 = vpop.permute.xlu1 %1669  ;;  %v1618_v60 = vadd.f32 0.5, %v1610_v34  ;;  %v1702_v21 = vmul.f32 0.5, %v2638_v10 }
 0x3a6   : > { %v1685_v31 = vsub.f32 %v1670_v27, %v3320_v53  ;;  %v1704_v9 = vadd.f32 0.5, %v1700_v61 }
 0x3a7   : > { %v1626_v8 = vmul.f32 %v1618_v60, %v1516_v58  ;;  %v1706_v28 = vadd.f32 0.5, %v1702_v21  ;;  %v3447_v21 = vperm.slane %v3312_v45, 2 }
 0x3a8   : > { %v1689_v37 = vmul.f32 %v1685_v31, %v3330_v55  ;;  %v1708_v20 = vmul.f32 %v1704_v9, %v3299_v48  ;;  %v1652_v31 = vrot.slane %v1651_v24, 4 }
 0x3a9   : > { %v1637_v18 = vsel %vm1631_vm6, %v1626_v8, 0.0  ;;  %v1710_v34 = vmul.f32 %v1706_v28, %v3299_v48 }
 0x3aa   : > { %v1693_v44 = vmul.f32 0.5, %v1689_v37  ;;  %v1638_v25 = vadd.f32 %v1637_v18, %v1636_v22  ;;  %v1712_v27 = vsel %vm1631_vm6, %v1708_v20, 0.0  ;;  %v1653_v38 = vadd.f32 %v1652_v31, %v1651_v24 }
 0x3ab   : > { %v1721_v41 = vsel %vm1631_vm6, %v1710_v34, 0.0  ;;  %v3452_v24 = vperm.slane %v3315_v52, 0 }
 0x3ac   : > { %2639 = vtanh.f32 %v1693_v44  ;;  %v1639_v32 = vrot.slane %v1638_v25, 4  ;;  %v1654_v47 = vrot.slane %v1653_v38, 2 }
 0x3ad   : > { %v1683_v1 = vpop.permute.xlu1 %1682 }
 0x3ae   : > { %v1687_v7 = vsub.f32 %v1683_v1, %v3320_v53  ;;  %v1640_v39 = vadd.f32 %v1639_v32, %v1638_v25  ;;  %v1655_v63 = vadd.f32 %v1654_v47, %v1653_v38 }
 0x3b0   : > { %v1691_v11 = vmul.f32 %v1687_v7, %v3330_v55  ;;  %v1641_v58 = vrot.slane %v1640_v39, 2  ;;  %v1656_v5 = vrot.slane %v1655_v63, 1 }
 0x3b2   : > { %v2640_v13 = vpop.eup %2639  ;;  %v1695_v17 = vmul.f32 0.5, %v1691_v11  ;;  %v1642_v50 = vadd.f32 %v1641_v58, %v1640_v39  ;;  %v3433_v10 = vadd.f32 %v1656_v5, %v1655_v63 }
 0x3b3   : > { %v1701_v19 = vmul.f32 0.5, %v2640_v13 }
 0x3b4   : > { %2641 = vtanh.f32 %v1695_v17  ;;  %v1643_v6 = vrot.slane %v1642_v50, 1  ;;  %v3443_v17 = vperm.slane %v1744_v16, 2 }
 0x3b5   : > { %v1705_v23 = vadd.f32 0.5, %v1701_v19 }
 0x3b6   : > { %v3435_v59 = vadd.f32 %v1643_v6, %v1642_v50 }
 0x3b7   : > { %v1709_v26 = vmul.f32 %v1705_v23, %v3304_v49  ;;  %v1731_v23 = vmul.f32 %v2731_v57, %v3447_v21 }
 0x3b9   : > { %v1713_v29 = vsel %vm1631_vm6, %v1709_v26, 0.0  ;;  %v1733_v28 = vadd.f32 %v3452_v24, %v1731_v23 }
 0x3ba   : > { %v2642_v30 = vpop.eup %2641  ;;  %v1714_v35 = vadd.f32 %v1713_v29, %v1712_v27 }
 0x3bb   : > { %v1703_v36 = vmul.f32 0.5, %v2642_v30 }
 0x3bc   : > { %v1715_v37 = vrot.slane %v1714_v35, 4 }
 0x3bd   : > { %v1707_v33 = vadd.f32 0.5, %v1703_v36 }
 0x3be   : > { %v1716_v40 = vadd.f32 %v1715_v37, %v1714_v35 }
 0x3bf   : > { %v1711_v42 = vmul.f32 %v1707_v33, %v3304_v49 }
 0x3c0   : > { %v1717_v43 = vrot.slane %v1716_v40, 2 }
 0x3c1   : > { %v1722_v44 = vsel %vm1631_vm6, %v1711_v42, 0.0 }
 0x3c2   : > { %v1723_v60 = vadd.f32 %v1722_v44, %v1721_v41  ;;  %v1718_v62 = vadd.f32 %v1717_v43, %v1716_v40 }
 0x3c4   : > { %v1724_v61 = vrot.slane %v1723_v60, 4  ;;  %v1719_v3 = vrot.slane %v1718_v62, 1 }
 0x3c6   : > { %v1725_v0 = vadd.f32 %v1724_v61, %v1723_v60  ;;  %v1720_v8 = vadd.f32 %v1719_v3, %v1718_v62 }
 0x3c8   : > { %v1726_v1 = vrot.slane %v1725_v0, 2  ;;  %v1734_v12 = vadd.f32 %v1720_v8, %v3435_v59 }
 0x3ca   : > { %v1727_v7 = vadd.f32 %v1726_v1, %v1725_v0 }
 0x3cc   : > { %v1728_v9 = vrot.slane %v1727_v7, 1 }
 0x3ce   : > { %v1729_v11 = vadd.f32 %v1728_v9, %v1727_v7 }
 0x3d0   : > { %v1735_v13 = vadd.f32 %v1729_v11, %v3433_v10 }
 0x3d2   : > { %v1739_v14 = vsel %vm1738_vm7, %v1735_v13, %v1734_v12 }
 0x3d3   : > { %1746 = vrot.lane.b32.xlu2 %v1739_v14, %s2737_s1  ;;  %v1741_v35 = vadd.f32 %v1739_v14, %v1733_v28 }
 0x42d   : > { %v1747_v18 = vpop.permute.xlu2 %1746 }
 0x42e   : > { %v1749_v19 = vadd.f32 %v1747_v18, %v3443_v17 }
 0x430   : > { %v1750_v20 = vadd.f32 1e-08, %v1749_v19 }
 0x432   : > { %2643 = vrcp.f32 %v1750_v20  ;;  %v1762_v27 = vand.u32 2147483648, %v1750_v20  ;;  %v1760_v30 = vand.u32 2147483647, %v1750_v20  ;;  %vm1756_vm9 = vweird.f32 %v1750_v20 }
 0x434   : > { %v1763_v32 = vor.u32 1.1754944e-38, %v1762_v27  ;;  %vm1761_vm11 = vcmp.eq.f32.partialorder %v1760_v30, 8.507059e+37 }
 0x438   : > { %v2644_v22 = vpop.eup %2643 }
 0x439   : > { %v1752_v25 = vmul.f32 %v2644_v22, %v1750_v20  ;;  %vm1757_vm8 = vweird.f32 %v2644_v22 }
 0x43a   : > { %vm1758_vm10 = vmor %vm1756_vm9, %vm1757_vm8 }
 0x43b   : > { %v1753_v26 = vsub.f32 1.0, %v1752_v25 }
 0x43d   : > { %v1754_v29 = vmul.f32 %v2644_v22, %v1753_v26 }
 0x43f   : > { %v1755_v31 = vadd.f32 %v2644_v22, %v1754_v29 }
 0x441   : > { %v1759_v34 = vsel %vm1758_vm10, %v2644_v22, %v1755_v31 }
 0x442   : > { %v1764_v36 = vsel %vm1761_vm11, %v1763_v32, %v1759_v34 }
 0x443   : > { %v1765_v57 = vmul.f32 %v1764_v36, %v1741_v35 }
 0x445   : > { %v1779_v37 = vperm.slane %v1765_v57, 1  ;;  %v1766_v33 = vperm.slane %v1765_v57, 0 }
 0x447   : > { %1784 = vperm.xlu2 %2610, %v1779_v37   ;;  %1777 = vperm.xlu1 %2609, %v1766_v33  }
 0x448   : > { %1771 = vperm.xlu0 %2603, %v1766_v33  }
 0x450   : > { %2611 = vset.pattern.permute.xlu0 %v3360_v4 }
 0x458   : > { %1790 = vperm.xlu0 %2611, %v1779_v37  }
 0x4a1   : > { %v1785_v39 = vpop.permute.xlu2 %1784 }
 0x4a2   : > { %v1794_v44 = vsub.f32 %v1785_v39, %v3309_v51 }
 0x4a4   : > { %v1798_v61 = vmul.f32 %v1794_v44, %v3325_v54 }
 0x4a6   : > { %v1802_v62 = vmul.f32 0.5, %v1798_v61 }
 0x4b9   : > { %v1778_v38 = vpop.permute.xlu1 %1777 }
 0x4ba   : > { %v1793_v40 = vsub.f32 %v1778_v38, %v3320_v53  ;;  %v1772_v41 = vpop.permute.xlu0 %1771 }
 0x4bb   : > { %v1792_v42 = vsub.f32 %v1772_v41, %v3309_v51  ;;  %v1838_v41 = vmul.f32 %v1765_v57, %v3447_v21 }
 0x4bc   : > { %v1797_v43 = vmul.f32 %v1793_v40, %v3330_v55 }
 0x4bd   : > { %v1796_v47 = vmul.f32 %v1792_v42, %v3325_v54 }
 0x4be   : > { %v1801_v58 = vmul.f32 0.5, %v1797_v43 }
 0x4bf   : > { %v1800_v60 = vmul.f32 0.5, %v1796_v47  ;;  %v1839_v47 = vadd.f32 %v1838_v41, %v3452_v24 }
 0x4c0   : > { %2645 = vtanh.f32 %v1801_v58 }
 0x4c1   : > { %2647 = vtanh.f32 %v1800_v60 }
 0x4c2   : > { %2649 = vtanh.f32 %v1802_v62 }
 0x4c6   : > { %v2646_v63 = vpop.eup %2645 }
 0x4c7   : > { %v2648_v50 = vpop.eup %2647  ;;  %v1809_v0 = vmul.f32 0.5, %v2646_v63 }
 0x4c8   : > { %v1808_v1 = vmul.f32 0.5, %v2648_v50  ;;  %v2650_v14 = vpop.eup %2649 }
 0x4c9   : > { %v1813_v3 = vadd.f32 0.5, %v1809_v0  ;;  %v1810_v18 = vmul.f32 0.5, %v2650_v14 }
 0x4ca   : > { %v1812_v5 = vadd.f32 0.5, %v1808_v1  ;;  %v1791_v6 = vpop.permute.xlu0 %1790 }
 0x4cb   : > { %v1817_v7 = vmul.f32 %v1813_v3, %v3304_v49  ;;  %v1795_v8 = vsub.f32 %v1791_v6, %v3320_v53  ;;  %v1814_v20 = vadd.f32 0.5, %v1810_v18 }
 0x4cc   : > { %v1816_v9 = vmul.f32 %v1812_v5, %v3299_v48 }
 0x4cd   : > { %v1799_v11 = vmul.f32 %v1795_v8, %v3330_v55  ;;  %v1821_v12 = vsel %vm1631_vm6, %v1817_v7, 0.0  ;;  %v1818_v26 = vmul.f32 %v1814_v20, %v3299_v48 }
 0x4ce   : > { %v1820_v13 = vsel %vm1631_vm6, %v1816_v9, 0.0 }
 0x4cf   : > { %v1803_v15 = vmul.f32 0.5, %v1799_v11  ;;  %v1822_v16 = vadd.f32 %v1821_v12, %v1820_v13  ;;  %v1829_v30 = vsel %vm1631_vm6, %v1818_v26, 0.0 }
 0x4d1   : > { %2651 = vtanh.f32 %v1803_v15  ;;  %v1823_v19 = vrot.slane %v1822_v16, 4 }
 0x4d3   : > { %v1824_v25 = vadd.f32 %v1823_v19, %v1822_v16 }
 0x4d5   : > { %v1825_v29 = vrot.slane %v1824_v25, 2 }
 0x4d7   : > { %v2652_v22 = vpop.eup %2651  ;;  %v1826_v34 = vadd.f32 %v1825_v29, %v1824_v25 }
 0x4d8   : > { %v1811_v23 = vmul.f32 0.5, %v2652_v22 }
 0x4d9   : > { %v1827_v33 = vrot.slane %v1826_v34, 1 }
 0x4da   : > { %v1815_v27 = vadd.f32 0.5, %v1811_v23 }
 0x4db   : > { %v1828_v39 = vadd.f32 %v1827_v33, %v1826_v34 }
 0x4dc   : > { %v1819_v28 = vmul.f32 %v1815_v27, %v3304_v49 }
 0x4dd   : > { %v1840_v43 = vadd.f32 %v1828_v39, %v3435_v59 }
 0x4de   : > { %v1830_v31 = vsel %vm1631_vm6, %v1819_v28, 0.0 }
 0x4df   : > { %v1831_v32 = vadd.f32 %v1830_v31, %v1829_v30 }
 0x4e1   : > { %v1832_v35 = vrot.slane %v1831_v32, 4 }
 0x4e3   : > { %v1833_v36 = vadd.f32 %v1832_v35, %v1831_v32 }
 0x4e5   : > { %v1834_v37 = vrot.slane %v1833_v36, 2 }
 0x4e7   : > { %v1835_v38 = vadd.f32 %v1834_v37, %v1833_v36 }
 0x4e9   : > { %v1836_v40 = vrot.slane %v1835_v38, 1 }
 0x4eb   : > { %v1837_v42 = vadd.f32 %v1836_v40, %v1835_v38 }
 0x4ed   : > { %v1841_v44 = vadd.f32 %v1837_v42, %v3433_v10 }
 0x4ef   : > { %v1844_v58 = vsel %vm1738_vm7, %v1841_v44, %v1840_v43 }
 0x4f0   : > { %1847 = vrot.lane.b32.xlu1 %v1844_v58, %s2737_s1  ;;  %v1846_v60 = vadd.f32 %v1844_v58, %v1839_v47 }
 0x562   : > { %v1848_v61 = vpop.permute.xlu1 %1847 }
 0x563   : > { %v1850_v62 = vadd.f32 %v1848_v61, %v3443_v17 }
 0x565   : > { %v1851_v63 = vadd.f32 1e-08, %v1850_v62 }
 0x567   : > { %2653 = vrcp.f32 %v1851_v63  ;;  %v1863_v1 = vand.u32 2147483648, %v1851_v63  ;;  %v1861_v5 = vand.u32 2147483647, %v1851_v63  ;;  %vm1857_vm13 = vweird.f32 %v1851_v63 }
 0x569   : > { %v1864_v7 = vor.u32 1.1754944e-38, %v1863_v1  ;;  %vm1862_vm15 = vcmp.eq.f32.partialorder %v1861_v5, 8.507059e+37 }
 0x56d   : > { %v2654_v50 = vpop.eup %2653 }
 0x56e   : > { %v1853_v0 = vmul.f32 %v2654_v50, %v1851_v63  ;;  %vm1858_vm12 = vweird.f32 %v2654_v50 }
 0x56f   : > { %vm1859_vm14 = vmor %vm1857_vm13, %vm1858_vm12 }
 0x570   : > { %v1854_v57 = vsub.f32 1.0, %v1853_v0 }
 0x572   : > { %v1855_v3 = vmul.f32 %v2654_v50, %v1854_v57 }
 0x574   : > { %v1856_v6 = vadd.f32 %v2654_v50, %v1855_v3 }
 0x576   : > { %v1860_v8 = vsel %vm1859_vm14, %v2654_v50, %v1856_v6 }
 0x577   : > { %v1865_v9 = vsel %vm1862_vm15, %v1864_v7, %v1860_v8 }
 0x578   : > { %v1866_v11 = vmul.f32 %v1865_v9, %v1846_v60 }
 0x57a   : > { %v1880_v12 = vperm.slane %v1866_v11, 1  ;;  %v1867_v13 = vperm.slane %v1866_v11, 0 }
 0x57c   : > { %1891 = vperm.xlu0 %2611, %v1880_v12   ;;  %1878 = vperm.xlu1 %2609, %v1867_v13  }
 0x57d   : > { %1872 = vperm.xlu2 %2610, %v1867_v13  }
 0x584   : > { %2612 = vset.pattern.permute.xlu1 %v3354_v2 }
 0x585   : > { %1885 = vperm.xlu2 %2610, %v1880_v12  }
 0x5d7   : > { %v1873_v14 = vpop.permute.xlu2 %1872 }
 0x5d8   : > { %v1893_v18 = vsub.f32 %v1873_v14, %v3309_v51 }
 0x5da   : > { %v1897_v20 = vmul.f32 %v1893_v18, %v3325_v54  ;;  %v1939_v18 = vmul.f32 %v1866_v11, %v3447_v21 }
 0x5dc   : > { %v1901_v23 = vmul.f32 0.5, %v1897_v20 }
 0x5df   : > { %v1886_v15 = vpop.permute.xlu2 %1885 }
 0x5e0   : > { %v1895_v16 = vsub.f32 %v1886_v15, %v3309_v51 }
 0x5e2   : > { %v1899_v19 = vmul.f32 %v1895_v16, %v3325_v54 }
 0x5e4   : > { %v1903_v22 = vmul.f32 0.5, %v1899_v19 }
 0x5e6   : > { %2655 = vtanh.f32 %v1903_v22 }
 0x5e7   : > { %2657 = vtanh.f32 %v1901_v23  ;;  %v1940_v23 = vadd.f32 %v1939_v18, %v3452_v24 }
 0x5ec   : > { %v2656_v31 = vpop.eup %2655 }
 0x5ed   : > { %v2658_v34 = vpop.eup %2657  ;;  %v1911_v36 = vmul.f32 0.5, %v2656_v31 }
 0x5ee   : > { %v1892_v25 = vpop.permute.xlu0 %1891  ;;  %v1879_v26 = vpop.permute.xlu1 %1878  ;;  %v1909_v37 = vmul.f32 0.5, %v2658_v34 }
 0x5ef   : > { %v1896_v27 = vsub.f32 %v1892_v25, %v3320_v53  ;;  %v1894_v28 = vsub.f32 %v1879_v26, %v3320_v53  ;;  %v1915_v33 = vadd.f32 0.5, %v1911_v36 }
 0x5f0   : > { %v1913_v39 = vadd.f32 0.5, %v1909_v37 }
 0x5f1   : > { %v1900_v29 = vmul.f32 %v1896_v27, %v3330_v55  ;;  %v1898_v30 = vmul.f32 %v1894_v28, %v3330_v55  ;;  %v1919_v43 = vmul.f32 %v1915_v33, %v3299_v48 }
 0x5f2   : > { %v1917_v47 = vmul.f32 %v1913_v39, %v3299_v48 }
 0x5f3   : > { %v1904_v32 = vmul.f32 0.5, %v1900_v29  ;;  %v1902_v35 = vmul.f32 0.5, %v1898_v30  ;;  %v1930_v62 = vsel %vm1631_vm6, %v1919_v43, 0.0 }
 0x5f4   : > { %v1921_v50 = vsel %vm1631_vm6, %v1917_v47, 0.0 }
 0x5f5   : > { %2659 = vtanh.f32 %v1904_v32 }
 0x5f6   : > { %2661 = vtanh.f32 %v1902_v35 }
 0x5fb   : > { %v2660_v38 = vpop.eup %2659 }
 0x5fc   : > { %v2662_v40 = vpop.eup %2661  ;;  %v1912_v41 = vmul.f32 0.5, %v2660_v38 }
 0x5fd   : > { %v1910_v42 = vmul.f32 0.5, %v2662_v40 }
 0x5fe   : > { %v1916_v44 = vadd.f32 0.5, %v1912_v41 }
 0x5ff   : > { %v1914_v58 = vadd.f32 0.5, %v1910_v42 }
 0x600   : > { %v1920_v60 = vmul.f32 %v1916_v44, %v3304_v49 }
 0x601   : > { %v1918_v61 = vmul.f32 %v1914_v58, %v3304_v49 }
 0x602   : > { %v1931_v63 = vsel %vm1631_vm6, %v1920_v60, 0.0 }
 0x603   : > { %v1932_v0 = vadd.f32 %v1931_v63, %v1930_v62  ;;  %v1922_v57 = vsel %vm1631_vm6, %v1918_v61, 0.0 }
 0x604   : > { %v1923_v1 = vadd.f32 %v1922_v57, %v1921_v50 }
 0x605   : > { %v1933_v3 = vrot.slane %v1932_v0, 4 }
 0x606   : > { %v1924_v5 = vrot.slane %v1923_v1, 4 }
 0x607   : > { %v1934_v6 = vadd.f32 %v1933_v3, %v1932_v0 }
 0x608   : > { %v1925_v7 = vadd.f32 %v1924_v5, %v1923_v1 }
 0x609   : > { %v1935_v8 = vrot.slane %v1934_v6, 2 }
 0x60a   : > { %v1926_v9 = vrot.slane %v1925_v7, 2 }
 0x60b   : > { %v1936_v12 = vadd.f32 %v1935_v8, %v1934_v6 }
 0x60c   : > { %v1927_v13 = vadd.f32 %v1926_v9, %v1925_v7 }
 0x60d   : > { %v1937_v14 = vrot.slane %v1936_v12, 1 }
 0x60e   : > { %v1928_v15 = vrot.slane %v1927_v13, 1 }
 0x60f   : > { %v1938_v16 = vadd.f32 %v1937_v14, %v1936_v12 }
 0x610   : > { %v1929_v19 = vadd.f32 %v1928_v15, %v1927_v13 }
 0x611   : > { %v1942_v20 = vadd.f32 %v1938_v16, %v3433_v10 }
 0x612   : > { %v1941_v22 = vadd.f32 %v1929_v19, %v3435_v59 }
 0x614   : > { %v1945_v25 = vsel %vm1738_vm7, %v1942_v20, %v1941_v22 }
 0x615   : > { %1948 = vrot.lane.b32.xlu1 %v1945_v25, %s2737_s1  ;;  %v1947_v26 = vadd.f32 %v1945_v25, %v1940_v23 }
 0x687   : > { %v1949_v27 = vpop.permute.xlu1 %1948 }
 0x688   : > { %v1951_v28 = vadd.f32 %v1949_v27, %v3443_v17 }
 0x68a   : > { %v1952_v29 = vadd.f32 1e-08, %v1951_v28 }
 0x68c   : > { %2663 = vrcp.f32 %v1952_v29  ;;  %v1964_v32 = vand.u32 2147483648, %v1952_v29  ;;  %v1962_v34 = vand.u32 2147483647, %v1952_v29  ;;  %vm1958_vm1 = vweird.f32 %v1952_v29 }
 0x68e   : > { %v1965_v37 = vor.u32 1.1754944e-38, %v1964_v32  ;;  %vm1963_vm3 = vcmp.eq.f32.partialorder %v1962_v34, 8.507059e+37 }
 0x692   : > { %v2664_v30 = vpop.eup %2663 }
 0x693   : > { %v1954_v31 = vmul.f32 %v2664_v30, %v1952_v29  ;;  %vm1959_vm0 = vweird.f32 %v2664_v30 }
 0x694   : > { %vm1960_vm2 = vmor %vm1958_vm1, %vm1959_vm0  ;;  %vm2272_vm0 = vcmask 123904   ;;  %vm2291_vm1 = vcmask (%p1501_p0), 25600  }
 0x695   : > { %v1955_v11 = vsub.f32 1.0, %v1954_v31 }
 0x697   : > { %v1956_v35 = vmul.f32 %v2664_v30, %v1955_v11 }
 0x699   : > { %v1957_v36 = vadd.f32 %v2664_v30, %v1956_v35 }
 0x69b   : > { %v1961_v33 = vsel %vm1960_vm2, %v2664_v30, %v1957_v36 }
 0x69c   : > { %v1966_v38 = vsel %vm1963_vm3, %v1965_v37, %v1961_v33 }
 0x69d   : > { %v1967_v39 = vmul.f32 %v1966_v38, %v1947_v26 }
 0x69f   : > { %v1981_v40 = vperm.slane %v1967_v39, 1  ;;  %v1968_v41 = vperm.slane %v1967_v39, 0 }
 0x6a1   : > { %1986 = vperm.xlu1 %2612, %v1981_v40   ;;  %1979 = vperm.xlu0 %2611, %v1968_v41  }
 0x6a2   : > { %1973 = vperm.xlu2 %2610, %v1968_v41  }
 0x6a9   : > { %2614 = vset.pattern.permute.xlu0 %v3354_v2 }
 0x6aa   : > { %2613 = vset.pattern.permute.xlu2 %v3360_v4 }
 0x6b2   : > { %1992 = vperm.xlu2 %2613, %v1981_v40  }
 0x6fc   : > { %v1974_v42 = vpop.permute.xlu2 %1973 }
 0x6fd   : > { %v1994_v43 = vsub.f32 %v1974_v42, %v3309_v51 }
 0x6ff   : > { %v1998_v44 = vmul.f32 %v1994_v43, %v3325_v54 }
 0x701   : > { %v2002_v60 = vmul.f32 0.5, %v1998_v44 }
 0x703   : > { %2665 = vtanh.f32 %v2002_v60 }
 0x709   : > { %v2666_v5 = vpop.eup %2665 }
 0x70a   : > { %v2010_v12 = vmul.f32 0.5, %v2666_v5 }
 0x70c   : > { %v1993_v47 = vpop.permute.xlu2 %1992  ;;  %v2014_v15 = vadd.f32 0.5, %v2010_v12 }
 0x70d   : > { %v1997_v58 = vsub.f32 %v1993_v47, %v3320_v53  ;;  %v2040_v47 = vmul.f32 %v1967_v39, %v3447_v21 }
 0x70e   : > { %v2018_v23 = vmul.f32 %v2014_v15, %v3299_v48 }
 0x70f   : > { %v2001_v61 = vmul.f32 %v1997_v58, %v3330_v55 }
 0x710   : > { %v2022_v30 = vsel %vm1631_vm6, %v2018_v23, 0.0 }
 0x711   : > { %v2005_v62 = vmul.f32 0.5, %v2001_v61 }
 0x713   : > { %2667 = vtanh.f32 %v2005_v62  ;;  %v1987_v63 = vpop.permute.xlu1 %1986  ;;  %v1980_v50 = vpop.permute.xlu0 %1979  ;;  %v2041_v62 = vadd.f32 %v2040_v47, %v3452_v24 }
 0x714   : > { %v1996_v0 = vsub.f32 %v1987_v63, %v3309_v51  ;;  %v1995_v57 = vsub.f32 %v1980_v50, %v3320_v53 }
 0x716   : > { %v2000_v1 = vmul.f32 %v1996_v0, %v3325_v54  ;;  %v1999_v3 = vmul.f32 %v1995_v57, %v3330_v55 }
 0x718   : > { %v2004_v6 = vmul.f32 0.5, %v2000_v1  ;;  %v2003_v7 = vmul.f32 0.5, %v1999_v3 }
 0x719   : > { %v2668_v8 = vpop.eup %2667 }
 0x71a   : > { %2669 = vtanh.f32 %v2004_v6  ;;  %v2013_v9 = vmul.f32 0.5, %v2668_v8 }
 0x71b   : > { %2671 = vtanh.f32 %v2003_v7 }
 0x71c   : > { %v2017_v13 = vadd.f32 0.5, %v2013_v9 }
 0x71e   : > { %v2021_v20 = vmul.f32 %v2017_v13, %v3304_v49 }
 0x720   : > { %v2670_v14 = vpop.eup %2669  ;;  %v2032_v28 = vsel %vm1631_vm6, %v2021_v20, 0.0 }
 0x721   : > { %v2672_v16 = vpop.eup %2671  ;;  %v2012_v18 = vmul.f32 0.5, %v2670_v14 }
 0x722   : > { %v2011_v19 = vmul.f32 0.5, %v2672_v16 }
 0x723   : > { %v2016_v22 = vadd.f32 0.5, %v2012_v18 }
 0x724   : > { %v2015_v25 = vadd.f32 0.5, %v2011_v19 }
 0x725   : > { %v2020_v26 = vmul.f32 %v2016_v22, %v3299_v48 }
 0x726   : > { %v2019_v27 = vmul.f32 %v2015_v25, %v3304_v49 }
 0x727   : > { %v2031_v29 = vsel %vm1631_vm6, %v2020_v26, 0.0 }
 0x728   : > { %v2033_v31 = vadd.f32 %v2032_v28, %v2031_v29  ;;  %v2023_v11 = vsel %vm1631_vm6, %v2019_v27, 0.0 }
 0x729   : > { %v2024_v32 = vadd.f32 %v2023_v11, %v2022_v30 }
 0x72a   : > { %v2034_v35 = vrot.slane %v2033_v31, 4 }
 0x72b   : > { %v2025_v34 = vrot.slane %v2024_v32, 4 }
 0x72c   : > { %v2035_v36 = vadd.f32 %v2034_v35, %v2033_v31 }
 0x72d   : > { %v2026_v37 = vadd.f32 %v2025_v34, %v2024_v32 }
 0x72e   : > { %v2036_v33 = vrot.slane %v2035_v36, 2 }
 0x72f   : > { %v2027_v38 = vrot.slane %v2026_v37, 2 }
 0x730   : > { %v2037_v40 = vadd.f32 %v2036_v33, %v2035_v36 }
 0x731   : > { %v2028_v41 = vadd.f32 %v2027_v38, %v2026_v37 }
 0x732   : > { %v2038_v42 = vrot.slane %v2037_v40, 1 }
 0x733   : > { %v2029_v43 = vrot.slane %v2028_v41, 1 }
 0x734   : > { %v2039_v44 = vadd.f32 %v2038_v42, %v2037_v40 }
 0x735   : > { %v2030_v58 = vadd.f32 %v2029_v43, %v2028_v41 }
 0x736   : > { %v2043_v60 = vadd.f32 %v2039_v44, %v3433_v10 }
 0x737   : > { %v2042_v61 = vadd.f32 %v2030_v58, %v3435_v59 }
 0x739   : > { %v2046_v63 = vsel %vm1738_vm7, %v2043_v60, %v2042_v61 }
 0x73a   : > { %2049 = vrot.lane.b32.xlu0 %v2046_v63, %s2737_s1  ;;  %v2048_v50 = vadd.f32 %v2046_v63, %v2041_v62 }
 0x7ac   : > { %v2050_v0 = vpop.permute.xlu0 %2049 }
 0x7ad   : > { %v2052_v57 = vadd.f32 %v2050_v0, %v3443_v17 }
 0x7af   : > { %v2053_v1 = vadd.f32 1e-08, %v2052_v57 }
 0x7b1   : > { %2673 = vrcp.f32 %v2053_v1  ;;  %v2065_v6 = vand.u32 2147483648, %v2053_v1  ;;  %v2063_v8 = vand.u32 2147483647, %v2053_v1  ;;  %vm2059_vm5 = vweird.f32 %v2053_v1 }
 0x7b3   : > { %v2066_v12 = vor.u32 1.1754944e-38, %v2065_v6  ;;  %vm2064_vm9 = vcmp.eq.f32.partialorder %v2063_v8, 8.507059e+37 }
 0x7b7   : > { %v2674_v3 = vpop.eup %2673 }
 0x7b8   : > { %v2055_v5 = vmul.f32 %v2674_v3, %v2053_v1  ;;  %vm2060_vm4 = vweird.f32 %v2674_v3 }
 0x7b9   : > { %vm2061_vm8 = vmor %vm2059_vm5, %vm2060_vm4 }
 0x7ba   : > { %v2056_v39 = vsub.f32 1.0, %v2055_v5 }
 0x7bc   : > { %v2057_v7 = vmul.f32 %v2674_v3, %v2056_v39 }
 0x7be   : > { %v2058_v9 = vadd.f32 %v2674_v3, %v2057_v7 }
 0x7c0   : > { %v2062_v13 = vsel %vm2061_vm8, %v2674_v3, %v2058_v9 }
 0x7c1   : > { %v2067_v14 = vsel %vm2064_vm9, %v2066_v12, %v2062_v13 }
 0x7c2   : > { %v2068_v15 = vmul.f32 %v2067_v14, %v2048_v50 }
 0x7c4   : > { %v2082_v16 = vperm.slane %v2068_v15, 1  ;;  %v2069_v18 = vperm.slane %v2068_v15, 0 }
 0x7c6   : > { %2087 = vperm.xlu0 %2614, %v2082_v16   ;;  %2080 = vperm.xlu2 %2613, %v2069_v18  }
 0x7c7   : > { %2074 = vperm.xlu1 %2612, %v2069_v18  }
 0x7cf   : > { %2615 = vset.pattern.permute.xlu1 %v3360_v4 }
 0x7d7   : > { %2093 = vperm.xlu1 %2615, %v2082_v16  }
 0x7df   : > { %2616 = vset.pattern.permute.xlu1 %v3354_v2 }
 0x820   : > { %v2081_v19 = vpop.permute.xlu2 %2080 }
 0x821   : > { %v2096_v20 = vsub.f32 %v2081_v19, %v3320_v53 }
 0x823   : > { %v2100_v22 = vmul.f32 %v2096_v20, %v3330_v55 }
 0x825   : > { %v2104_v23 = vmul.f32 0.5, %v2100_v22  ;;  %v2141_v22 = vmul.f32 %v2068_v15, %v3447_v21 }
 0x827   : > { %2675 = vtanh.f32 %v2104_v23 }
 0x82d   : > { %v2676_v31 = vpop.eup %2675 }
 0x82e   : > { %v2112_v2 = vmul.f32 0.5, %v2676_v31 }
 0x830   : > { %v2116_v34 = vadd.f32 0.5, %v2112_v2 }
 0x832   : > { %v2120_v40 = vmul.f32 %v2116_v34, %v3304_v49 }
 0x834   : > { %v2124_v58 = vsel %vm1631_vm6, %v2120_v40, 0.0 }
 0x838   : > { %v2088_v25 = vpop.permute.xlu0 %2087 }
 0x839   : > { %v2075_v26 = vpop.permute.xlu1 %2074  ;;  %v2097_v28 = vsub.f32 %v2088_v25, %v3309_v51 }
 0x83a   : > { %v2095_v27 = vsub.f32 %v2075_v26, %v3309_v51 }
 0x83b   : > { %v2101_v11 = vmul.f32 %v2097_v28, %v3325_v54 }
 0x83c   : > { %v2099_v29 = vmul.f32 %v2095_v27, %v3325_v54  ;;  %v2142_v27 = vadd.f32 %v2141_v22, %v3452_v24 }
 0x83d   : > { %v2105_v32 = vmul.f32 0.5, %v2101_v11 }
 0x83e   : > { %v2103_v30 = vmul.f32 0.5, %v2099_v29 }
 0x840   : > { %2677 = vtanh.f32 %v2103_v30 }
 0x841   : > { %2679 = vtanh.f32 %v2105_v32 }
 0x846   : > { %v2678_v35 = vpop.eup %2677 }
 0x847   : > { %v2111_v36 = vmul.f32 0.5, %v2678_v35  ;;  %v2680_v44 = vpop.eup %2679 }
 0x848   : > { %v2113_v61 = vmul.f32 0.5, %v2680_v44 }
 0x849   : > { %v2115_v37 = vadd.f32 0.5, %v2111_v36  ;;  %v2094_v33 = vpop.permute.xlu1 %2093 }
 0x84a   : > { %v2098_v38 = vsub.f32 %v2094_v33, %v3320_v53  ;;  %v2117_v63 = vadd.f32 0.5, %v2113_v61 }
 0x84b   : > { %v2119_v41 = vmul.f32 %v2115_v37, %v3299_v48 }
 0x84c   : > { %v2102_v42 = vmul.f32 %v2098_v38, %v3330_v55  ;;  %v2121_v1 = vmul.f32 %v2117_v63, %v3299_v48 }
 0x84d   : > { %v2123_v43 = vsel %vm1631_vm6, %v2119_v41, 0.0 }
 0x84e   : > { %v2106_v47 = vmul.f32 0.5, %v2102_v42  ;;  %v2125_v60 = vadd.f32 %v2124_v58, %v2123_v43  ;;  %v2132_v6 = vsel %vm1631_vm6, %v2121_v1, 0.0 }
 0x850   : > { %2681 = vtanh.f32 %v2106_v47  ;;  %v2126_v62 = vrot.slane %v2125_v60, 4 }
 0x852   : > { %v2127_v57 = vadd.f32 %v2126_v62, %v2125_v60 }
 0x854   : > { %v2128_v39 = vrot.slane %v2127_v57, 2 }
 0x856   : > { %v2682_v50 = vpop.eup %2681  ;;  %v2129_v12 = vadd.f32 %v2128_v39, %v2127_v57 }
 0x857   : > { %v2114_v0 = vmul.f32 0.5, %v2682_v50 }
 0x858   : > { %v2130_v16 = vrot.slane %v2129_v12, 1 }
 0x859   : > { %v2118_v3 = vadd.f32 0.5, %v2114_v0 }
 0x85a   : > { %v2131_v19 = vadd.f32 %v2130_v16, %v2129_v12 }
 0x85b   : > { %v2122_v5 = vmul.f32 %v2118_v3, %v3304_v49 }
 0x85c   : > { %v2143_v25 = vadd.f32 %v2131_v19, %v3435_v59 }
 0x85d   : > { %v2133_v7 = vsel %vm1631_vm6, %v2122_v5, 0.0 }
 0x85e   : > { %v2134_v8 = vadd.f32 %v2133_v7, %v2132_v6 }
 0x860   : > { %v2135_v9 = vrot.slane %v2134_v8, 4 }
 0x862   : > { %v2136_v13 = vadd.f32 %v2135_v9, %v2134_v8 }
 0x864   : > { %v2137_v14 = vrot.slane %v2136_v13, 2 }
 0x866   : > { %v2138_v18 = vadd.f32 %v2137_v14, %v2136_v13 }
 0x868   : > { %v2139_v20 = vrot.slane %v2138_v18, 1 }
 0x86a   : > { %v2140_v23 = vadd.f32 %v2139_v20, %v2138_v18 }
 0x86c   : > { %v2144_v26 = vadd.f32 %v2140_v23, %v3433_v10 }
 0x86e   : > { %v2147_v28 = vsel %vm1738_vm7, %v2144_v26, %v2143_v25 }
 0x86f   : > { %2150 = vrot.lane.b32.xlu2 %v2147_v28, %s2737_s1  ;;  %v2149_v29 = vadd.f32 %v2147_v28, %v2142_v27 }
 0x8c9   : > { %v2151_v30 = vpop.permute.xlu2 %2150 }
 0x8ca   : > { %v2153_v31 = vadd.f32 %v2151_v30, %v3443_v17 }
 0x8cc   : > { %v2154_v11 = vadd.f32 1e-08, %v2153_v31 }
 0x8ce   : > { %2683 = vrcp.f32 %v2154_v11  ;;  %v2166_v35 = vand.u32 2147483648, %v2154_v11  ;;  %v2164_v36 = vand.u32 2147483647, %v2154_v11  ;;  %vm2160_vm11 = vweird.f32 %v2154_v11 }
 0x8d0   : > { %v2167_v33 = vor.u32 1.1754944e-38, %v2166_v35  ;;  %vm2165_vm13 = vcmp.eq.f32.partialorder %v2164_v36, 8.507059e+37 }
 0x8d4   : > { %v2684_v2 = vpop.eup %2683 }
 0x8d5   : > { %v2156_v32 = vmul.f32 %v2684_v2, %v2154_v11  ;;  %vm2161_vm10 = vweird.f32 %v2684_v2 }
 0x8d6   : > { %vm2162_vm12 = vmor %vm2160_vm11, %vm2161_vm10 }
 0x8d7   : > { %v2157_v15 = vsub.f32 1.0, %v2156_v32 }
 0x8d9   : > { %v2158_v34 = vmul.f32 %v2684_v2, %v2157_v15 }
 0x8db   : > { %v2159_v37 = vadd.f32 %v2684_v2, %v2158_v34 }
 0x8dd   : > { %v2163_v38 = vsel %vm2162_vm12, %v2684_v2, %v2159_v37 }
 0x8de   : > { %v2168_v40 = vsel %vm2165_vm13, %v2167_v33, %v2163_v38 }
 0x8df   : > { %v2169_v41 = vmul.f32 %v2168_v40, %v2149_v29 }
 0x8e1   : > { %v2183_v42 = vperm.slane %v2169_v41, 1  ;;  %v2170_v43 = vperm.slane %v2169_v41, 0 }
 0x8e3   : > { %2188 = vperm.xlu0 %2614, %v2183_v42   ;;  %2181 = vperm.xlu2 %2613, %v2170_v43  }
 0x8e4   : > { %2175 = vperm.xlu1 %2616, %v2170_v43  }
 0x8eb   : > { %2618 = vset.pattern.permute.xlu0 %v3360_v4 }
 0x8ec   : > { %2617 = vset.pattern.permute.xlu1 %v3360_v4 }
 0x8f4   : > { %2194 = vperm.xlu1 %2617, %v2183_v42  }
 0x93d   : > { %v2182_v44 = vpop.permute.xlu2 %2181 }
 0x93e   : > { %v2197_v47 = vsub.f32 %v2182_v44, %v3320_v53 }
 0x940   : > { %v2201_v58 = vmul.f32 %v2197_v47, %v3330_v55  ;;  %v2242_v47 = vmul.f32 %v2169_v41, %v3447_v21 }
 0x942   : > { %v2205_v60 = vmul.f32 0.5, %v2201_v58 }
 0x944   : > { %2685 = vtanh.f32 %v2205_v60 }
 0x94a   : > { %v2686_v1 = vpop.eup %2685 }
 0x94b   : > { %v2213_v3 = vmul.f32 0.5, %v2686_v1 }
 0x94d   : > { %v2217_v6 = vadd.f32 0.5, %v2213_v3 }
 0x94f   : > { %v2221_v13 = vmul.f32 %v2217_v6, %v3304_v49 }
 0x951   : > { %v2225_v22 = vsel %vm1631_vm6, %v2221_v13, 0.0 }
 0x955   : > { %v2189_v61 = vpop.permute.xlu0 %2188 }
 0x956   : > { %v2176_v62 = vpop.permute.xlu1 %2175  ;;  %v2198_v50 = vsub.f32 %v2189_v61, %v3309_v51 }
 0x957   : > { %v2196_v63 = vsub.f32 %v2176_v62, %v3309_v51  ;;  %v2243_v62 = vadd.f32 %v2242_v47, %v3452_v24 }
 0x958   : > { %v2202_v4 = vmul.f32 %v2198_v50, %v3325_v54 }
 0x959   : > { %v2200_v0 = vmul.f32 %v2196_v63, %v3325_v54 }
 0x95a   : > { %v2206_v5 = vmul.f32 0.5, %v2202_v4 }
 0x95b   : > { %v2204_v57 = vmul.f32 0.5, %v2200_v0 }
 0x95d   : > { %2687 = vtanh.f32 %v2204_v57 }
 0x95e   : > { %2689 = vtanh.f32 %v2206_v5 }
 0x963   : > { %v2688_v39 = vpop.eup %2687 }
 0x964   : > { %v2212_v7 = vmul.f32 0.5, %v2688_v39  ;;  %v2690_v19 = vpop.eup %2689 }
 0x965   : > { %v2214_v25 = vmul.f32 0.5, %v2690_v19 }
 0x966   : > { %v2216_v8 = vadd.f32 0.5, %v2212_v7  ;;  %v2195_v9 = vpop.permute.xlu1 %2194 }
 0x967   : > { %v2199_v12 = vsub.f32 %v2195_v9, %v3320_v53  ;;  %v2218_v27 = vadd.f32 0.5, %v2214_v25 }
 0x968   : > { %v2220_v14 = vmul.f32 %v2216_v8, %v3299_v48 }
 0x969   : > { %v2203_v16 = vmul.f32 %v2199_v12, %v3330_v55  ;;  %v2222_v31 = vmul.f32 %v2218_v27, %v3299_v48 }
 0x96a   : > { %v2224_v18 = vsel %vm1631_vm6, %v2220_v14, 0.0 }
 0x96b   : > { %v2207_v20 = vmul.f32 0.5, %v2203_v16  ;;  %v2226_v23 = vadd.f32 %v2225_v22, %v2224_v18  ;;  %v2233_v15 = vsel %vm1631_vm6, %v2222_v31, 0.0 }
 0x96d   : > { %2691 = vtanh.f32 %v2207_v20  ;;  %v2227_v26 = vrot.slane %v2226_v23, 4 }
 0x96f   : > { %v2228_v30 = vadd.f32 %v2227_v26, %v2226_v23 }
 0x971   : > { %v2229_v32 = vrot.slane %v2228_v30, 2 }
 0x973   : > { %v2692_v28 = vpop.eup %2691  ;;  %v2230_v37 = vadd.f32 %v2229_v32, %v2228_v30 }
 0x974   : > { %v2215_v29 = vmul.f32 0.5, %v2692_v28 }
 0x975   : > { %v2231_v40 = vrot.slane %v2230_v37, 1 }
 0x976   : > { %v2219_v11 = vadd.f32 0.5, %v2215_v29 }
 0x977   : > { %v2232_v43 = vadd.f32 %v2231_v40, %v2230_v37 }
 0x978   : > { %v2223_v2 = vmul.f32 %v2219_v11, %v3304_v49 }
 0x979   : > { %v2244_v60 = vadd.f32 %v2232_v43, %v3435_v59 }
 0x97a   : > { %v2234_v35 = vsel %vm1631_vm6, %v2223_v2, 0.0 }
 0x97b   : > { %v2235_v34 = vadd.f32 %v2234_v35, %v2233_v15 }
 0x97d   : > { %v2236_v36 = vrot.slane %v2235_v34, 4 }
 0x97f   : > { %v2237_v33 = vadd.f32 %v2236_v36, %v2235_v34 }
 0x981   : > { %v2238_v38 = vrot.slane %v2237_v33, 2 }
 0x983   : > { %v2239_v42 = vadd.f32 %v2238_v38, %v2237_v33 }
 0x985   : > { %v2240_v44 = vrot.slane %v2239_v42, 1 }
 0x987   : > { %v2241_v58 = vadd.f32 %v2240_v44, %v2239_v42 }
 0x989   : > { %v2245_v61 = vadd.f32 %v2241_v58, %v3433_v10 }
 0x98b   : > { %v2248_v63 = vsel %vm1738_vm7, %v2245_v61, %v2244_v60 }
 0x98c   : > { %2251 = vrot.lane.b32.xlu2 %v2248_v63, %s2737_s1  ;;  %v2250_v50 = vadd.f32 %v2248_v63, %v2243_v62 }
 0x9e6   : > { %v2252_v0 = vpop.permute.xlu2 %2251 }
 0x9e7   : > { %v2254_v57 = vadd.f32 %v2252_v0, %v3443_v17  ;;  %v2276_v17 = vld [vmem:[%s3621_s18] sm:$0x3] (%p1501_p0) }
 0x9e8   :  { %v2281_v9 = vperm.slane (%p1501_p0), %v2276_v17, 0  ;;  %v2286_v12 = vperm.slane (%p1501_p0), %v2276_v17, 1 }
 0x9e9   : > { %v2255_v1 = vadd.f32 1e-08, %v2254_v57 }
 0x9eb   : > { %2693 = vrcp.f32 %v2255_v1  ;;  %v2267_v3 = vand.u32 2147483648, %v2255_v1  ;;  %v2265_v10 = vand.u32 2147483647, %v2255_v1  ;;  %vm2261_vm14 = vweird.f32 %v2255_v1 }
 0x9ed   : > { %v2268_v24 = vor.u32 1.1754944e-38, %v2267_v3  ;;  %vm2266_vm7 = vcmp.eq.f32.partialorder %v2265_v10, 8.507059e+37 }
 0x9f1   : > { %v2694_v4 = vpop.eup %2693 }
 0x9f2   : > { %v2257_v21 = vmul.f32 %v2694_v4, %v2255_v1  ;;  %vm2262_vm6 = vweird.f32 %v2694_v4 }
 0x9f3   : > { %vm2263_vm15 = vmor %vm2261_vm14, %vm2262_vm6 }
 0x9f4   : > { %v2258_v41 = vsub.f32 1.0, %v2257_v21 }
 0x9f6   : > { %v2259_v59 = vmul.f32 %v2694_v4, %v2258_v41 }
 0x9f8   : > { %v2260_v5 = vadd.f32 %v2694_v4, %v2259_v59 }
 0x9fa   : > { %v2264_v39 = vsel %vm2263_vm15, %v2694_v4, %v2260_v5  ;;  %1503 = sbr.rel (!%p1501_p0) target bundleno = 758 (0x2f6), region = 148 }
 0x9fb   : > { %v2269_v6 = vsel %vm2266_vm7, %v2268_v24, %v2264_v39 }
 0x9fc   : > { %v2270_v7 = vmul.f32 %v2269_v6, %v2250_v50  }
 0x9fe   : > { %2273 = vst.msk [vmem:[%s2271_s23] sm:$0x3] %vm2272_vm0, %v2270_v7  ;;  %v3637_v57 = vmov %v2270_v7 }
 0x9ff   :  { %2275 = vst.msk [vmem:[#allocation4] sm:$0x3] %vm2272_vm0, %v2270_v7 }
 0xa00   :  { %2308 = dma.vmem_to_hbm [thread:$0]  %s2304_s25, 32, %s2306_s6, [#allocation5]  }
 0xa05   :  { %v2277_v8 = vld [vmem:[#allocation3] sm:$0x3]  ;;  %v2278_v13 = vld [vmem:[#allocation3 + $0x2] sm:$0x3]  ;;  %v2279_v14 = vld [vmem:[#allocation3 + $0x4] sm:$0x3] }
 0xa06   :  { %v2280_v16 = vld [vmem:[#allocation3 + $0x6] sm:$0x3]  ;;  %v2282_v18 = vmul.f32 %v2281_v9, %v2277_v8  ;;  %v2283_v19 = vmul.f32 %v2281_v9, %v2278_v13  ;;  %v2284_v20 = vmul.f32 %v2281_v9, %v2279_v14 }
 0xa07   :  { %v2285_v46 = vmul.f32 %v2281_v9, %v2280_v16 }
 0xa08   :  { %v2287_v48 = vadd.f32 %v2286_v12, %v2282_v18  ;;  %v2288_v49 = vadd.f32 %v2286_v12, %v2283_v19  ;;  %v2289_v51 = vadd.f32 %v2286_v12, %v2284_v20 }
 0xa09   :  { %v2290_v45 = vadd.f32 %v2286_v12, %v2285_v46 }
 0xa0a   :  { %2292 = vst.msk [vmem:[%s3622_s19] sm:$0x3] %vm2291_vm1, %v2287_v48 }
 0xa0b   :  { %2293 = vst.msk [vmem:[%s3622_s19 + $0x2] sm:$0x3] %vm2291_vm1, %v2288_v49 }
 0xa0c   :  { %2294 = vst.msk [vmem:[%s3622_s19 + $0x4] sm:$0x3] %vm2291_vm1, %v2289_v51 }
 0xa0d   :  { %2295 = vst.msk [vmem:[%s3622_s19 + $0x6] sm:$0x3] %vm2291_vm1, %v2290_v45 }
 0xa0e   :  { %2727 = dma.done.wait [#allocation5], 32  }
 0xa0f   :  { %2728 = vsyncadd [#allocation5], 4294967264 }
 0xa10   :  { %2315 = vsyncpa [#allocation5], 1 }

</bundles_post_ra>
